<compile_context>
chip_gen: v7x
topology: tpu7x:2x2x1
jax: 0.10.0
libtpu: 0.0.40
codegen_flags: <defaults>
</compile_context>

<pallas_src>
import functools

import jax
import jax.numpy as jnp
from jax.experimental import pallas as pl
from jax.experimental.pallas import tpu as pltpu

DIMENSION = 128          # `dimension` arg of the PyTorch module (lane-aligned)
BATCH = 8                # batch size (BatchNorm1d training semantics need B > 1)
IN_FEATURES = 1152
BN_EPS = 1e-5

# (fan_in, fan_out) of the six Linear layers, in forward order.
def _layer_shapes(dimension):
    return [
        (IN_FEATURES, 512), (512, 256), (256, dimension),      # encoder
        (dimension, 256), (256, 512), (512, IN_FEATURES),      # decoder
    ]


def autoencoder_kernel(
    # inputs
    x_ref,
    gb1, gb2, gb3, gb4, gb5, gb6,          # packed (2, fan_out): row0=gamma, row1=beta
    alphas_ref,                            # (3,) PReLU alphas in SMEM
    w1h, w2h, w3h, w4h, w5h, w6h,          # bf16 weights, left in HBM (pl.ANY)
    # outputs
    enc_ref, dec_ref,
    # scratch: per-layer VMEM weight buffers + DMA semaphores
    wb1, wb2, wb3, wb4, wb5, wb6, sems,
):
    w_hbm = (w1h, w2h, w3h, w4h, w5h, w6h)
    w_buf = (wb1, wb2, wb3, wb4, wb5, wb6)
    gbs = (gb1, gb2, gb3, gb4, gb5, gb6)

    # Kick off all six weight DMAs immediately; each is awaited just before use,
    # so layer-(i+1..5) fetches overlap with layer-i compute.
    copies = [
        pltpu.make_async_copy(w_hbm[i], w_buf[i], sems.at[i]) for i in range(6)
    ]
    for cp in copies:
        cp.start()

    def linear_bn(h, i):
        """bf16 matmul (f32 accum) + training-mode BatchNorm1d (bias-free)."""
        copies[i].wait()
        z = jnp.dot(
            h.astype(jnp.bfloat16), w_buf[i][...],
            preferred_element_type=jnp.float32,
        )
        gb = gbs[i][...]                      # (2, fan_out) f32
        gamma, beta = gb[0:1, :], gb[1:2, :]
        mean = jnp.mean(z, axis=0, keepdims=True)
        msq = jnp.mean(z * z, axis=0, keepdims=True)
        var = jnp.maximum(msq - mean * mean, 0.0)     # one-pass batch variance
        scale = gamma * jax.lax.rsqrt(var + BN_EPS)   # fold gamma into inv-std
        return (z - mean) * scale + beta

    def prelu(h, a):
        return jnp.maximum(h, 0.0) + a * jnp.minimum(h, 0.0)

    x = x_ref[...]

    # ---- encoder: (Linear -> BN -> Sigmoid) x 3 ----
    h = jax.nn.sigmoid(linear_bn(x, 0))
    h = jax.nn.sigmoid(linear_bn(h, 1))
    encoded = jax.nn.sigmoid(linear_bn(h, 2))
    enc_ref[...] = encoded

    # ---- decoder: (Linear -> BN -> PReLU) x 3 ----
    h = prelu(linear_bn(encoded, 3), alphas_ref[0])
    h = prelu(linear_bn(h, 4), alphas_ref[1])
    dec_ref[...] = prelu(linear_bn(h, 5), alphas_ref[2])


def init_params(key, dimension=DIMENSION):
    """Deterministic init mimicking PyTorch defaults.

    Returns:
      params: list of 6 tuples (w_bf16[fan_in,fan_out], b_f32[1,fan_out],
                                gb_f32[2,fan_out]  (row0=gamma, row1=beta))
      alphas: (3,) f32 PReLU parameters (PyTorch default 0.25).
    """
    params = []
    for (fan_in, fan_out) in _layer_shapes(dimension):
        key, kw, kb = jax.random.split(key, 3)
        bound = 1.0 / jnp.sqrt(fan_in)
        w = jax.random.uniform(kw, (fan_in, fan_out), jnp.float32, -bound, bound)
        b = jax.random.uniform(kb, (1, fan_out), jnp.float32, -bound, bound)
        gamma = jnp.ones((1, fan_out), jnp.float32)   # BN weight init
        beta = jnp.zeros((1, fan_out), jnp.float32)   # BN bias init
        gb = jnp.concatenate([gamma, beta], axis=0)   # (2, fan_out)
        params.append((w.astype(jnp.bfloat16), b, gb))
    alphas = jnp.full((3,), 0.25, jnp.float32)
    return params, alphas


@functools.partial(jax.jit, static_argnames=("dimension",))
def autoencoder_forward(x, params, alphas, dimension=DIMENSION):
    batch = x.shape[0]
    weights = [p[0] for p in params]    # bf16, left in HBM
    gbs = [p[2] for p in params]        # small packed f32 vectors -> VMEM
    # (biases p[1] intentionally NOT passed: cancelled by BatchNorm's mean sub.)

    vmem = pl.BlockSpec(memory_space=pltpu.MemorySpace.VMEM)
    smem = pl.BlockSpec(memory_space=pltpu.MemorySpace.SMEM)
    hbm = pl.BlockSpec(memory_space=pl.ANY)

    flat_inputs = [x] + gbs + [alphas] + weights
    in_specs = [vmem] + [vmem] * 6 + [smem] + [hbm] * 6

    out_shapes = (
        jax.ShapeDtypeStruct((batch, dimension), jnp.float32),       # encoded
        jax.ShapeDtypeStruct((batch, IN_FEATURES), jnp.float32),     # decoded
    )

    scratch_shapes = (
        [pltpu.VMEM(s, jnp.bfloat16) for s in _layer_shapes(dimension)]
        + [pltpu.SemaphoreType.DMA((6,))]
    )

    return pl.pallas_call(
        autoencoder_kernel,
        out_shape=out_shapes,
        in_specs=in_specs,
        out_specs=(vmem, vmem),
        scratch_shapes=scratch_shapes,
        compiler_params=pltpu.CompilerParams(vmem_limit_bytes=24 << 20),
    )(*flat_inputs)


def reference_forward(x, params, alphas):
    """Pure-JAX reference replicating the PyTorch forward (training-mode BN).

    Uses the same bf16 weights / bf16 matmul inputs with f32 accumulation, but
    keeps the Linear biases and the classic two-pass BN variance.
    """
    h = x
    encoded = None
    for i, (w, b, gb) in enumerate(params):
        z = jnp.dot(h.astype(jnp.bfloat16), w,
                    preferred_element_type=jnp.float32) + b
        mean = z.mean(0, keepdims=True)
        var = ((z - mean) ** 2).mean(0, keepdims=True)
        zn = gb[0:1] * (z - mean) / jnp.sqrt(var + BN_EPS) + gb[1:2]
        if i < 3:
            h = jax.nn.sigmoid(zn)
            if i == 2:
                encoded = h
        else:
            a = alphas[i - 3]
            h = jnp.maximum(zn, 0.0) + a * jnp.minimum(zn, 0.0)
    return encoded, h


if __name__ == "__main__":
    key = jax.random.PRNGKey(0)
    key_x, key_p = jax.random.split(key)

    x = jax.random.normal(key_x, (BATCH, IN_FEATURES), jnp.float32)
    params, alphas = init_params(key_p, DIMENSION)

    encoded, decoded = autoencoder_forward(x, params, alphas, dimension=DIMENSION)
    jax.block_until_ready((encoded, decoded))

    # correctness check against pure-JAX reference
    enc_ref, dec_ref = reference_forward(x, params, alphas)
    assert encoded.shape == (BATCH, DIMENSION)
    assert decoded.shape == (BATCH, IN_FEATURES)
    assert jnp.allclose(encoded, enc_ref, atol=2e-3, rtol=2e-3)
    assert jnp.allclose(decoded, dec_ref, atol=2e-3, rtol=2e-3)

    print("KERNEL_OK")
</pallas_src>

<mosaic_0001>
module attributes {stable_mosaic.version = 11 : i64} {
  func.func @autoencoder_kernel(%arg0: memref<8x1152xf32, #tpu.memory_space<vmem>>, %arg1: memref<2x512xf32, #tpu.memory_space<vmem>>, %arg2: memref<2x256xf32, #tpu.memory_space<vmem>>, %arg3: memref<2x128xf32, #tpu.memory_space<vmem>>, %arg4: memref<2x256xf32, #tpu.memory_space<vmem>>, %arg5: memref<2x512xf32, #tpu.memory_space<vmem>>, %arg6: memref<2x1152xf32, #tpu.memory_space<vmem>>, %arg7: memref<3xf32, #tpu.memory_space<smem>>, %arg8: memref<1152x512xbf16, #tpu.memory_space<any>>, %arg9: memref<512x256xbf16, #tpu.memory_space<any>>, %arg10: memref<256x128xbf16, #tpu.memory_space<any>>, %arg11: memref<128x256xbf16, #tpu.memory_space<any>>, %arg12: memref<256x512xbf16, #tpu.memory_space<any>>, %arg13: memref<512x1152xbf16, #tpu.memory_space<any>>, %arg14: memref<8x128xf32, #tpu.memory_space<vmem>>, %arg15: memref<8x1152xf32, #tpu.memory_space<vmem>>, %arg16: memref<1152x512xbf16, #tpu.memory_space<vmem>>, %arg17: memref<512x256xbf16, #tpu.memory_space<vmem>>, %arg18: memref<256x128xbf16, #tpu.memory_space<vmem>>, %arg19: memref<128x256xbf16, #tpu.memory_space<vmem>>, %arg20: memref<256x512xbf16, #tpu.memory_space<vmem>>, %arg21: memref<512x1152xbf16, #tpu.memory_space<vmem>>, %arg22: memref<6x!tpu.dma_semaphore, #tpu.memory_space<semaphore_mem>>) attributes {dimension_semantics = [], scalar_prefetch = 0 : i64, scratch_operands = 7 : i64, tpu.core_type = #tpu.core_type<tc>} {
    %c0_i32 = arith.constant 0 : i32
    %0 = tpu.memref_slice %arg22[%c0_i32] : memref<6x!tpu.dma_semaphore, #tpu.memory_space<semaphore_mem>> -> memref<1x!tpu.dma_semaphore, #tpu.memory_space<semaphore_mem>>
    %1 = tpu.memref_squeeze %0 : memref<1x!tpu.dma_semaphore, #tpu.memory_space<semaphore_mem>> -> memref<!tpu.dma_semaphore, #tpu.memory_space<semaphore_mem>>
    tpu.enqueue_dma source(%arg8 : memref<1152x512xbf16, #tpu.memory_space<any>>) target(%arg16 : memref<1152x512xbf16, #tpu.memory_space<vmem>>) target_semaphore(%1 : memref<!tpu.dma_semaphore, #tpu.memory_space<semaphore_mem>>)
    %c1_i32 = arith.constant 1 : i32
    %2 = tpu.memref_slice %arg22[%c1_i32] : memref<6x!tpu.dma_semaphore, #tpu.memory_space<semaphore_mem>> -> memref<1x!tpu.dma_semaphore, #tpu.memory_space<semaphore_mem>>
    %3 = tpu.memref_squeeze %2 : memref<1x!tpu.dma_semaphore, #tpu.memory_space<semaphore_mem>> -> memref<!tpu.dma_semaphore, #tpu.memory_space<semaphore_mem>>
    tpu.enqueue_dma source(%arg9 : memref<512x256xbf16, #tpu.memory_space<any>>) target(%arg17 : memref<512x256xbf16, #tpu.memory_space<vmem>>) target_semaphore(%3 : memref<!tpu.dma_semaphore, #tpu.memory_space<semaphore_mem>>)
    %c2_i32 = arith.constant 2 : i32
    %4 = tpu.memref_slice %arg22[%c2_i32] : memref<6x!tpu.dma_semaphore, #tpu.memory_space<semaphore_mem>> -> memref<1x!tpu.dma_semaphore, #tpu.memory_space<semaphore_mem>>
    %5 = tpu.memref_squeeze %4 : memref<1x!tpu.dma_semaphore, #tpu.memory_space<semaphore_mem>> -> memref<!tpu.dma_semaphore, #tpu.memory_space<semaphore_mem>>
    tpu.enqueue_dma source(%arg10 : memref<256x128xbf16, #tpu.memory_space<any>>) target(%arg18 : memref<256x128xbf16, #tpu.memory_space<vmem>>) target_semaphore(%5 : memref<!tpu.dma_semaphore, #tpu.memory_space<semaphore_mem>>)
    %c3_i32 = arith.constant 3 : i32
    %6 = tpu.memref_slice %arg22[%c3_i32] : memref<6x!tpu.dma_semaphore, #tpu.memory_space<semaphore_mem>> -> memref<1x!tpu.dma_semaphore, #tpu.memory_space<semaphore_mem>>
    %7 = tpu.memref_squeeze %6 : memref<1x!tpu.dma_semaphore, #tpu.memory_space<semaphore_mem>> -> memref<!tpu.dma_semaphore, #tpu.memory_space<semaphore_mem>>
    tpu.enqueue_dma source(%arg11 : memref<128x256xbf16, #tpu.memory_space<any>>) target(%arg19 : memref<128x256xbf16, #tpu.memory_space<vmem>>) target_semaphore(%7 : memref<!tpu.dma_semaphore, #tpu.memory_space<semaphore_mem>>)
    %c4_i32 = arith.constant 4 : i32
    %8 = tpu.memref_slice %arg22[%c4_i32] : memref<6x!tpu.dma_semaphore, #tpu.memory_space<semaphore_mem>> -> memref<1x!tpu.dma_semaphore, #tpu.memory_space<semaphore_mem>>
    %9 = tpu.memref_squeeze %8 : memref<1x!tpu.dma_semaphore, #tpu.memory_space<semaphore_mem>> -> memref<!tpu.dma_semaphore, #tpu.memory_space<semaphore_mem>>
    tpu.enqueue_dma source(%arg12 : memref<256x512xbf16, #tpu.memory_space<any>>) target(%arg20 : memref<256x512xbf16, #tpu.memory_space<vmem>>) target_semaphore(%9 : memref<!tpu.dma_semaphore, #tpu.memory_space<semaphore_mem>>)
    %c5_i32 = arith.constant 5 : i32
    %10 = tpu.memref_slice %arg22[%c5_i32] : memref<6x!tpu.dma_semaphore, #tpu.memory_space<semaphore_mem>> -> memref<1x!tpu.dma_semaphore, #tpu.memory_space<semaphore_mem>>
    %11 = tpu.memref_squeeze %10 : memref<1x!tpu.dma_semaphore, #tpu.memory_space<semaphore_mem>> -> memref<!tpu.dma_semaphore, #tpu.memory_space<semaphore_mem>>
    tpu.enqueue_dma source(%arg13 : memref<512x1152xbf16, #tpu.memory_space<any>>) target(%arg21 : memref<512x1152xbf16, #tpu.memory_space<vmem>>) target_semaphore(%11 : memref<!tpu.dma_semaphore, #tpu.memory_space<semaphore_mem>>)
    %c0 = arith.constant 0 : index
    %c0_0 = arith.constant 0 : index
    %12 = vector.load %arg0[%c0, %c0_0] : memref<8x1152xf32, #tpu.memory_space<vmem>>, vector<8x1152xf32>
    %c0_i32_1 = arith.constant 0 : i32
    %13 = tpu.memref_slice %arg22[%c0_i32_1] : memref<6x!tpu.dma_semaphore, #tpu.memory_space<semaphore_mem>> -> memref<1x!tpu.dma_semaphore, #tpu.memory_space<semaphore_mem>>
    %14 = tpu.memref_squeeze %13 : memref<1x!tpu.dma_semaphore, #tpu.memory_space<semaphore_mem>> -> memref<!tpu.dma_semaphore, #tpu.memory_space<semaphore_mem>>
    tpu.wait_dma2 semaphore(%14 : memref<!tpu.dma_semaphore, #tpu.memory_space<semaphore_mem>>) src(%arg8 : memref<1152x512xbf16, #tpu.memory_space<any>>) dst(%arg16 : memref<1152x512xbf16, #tpu.memory_space<vmem>>)
    %15 = arith.truncf %12 : vector<8x1152xf32> to vector<8x1152xbf16>
    %c0_2 = arith.constant 0 : index
    %c0_3 = arith.constant 0 : index
    %16 = vector.load %arg16[%c0_2, %c0_3] : memref<1152x512xbf16, #tpu.memory_space<vmem>>, vector<1152x512xbf16>
    %cst = arith.constant dense<0.000000e+00> : vector<8x512xf32>
    %17 = tpu.matmul %15, %16, %cst {dimension_numbers = #tpu.dot_dimension_numbers<[1], [0], [0], [1], [0, 0, 1, 1], [], []>} : vector<8x1152xbf16>, vector<1152x512xbf16>, vector<8x512xf32> -> vector<8x512xf32>
    %c0_4 = arith.constant 0 : index
    %c0_5 = arith.constant 0 : index
    %18 = vector.load %arg1[%c0_4, %c0_5] : memref<2x512xf32, #tpu.memory_space<vmem>>, vector<2x512xf32>
    %19 = vector.extract_strided_slice %18 {offsets = [0, 0], sizes = [1, 512], strides = [1, 1]} : vector<2x512xf32> to vector<1x512xf32>
    %20 = vector.extract_strided_slice %18 {offsets = [1, 0], sizes = [1, 512], strides = [1, 1]} : vector<2x512xf32> to vector<1x512xf32>
    %cst_6 = arith.constant dense<0.000000e+00> : vector<512xf32>
    %21 = vector.multi_reduction <add>, %17, %cst_6 [0] : vector<8x512xf32> to vector<512xf32>
    %22 = vector.shape_cast %21 : vector<512xf32> to vector<1x512xf32>
    %cst_7 = arith.constant 8.000000e+00 : f32
    %23 = vector.broadcast %cst_7 : f32 to vector<1x512xf32>
    %24 = arith.divf %22, %23 : vector<1x512xf32>
    %25 = arith.mulf %17, %17 : vector<8x512xf32>
    %cst_8 = arith.constant dense<0.000000e+00> : vector<512xf32>
    %26 = vector.multi_reduction <add>, %25, %cst_8 [0] : vector<8x512xf32> to vector<512xf32>
    %27 = vector.shape_cast %26 : vector<512xf32> to vector<1x512xf32>
    %cst_9 = arith.constant 8.000000e+00 : f32
    %28 = vector.broadcast %cst_9 : f32 to vector<1x512xf32>
    %29 = arith.divf %27, %28 : vector<1x512xf32>
    %30 = arith.mulf %24, %24 : vector<1x512xf32>
    %31 = arith.subf %29, %30 : vector<1x512xf32>
    %cst_10 = arith.constant 0.000000e+00 : f32
    %32 = vector.broadcast %cst_10 : f32 to vector<1x512xf32>
    %33 = arith.maximumf %31, %32 : vector<1x512xf32>
    %cst_11 = arith.constant 9.99999974E-6 : f32
    %34 = vector.broadcast %cst_11 : f32 to vector<1x512xf32>
    %35 = arith.addf %33, %34 : vector<1x512xf32>
    %36 = math.rsqrt %35 : vector<1x512xf32>
    %37 = arith.mulf %19, %36 : vector<1x512xf32>
    %38 = vector.broadcast %24 : vector<1x512xf32> to vector<8x512xf32>
    %39 = arith.subf %17, %38 : vector<8x512xf32>
    %40 = vector.broadcast %37 : vector<1x512xf32> to vector<8x512xf32>
    %41 = arith.mulf %39, %40 : vector<8x512xf32>
    %42 = vector.broadcast %20 : vector<1x512xf32> to vector<8x512xf32>
    %43 = arith.addf %41, %42 : vector<8x512xf32>
    %44 = arith.negf %43 : vector<8x512xf32>
    %45 = math.exp %44 : vector<8x512xf32>
    %cst_12 = arith.constant 1.000000e+00 : f32
    %46 = vector.broadcast %cst_12 : f32 to vector<8x512xf32>
    %47 = arith.addf %46, %45 : vector<8x512xf32>
    %48 = arith.divf %46, %47 : vector<8x512xf32>
    %c1_i32_13 = arith.constant 1 : i32
    %49 = tpu.memref_slice %arg22[%c1_i32_13] : memref<6x!tpu.dma_semaphore, #tpu.memory_space<semaphore_mem>> -> memref<1x!tpu.dma_semaphore, #tpu.memory_space<semaphore_mem>>
    %50 = tpu.memref_squeeze %49 : memref<1x!tpu.dma_semaphore, #tpu.memory_space<semaphore_mem>> -> memref<!tpu.dma_semaphore, #tpu.memory_space<semaphore_mem>>
    tpu.wait_dma2 semaphore(%50 : memref<!tpu.dma_semaphore, #tpu.memory_space<semaphore_mem>>) src(%arg9 : memref<512x256xbf16, #tpu.memory_space<any>>) dst(%arg17 : memref<512x256xbf16, #tpu.memory_space<vmem>>)
    %51 = arith.truncf %48 : vector<8x512xf32> to vector<8x512xbf16>
    %c0_14 = arith.constant 0 : index
    %c0_15 = arith.constant 0 : index
    %52 = vector.load %arg17[%c0_14, %c0_15] : memref<512x256xbf16, #tpu.memory_space<vmem>>, vector<512x256xbf16>
    %cst_16 = arith.constant dense<0.000000e+00> : vector<8x256xf32>
    %53 = tpu.matmul %51, %52, %cst_16 {dimension_numbers = #tpu.dot_dimension_numbers<[1], [0], [0], [1], [0, 0, 1, 1], [], []>} : vector<8x512xbf16>, vector<512x256xbf16>, vector<8x256xf32> -> vector<8x256xf32>
    %c0_17 = arith.constant 0 : index
    %c0_18 = arith.constant 0 : index
    %54 = vector.load %arg2[%c0_17, %c0_18] : memref<2x256xf32, #tpu.memory_space<vmem>>, vector<2x256xf32>
    %55 = vector.extract_strided_slice %54 {offsets = [0, 0], sizes = [1, 256], strides = [1, 1]} : vector<2x256xf32> to vector<1x256xf32>
    %56 = vector.extract_strided_slice %54 {offsets = [1, 0], sizes = [1, 256], strides = [1, 1]} : vector<2x256xf32> to vector<1x256xf32>
    %cst_19 = arith.constant dense<0.000000e+00> : vector<256xf32>
    %57 = vector.multi_reduction <add>, %53, %cst_19 [0] : vector<8x256xf32> to vector<256xf32>
    %58 = vector.shape_cast %57 : vector<256xf32> to vector<1x256xf32>
    %cst_20 = arith.constant 8.000000e+00 : f32
    %59 = vector.broadcast %cst_20 : f32 to vector<1x256xf32>
    %60 = arith.divf %58, %59 : vector<1x256xf32>
    %61 = arith.mulf %53, %53 : vector<8x256xf32>
    %cst_21 = arith.constant dense<0.000000e+00> : vector<256xf32>
    %62 = vector.multi_reduction <add>, %61, %cst_21 [0] : vector<8x256xf32> to vector<256xf32>
    %63 = vector.shape_cast %62 : vector<256xf32> to vector<1x256xf32>
    %cst_22 = arith.constant 8.000000e+00 : f32
    %64 = vector.broadcast %cst_22 : f32 to vector<1x256xf32>
    %65 = arith.divf %63, %64 : vector<1x256xf32>
    %66 = arith.mulf %60, %60 : vector<1x256xf32>
    %67 = arith.subf %65, %66 : vector<1x256xf32>
    %cst_23 = arith.constant 0.000000e+00 : f32
    %68 = vector.broadcast %cst_23 : f32 to vector<1x256xf32>
    %69 = arith.maximumf %67, %68 : vector<1x256xf32>
    %cst_24 = arith.constant 9.99999974E-6 : f32
    %70 = vector.broadcast %cst_24 : f32 to vector<1x256xf32>
    %71 = arith.addf %69, %70 : vector<1x256xf32>
    %72 = math.rsqrt %71 : vector<1x256xf32>
    %73 = arith.mulf %55, %72 : vector<1x256xf32>
    %74 = vector.broadcast %60 : vector<1x256xf32> to vector<8x256xf32>
    %75 = arith.subf %53, %74 : vector<8x256xf32>
    %76 = vector.broadcast %73 : vector<1x256xf32> to vector<8x256xf32>
    %77 = arith.mulf %75, %76 : vector<8x256xf32>
    %78 = vector.broadcast %56 : vector<1x256xf32> to vector<8x256xf32>
    %79 = arith.addf %77, %78 : vector<8x256xf32>
    %80 = arith.negf %79 : vector<8x256xf32>
    %81 = math.exp %80 : vector<8x256xf32>
    %cst_25 = arith.constant 1.000000e+00 : f32
    %82 = vector.broadcast %cst_25 : f32 to vector<8x256xf32>
    %83 = arith.addf %82, %81 : vector<8x256xf32>
    %84 = arith.divf %82, %83 : vector<8x256xf32>
    %c2_i32_26 = arith.constant 2 : i32
    %85 = tpu.memref_slice %arg22[%c2_i32_26] : memref<6x!tpu.dma_semaphore, #tpu.memory_space<semaphore_mem>> -> memref<1x!tpu.dma_semaphore, #tpu.memory_space<semaphore_mem>>
    %86 = tpu.memref_squeeze %85 : memref<1x!tpu.dma_semaphore, #tpu.memory_space<semaphore_mem>> -> memref<!tpu.dma_semaphore, #tpu.memory_space<semaphore_mem>>
    tpu.wait_dma2 semaphore(%86 : memref<!tpu.dma_semaphore, #tpu.memory_space<semaphore_mem>>) src(%arg10 : memref<256x128xbf16, #tpu.memory_space<any>>) dst(%arg18 : memref<256x128xbf16, #tpu.memory_space<vmem>>)
    %87 = arith.truncf %84 : vector<8x256xf32> to vector<8x256xbf16>
    %c0_27 = arith.constant 0 : index
    %c0_28 = arith.constant 0 : index
    %88 = vector.load %arg18[%c0_27, %c0_28] : memref<256x128xbf16, #tpu.memory_space<vmem>>, vector<256x128xbf16>
    %cst_29 = arith.constant dense<0.000000e+00> : vector<8x128xf32>
    %89 = tpu.matmul %87, %88, %cst_29 {dimension_numbers = #tpu.dot_dimension_numbers<[1], [0], [0], [1], [0, 0, 1, 1], [], []>} : vector<8x256xbf16>, vector<256x128xbf16>, vector<8x128xf32> -> vector<8x128xf32>
    %c0_30 = arith.constant 0 : index
    %c0_31 = arith.constant 0 : index
    %90 = vector.load %arg3[%c0_30, %c0_31] : memref<2x128xf32, #tpu.memory_space<vmem>>, vector<2x128xf32>
    %91 = vector.extract_strided_slice %90 {offsets = [0, 0], sizes = [1, 128], strides = [1, 1]} : vector<2x128xf32> to vector<1x128xf32>
    %92 = vector.extract_strided_slice %90 {offsets = [1, 0], sizes = [1, 128], strides = [1, 1]} : vector<2x128xf32> to vector<1x128xf32>
    %cst_32 = arith.constant dense<0.000000e+00> : vector<128xf32>
    %93 = vector.multi_reduction <add>, %89, %cst_32 [0] : vector<8x128xf32> to vector<128xf32>
    %94 = vector.shape_cast %93 : vector<128xf32> to vector<1x128xf32>
    %cst_33 = arith.constant 8.000000e+00 : f32
    %95 = vector.broadcast %cst_33 : f32 to vector<1x128xf32>
    %96 = arith.divf %94, %95 : vector<1x128xf32>
    %97 = arith.mulf %89, %89 : vector<8x128xf32>
    %cst_34 = arith.constant dense<0.000000e+00> : vector<128xf32>
    %98 = vector.multi_reduction <add>, %97, %cst_34 [0] : vector<8x128xf32> to vector<128xf32>
    %99 = vector.shape_cast %98 : vector<128xf32> to vector<1x128xf32>
    %cst_35 = arith.constant 8.000000e+00 : f32
    %100 = vector.broadcast %cst_35 : f32 to vector<1x128xf32>
    %101 = arith.divf %99, %100 : vector<1x128xf32>
    %102 = arith.mulf %96, %96 : vector<1x128xf32>
    %103 = arith.subf %101, %102 : vector<1x128xf32>
    %cst_36 = arith.constant 0.000000e+00 : f32
    %104 = vector.broadcast %cst_36 : f32 to vector<1x128xf32>
    %105 = arith.maximumf %103, %104 : vector<1x128xf32>
    %cst_37 = arith.constant 9.99999974E-6 : f32
    %106 = vector.broadcast %cst_37 : f32 to vector<1x128xf32>
    %107 = arith.addf %105, %106 : vector<1x128xf32>
    %108 = math.rsqrt %107 : vector<1x128xf32>
    %109 = arith.mulf %91, %108 : vector<1x128xf32>
    %110 = vector.broadcast %96 : vector<1x128xf32> to vector<8x128xf32>
    %111 = arith.subf %89, %110 : vector<8x128xf32>
    %112 = vector.broadcast %109 : vector<1x128xf32> to vector<8x128xf32>
    %113 = arith.mulf %111, %112 : vector<8x128xf32>
    %114 = vector.broadcast %92 : vector<1x128xf32> to vector<8x128xf32>
    %115 = arith.addf %113, %114 : vector<8x128xf32>
    %116 = arith.negf %115 : vector<8x128xf32>
    %117 = math.exp %116 : vector<8x128xf32>
    %cst_38 = arith.constant 1.000000e+00 : f32
    %118 = vector.broadcast %cst_38 : f32 to vector<8x128xf32>
    %119 = arith.addf %118, %117 : vector<8x128xf32>
    %120 = arith.divf %118, %119 : vector<8x128xf32>
    %c0_39 = arith.constant 0 : index
    %c0_40 = arith.constant 0 : index
    %121 = vector.load %arg14[%c0_39, %c0_40] : memref<8x128xf32, #tpu.memory_space<vmem>>, vector<8x128xf32>
    tpu.vector_store %arg14[%c0_39, %c0_40], %120 {strides = array<i32>} : memref<8x128xf32, #tpu.memory_space<vmem>>, vector<8x128xf32>,
    %c3_i32_41 = arith.constant 3 : i32
    %122 = tpu.memref_slice %arg22[%c3_i32_41] : memref<6x!tpu.dma_semaphore, #tpu.memory_space<semaphore_mem>> -> memref<1x!tpu.dma_semaphore, #tpu.memory_space<semaphore_mem>>
    %123 = tpu.memref_squeeze %122 : memref<1x!tpu.dma_semaphore, #tpu.memory_space<semaphore_mem>> -> memref<!tpu.dma_semaphore, #tpu.memory_space<semaphore_mem>>
    tpu.wait_dma2 semaphore(%123 : memref<!tpu.dma_semaphore, #tpu.memory_space<semaphore_mem>>) src(%arg11 : memref<128x256xbf16, #tpu.memory_space<any>>) dst(%arg19 : memref<128x256xbf16, #tpu.memory_space<vmem>>)
    %124 = arith.truncf %120 : vector<8x128xf32> to vector<8x128xbf16>
    %c0_42 = arith.constant 0 : index
    %c0_43 = arith.constant 0 : index
    %125 = vector.load %arg19[%c0_42, %c0_43] : memref<128x256xbf16, #tpu.memory_space<vmem>>, vector<128x256xbf16>
    %cst_44 = arith.constant dense<0.000000e+00> : vector<8x256xf32>
    %126 = tpu.matmul %124, %125, %cst_44 {dimension_numbers = #tpu.dot_dimension_numbers<[1], [0], [0], [1], [0, 0, 1, 1], [], []>} : vector<8x128xbf16>, vector<128x256xbf16>, vector<8x256xf32> -> vector<8x256xf32>
    %c0_45 = arith.constant 0 : index
    %c0_46 = arith.constant 0 : index
    %127 = vector.load %arg4[%c0_45, %c0_46] : memref<2x256xf32, #tpu.memory_space<vmem>>, vector<2x256xf32>
    %128 = vector.extract_strided_slice %127 {offsets = [0, 0], sizes = [1, 256], strides = [1, 1]} : vector<2x256xf32> to vector<1x256xf32>
    %129 = vector.extract_strided_slice %127 {offsets = [1, 0], sizes = [1, 256], strides = [1, 1]} : vector<2x256xf32> to vector<1x256xf32>
    %cst_47 = arith.constant dense<0.000000e+00> : vector<256xf32>
    %130 = vector.multi_reduction <add>, %126, %cst_47 [0] : vector<8x256xf32> to vector<256xf32>
    %131 = vector.shape_cast %130 : vector<256xf32> to vector<1x256xf32>
    %cst_48 = arith.constant 8.000000e+00 : f32
    %132 = vector.broadcast %cst_48 : f32 to vector<1x256xf32>
    %133 = arith.divf %131, %132 : vector<1x256xf32>
    %134 = arith.mulf %126, %126 : vector<8x256xf32>
    %cst_49 = arith.constant dense<0.000000e+00> : vector<256xf32>
    %135 = vector.multi_reduction <add>, %134, %cst_49 [0] : vector<8x256xf32> to vector<256xf32>
    %136 = vector.shape_cast %135 : vector<256xf32> to vector<1x256xf32>
    %cst_50 = arith.constant 8.000000e+00 : f32
    %137 = vector.broadcast %cst_50 : f32 to vector<1x256xf32>
    %138 = arith.divf %136, %137 : vector<1x256xf32>
    %139 = arith.mulf %133, %133 : vector<1x256xf32>
    %140 = arith.subf %138, %139 : vector<1x256xf32>
    %cst_51 = arith.constant 0.000000e+00 : f32
    %141 = vector.broadcast %cst_51 : f32 to vector<1x256xf32>
    %142 = arith.maximumf %140, %141 : vector<1x256xf32>
    %cst_52 = arith.constant 9.99999974E-6 : f32
    %143 = vector.broadcast %cst_52 : f32 to vector<1x256xf32>
    %144 = arith.addf %142, %143 : vector<1x256xf32>
    %145 = math.rsqrt %144 : vector<1x256xf32>
    %146 = arith.mulf %128, %145 : vector<1x256xf32>
    %147 = vector.broadcast %133 : vector<1x256xf32> to vector<8x256xf32>
    %148 = arith.subf %126, %147 : vector<8x256xf32>
    %149 = vector.broadcast %146 : vector<1x256xf32> to vector<8x256xf32>
    %150 = arith.mulf %148, %149 : vector<8x256xf32>
    %151 = vector.broadcast %129 : vector<1x256xf32> to vector<8x256xf32>
    %152 = arith.addf %150, %151 : vector<8x256xf32>
    %c0_53 = arith.constant 0 : index
    %153 = memref.load %arg7[%c0_53] : memref<3xf32, #tpu.memory_space<smem>>
    %cst_54 = arith.constant 0.000000e+00 : f32
    %154 = vector.broadcast %cst_54 : f32 to vector<8x256xf32>
    %155 = arith.maximumf %152, %154 : vector<8x256xf32>
    %cst_55 = arith.constant 0.000000e+00 : f32
    %156 = vector.broadcast %cst_55 : f32 to vector<8x256xf32>
    %157 = arith.minimumf %152, %156 : vector<8x256xf32>
    %158 = vector.broadcast %153 : f32 to vector<8x256xf32>
    %159 = arith.mulf %158, %157 : vector<8x256xf32>
    %160 = arith.addf %155, %159 : vector<8x256xf32>
    %c4_i32_56 = arith.constant 4 : i32
    %161 = tpu.memref_slice %arg22[%c4_i32_56] : memref<6x!tpu.dma_semaphore, #tpu.memory_space<semaphore_mem>> -> memref<1x!tpu.dma_semaphore, #tpu.memory_space<semaphore_mem>>
    %162 = tpu.memref_squeeze %161 : memref<1x!tpu.dma_semaphore, #tpu.memory_space<semaphore_mem>> -> memref<!tpu.dma_semaphore, #tpu.memory_space<semaphore_mem>>
    tpu.wait_dma2 semaphore(%162 : memref<!tpu.dma_semaphore, #tpu.memory_space<semaphore_mem>>) src(%arg12 : memref<256x512xbf16, #tpu.memory_space<any>>) dst(%arg20 : memref<256x512xbf16, #tpu.memory_space<vmem>>)
    %163 = arith.truncf %160 : vector<8x256xf32> to vector<8x256xbf16>
    %c0_57 = arith.constant 0 : index
    %c0_58 = arith.constant 0 : index
    %164 = vector.load %arg20[%c0_57, %c0_58] : memref<256x512xbf16, #tpu.memory_space<vmem>>, vector<256x512xbf16>
    %cst_59 = arith.constant dense<0.000000e+00> : vector<8x512xf32>
    %165 = tpu.matmul %163, %164, %cst_59 {dimension_numbers = #tpu.dot_dimension_numbers<[1], [0], [0], [1], [0, 0, 1, 1], [], []>} : vector<8x256xbf16>, vector<256x512xbf16>, vector<8x512xf32> -> vector<8x512xf32>
    %c0_60 = arith.constant 0 : index
    %c0_61 = arith.constant 0 : index
    %166 = vector.load %arg5[%c0_60, %c0_61] : memref<2x512xf32, #tpu.memory_space<vmem>>, vector<2x512xf32>
    %167 = vector.extract_strided_slice %166 {offsets = [0, 0], sizes = [1, 512], strides = [1, 1]} : vector<2x512xf32> to vector<1x512xf32>
    %168 = vector.extract_strided_slice %166 {offsets = [1, 0], sizes = [1, 512], strides = [1, 1]} : vector<2x512xf32> to vector<1x512xf32>
    %cst_62 = arith.constant dense<0.000000e+00> : vector<512xf32>
    %169 = vector.multi_reduction <add>, %165, %cst_62 [0] : vector<8x512xf32> to vector<512xf32>
    %170 = vector.shape_cast %169 : vector<512xf32> to vector<1x512xf32>
    %cst_63 = arith.constant 8.000000e+00 : f32
    %171 = vector.broadcast %cst_63 : f32 to vector<1x512xf32>
    %172 = arith.divf %170, %171 : vector<1x512xf32>
    %173 = arith.mulf %165, %165 : vector<8x512xf32>
    %cst_64 = arith.constant dense<0.000000e+00> : vector<512xf32>
    %174 = vector.multi_reduction <add>, %173, %cst_64 [0] : vector<8x512xf32> to vector<512xf32>
    %175 = vector.shape_cast %174 : vector<512xf32> to vector<1x512xf32>
    %cst_65 = arith.constant 8.000000e+00 : f32
    %176 = vector.broadcast %cst_65 : f32 to vector<1x512xf32>
    %177 = arith.divf %175, %176 : vector<1x512xf32>
    %178 = arith.mulf %172, %172 : vector<1x512xf32>
    %179 = arith.subf %177, %178 : vector<1x512xf32>
    %cst_66 = arith.constant 0.000000e+00 : f32
    %180 = vector.broadcast %cst_66 : f32 to vector<1x512xf32>
    %181 = arith.maximumf %179, %180 : vector<1x512xf32>
    %cst_67 = arith.constant 9.99999974E-6 : f32
    %182 = vector.broadcast %cst_67 : f32 to vector<1x512xf32>
    %183 = arith.addf %181, %182 : vector<1x512xf32>
    %184 = math.rsqrt %183 : vector<1x512xf32>
    %185 = arith.mulf %167, %184 : vector<1x512xf32>
    %186 = vector.broadcast %172 : vector<1x512xf32> to vector<8x512xf32>
    %187 = arith.subf %165, %186 : vector<8x512xf32>
    %188 = vector.broadcast %185 : vector<1x512xf32> to vector<8x512xf32>
    %189 = arith.mulf %187, %188 : vector<8x512xf32>
    %190 = vector.broadcast %168 : vector<1x512xf32> to vector<8x512xf32>
    %191 = arith.addf %189, %190 : vector<8x512xf32>
    %c1 = arith.constant 1 : index
    %192 = memref.load %arg7[%c1] : memref<3xf32, #tpu.memory_space<smem>>
    %cst_68 = arith.constant 0.000000e+00 : f32
    %193 = vector.broadcast %cst_68 : f32 to vector<8x512xf32>
    %194 = arith.maximumf %191, %193 : vector<8x512xf32>
    %cst_69 = arith.constant 0.000000e+00 : f32
    %195 = vector.broadcast %cst_69 : f32 to vector<8x512xf32>
    %196 = arith.minimumf %191, %195 : vector<8x512xf32>
    %197 = vector.broadcast %192 : f32 to vector<8x512xf32>
    %198 = arith.mulf %197, %196 : vector<8x512xf32>
    %199 = arith.addf %194, %198 : vector<8x512xf32>
    %c5_i32_70 = arith.constant 5 : i32
    %200 = tpu.memref_slice %arg22[%c5_i32_70] : memref<6x!tpu.dma_semaphore, #tpu.memory_space<semaphore_mem>> -> memref<1x!tpu.dma_semaphore, #tpu.memory_space<semaphore_mem>>
    %201 = tpu.memref_squeeze %200 : memref<1x!tpu.dma_semaphore, #tpu.memory_space<semaphore_mem>> -> memref<!tpu.dma_semaphore, #tpu.memory_space<semaphore_mem>>
    tpu.wait_dma2 semaphore(%201 : memref<!tpu.dma_semaphore, #tpu.memory_space<semaphore_mem>>) src(%arg13 : memref<512x1152xbf16, #tpu.memory_space<any>>) dst(%arg21 : memref<512x1152xbf16, #tpu.memory_space<vmem>>)
    %202 = arith.truncf %199 : vector<8x512xf32> to vector<8x512xbf16>
    %c0_71 = arith.constant 0 : index
    %c0_72 = arith.constant 0 : index
    %203 = vector.load %arg21[%c0_71, %c0_72] : memref<512x1152xbf16, #tpu.memory_space<vmem>>, vector<512x1152xbf16>
    %cst_73 = arith.constant dense<0.000000e+00> : vector<8x1152xf32>
    %204 = tpu.matmul %202, %203, %cst_73 {dimension_numbers = #tpu.dot_dimension_numbers<[1], [0], [0], [1], [0, 0, 1, 1], [], []>} : vector<8x512xbf16>, vector<512x1152xbf16>, vector<8x1152xf32> -> vector<8x1152xf32>
    %c0_74 = arith.constant 0 : index
    %c0_75 = arith.constant 0 : index
    %205 = vector.load %arg6[%c0_74, %c0_75] : memref<2x1152xf32, #tpu.memory_space<vmem>>, vector<2x1152xf32>
    %206 = vector.extract_strided_slice %205 {offsets = [0, 0], sizes = [1, 1152], strides = [1, 1]} : vector<2x1152xf32> to vector<1x1152xf32>
    %207 = vector.extract_strided_slice %205 {offsets = [1, 0], sizes = [1, 1152], strides = [1, 1]} : vector<2x1152xf32> to vector<1x1152xf32>
    %cst_76 = arith.constant dense<0.000000e+00> : vector<1152xf32>
    %208 = vector.multi_reduction <add>, %204, %cst_76 [0] : vector<8x1152xf32> to vector<1152xf32>
    %209 = vector.shape_cast %208 : vector<1152xf32> to vector<1x1152xf32>
    %cst_77 = arith.constant 8.000000e+00 : f32
    %210 = vector.broadcast %cst_77 : f32 to vector<1x1152xf32>
    %211 = arith.divf %209, %210 : vector<1x1152xf32>
    %212 = arith.mulf %204, %204 : vector<8x1152xf32>
    %cst_78 = arith.constant dense<0.000000e+00> : vector<1152xf32>
    %213 = vector.multi_reduction <add>, %212, %cst_78 [0] : vector<8x1152xf32> to vector<1152xf32>
    %214 = vector.shape_cast %213 : vector<1152xf32> to vector<1x1152xf32>
    %cst_79 = arith.constant 8.000000e+00 : f32
    %215 = vector.broadcast %cst_79 : f32 to vector<1x1152xf32>
    %216 = arith.divf %214, %215 : vector<1x1152xf32>
    %217 = arith.mulf %211, %211 : vector<1x1152xf32>
    %218 = arith.subf %216, %217 : vector<1x1152xf32>
    %cst_80 = arith.constant 0.000000e+00 : f32
    %219 = vector.broadcast %cst_80 : f32 to vector<1x1152xf32>
    %220 = arith.maximumf %218, %219 : vector<1x1152xf32>
    %cst_81 = arith.constant 9.99999974E-6 : f32
    %221 = vector.broadcast %cst_81 : f32 to vector<1x1152xf32>
    %222 = arith.addf %220, %221 : vector<1x1152xf32>
    %223 = math.rsqrt %222 : vector<1x1152xf32>
    %224 = arith.mulf %206, %223 : vector<1x1152xf32>
    %225 = vector.broadcast %211 : vector<1x1152xf32> to vector<8x1152xf32>
    %226 = arith.subf %204, %225 : vector<8x1152xf32>
    %227 = vector.broadcast %224 : vector<1x1152xf32> to vector<8x1152xf32>
    %228 = arith.mulf %226, %227 : vector<8x1152xf32>
    %229 = vector.broadcast %207 : vector<1x1152xf32> to vector<8x1152xf32>
    %230 = arith.addf %228, %229 : vector<8x1152xf32>
    %c2 = arith.constant 2 : index
    %231 = memref.load %arg7[%c2] : memref<3xf32, #tpu.memory_space<smem>>
    %cst_82 = arith.constant 0.000000e+00 : f32
    %232 = vector.broadcast %cst_82 : f32 to vector<8x1152xf32>
    %233 = arith.maximumf %230, %232 : vector<8x1152xf32>
    %cst_83 = arith.constant 0.000000e+00 : f32
    %234 = vector.broadcast %cst_83 : f32 to vector<8x1152xf32>
    %235 = arith.minimumf %230, %234 : vector<8x1152xf32>
    %236 = vector.broadcast %231 : f32 to vector<8x1152xf32>
    %237 = arith.mulf %236, %235 : vector<8x1152xf32>
    %238 = arith.addf %233, %237 : vector<8x1152xf32>
    %c0_84 = arith.constant 0 : index
    %c0_85 = arith.constant 0 : index
    %239 = vector.load %arg15[%c0_84, %c0_85] : memref<8x1152xf32, #tpu.memory_space<vmem>>, vector<8x1152xf32>
    tpu.vector_store %arg15[%c0_84, %c0_85], %238 {strides = array<i32>} : memref<8x1152xf32, #tpu.memory_space<vmem>>, vector<8x1152xf32>,
    return
  }
}

</mosaic_0001>

<bundles_post_ra>
// kernel: autoencoder_forward.1
= control target key start
LH: loop header
LB: loop body
LE: loop exit
PB: predicated region body
PF: predicated region fallthrough
CT: control target
= control target key end

     0   :  { %21 = vsyncpa [#allocation10], 0  ;;  %s4617_s0 = inlined_call_operand.hbm [shape: f32[8,1152], index: 0, kind: input, shape index: {}]   ;;  %s4618_s1 = inlined_call_operand.hbm [shape: f32[2,512], index: 1, kind: input, shape index: {}]   ;;  %s4619_s2 = inlined_call_operand.hbm [shape: f32[2,256], index: 2, kind: input, shape index: {}]   ;;  %s4620_s3 = inlined_call_operand.hbm [shape: f32[2,128], index: 3, kind: input, shape index: {}]   ;;  %s4621_s4 = inlined_call_operand.hbm [shape: f32[2,256], index: 4, kind: input, shape index: {}]   ;;  %s4622_s5 = inlined_call_operand.hbm [shape: f32[2,512], index: 5, kind: input, shape index: {}]   ;;  %s4623_s6 = inlined_call_operand.hbm [shape: f32[2,1152], index: 6, kind: input, shape index: {}]   ;;  %s4624_s7 = inlined_call_operand.hbm [shape: f32[3], index: 7, kind: input, shape index: {}]   ;;  %s4625_s8 = inlined_call_operand.hbm [shape: bf16[1152,512], index: 8, kind: input, shape index: {}]   ;;  %s4626_s9 = inlined_call_operand.hbm [shape: bf16[512,256], index: 9, kind: input, shape index: {}]   ;;  %s4627_s10 = inlined_call_operand.hbm [shape: bf16[256,128], index: 10, kind: input, shape index: {}]   ;;  %s4628_s11 = inlined_call_operand.hbm [shape: bf16[128,256], index: 11, kind: input, shape index: {}]   ;;  %s4629_s12 = inlined_call_operand.hbm [shape: bf16[256,512], index: 12, kind: input, shape index: {}]   ;;  %s4630_s13 = inlined_call_operand.hbm [shape: bf16[512,1152], index: 13, kind: input, shape index: {}]   ;;  %s4631_s14 = inlined_call_operand.hbm [shape: f32[8,128], index: 14, kind: output, shape index: {0}]   ;;  %s4632_s15 = inlined_call_operand.hbm [shape: f32[8,1152], index: 15, kind: output, shape index: {1}]  }
   0x1   :  { %22 = vsyncpa [#allocation14], 0 }
   0x2   :  { %23 = vsyncpa [#allocation17], 0 }
   0x3   :  { %24 = vsyncpa [#allocation20], 0 }
   0x4   :  { %25 = vsyncpa [#allocation12], 0 }
   0x5   :  { %26 = vsyncpa [#allocation11], 0 }
   0x6   :  { %27 = vsyncpa [#allocation25], 0  ;;  %s3913_s18 = smov [#allocation13]   ;;  %s3914_s20 = smov [#allocation16]  }
   0x7   :  { %s44_s19 = sshll.u32 %s3913_s18, 4  ;;  %s64_s21 = sshll.u32 %s3914_s20, 4  ;;  %s45_s19 = int_to_ptr.vmem [resolvable:$true] %s44_s19  ;;  %s65_s21 = int_to_ptr.vmem [resolvable:$true] %s64_s21 }
   0x8   :  { %s3657_s24 = scalar_lea.hbm %s4618_s1, 128 }
   0x9   :  { %p3658_p0 = scmp.ne.s32.totalorder %s4618_s1, %s3657_s24  ;;  %p3661_p1 = scmp.lt.u32.totalorder %s3657_s24, %s4618_s1 }
   0xb   :  { %p3663_p2 = pnand %p3661_p1, %p3658_p0 }
   0xd   :  { %3666 = shalt.err (!%p3663_p2)
}
   0xe   :  { %s3667_s29 = scalar_lea.vmem %s45_s19, 128  ;;  %p3672_p4 = scmp.lt.s32.totalorder %s45_s19, %s45_s19 }
   0xf   :  { %p3668_p3 = scmp.ne.s32.totalorder %s45_s19, %s3667_s29  ;;  %p3673_p5 = scmp.lt.s32.totalorder %s3667_s29, %s3667_s29 }
  0x11   :  { %p3674_p6 = por %p3673_p5, %p3672_p4 }
  0x13   :  { %p3675_p7 = pnand %p3674_p6, %p3668_p3 }
  0x15   :  { %3678 = shalt.err (!%p3675_p7)
}
  0x16   :  { %47 = dma.hbm_to_vmem [thread:$0]  %s4618_s1, 128, %s45_s19, [#allocation14]  }
  0x17   :  { %s3679_s20 = scalar_lea.hbm %s4620_s3, 32 }
  0x18   :  { %p3680_p8 = scmp.ne.s32.totalorder %s4620_s3, %s3679_s20  ;;  %p3683_p9 = scmp.lt.u32.totalorder %s3679_s20, %s4620_s3 }
  0x1a   :  { %p3685_p10 = pnand %p3683_p9, %p3680_p8 }
  0x1c   :  { %3688 = shalt.err (!%p3685_p10)
}
  0x1d   :  { %s3689_s26 = scalar_lea.vmem %s65_s21, 32  ;;  %p3694_p12 = scmp.lt.s32.totalorder %s65_s21, %s65_s21 }
  0x1e   :  { %p3690_p11 = scmp.ne.s32.totalorder %s65_s21, %s3689_s26  ;;  %p3695_p13 = scmp.lt.s32.totalorder %s3689_s26, %s3689_s26 }
  0x20   :  { %p3696_p0 = por %p3695_p13, %p3694_p12 }
  0x22   :  { %p3697_p1 = pnand %p3696_p0, %p3690_p11 }
  0x24   :  { %3700 = shalt.err (!%p3697_p1)
}
  0x25   :  { %67 = dma.hbm_to_vmem [thread:$0]  %s4620_s3, 32, %s65_s21, [#allocation17]  }
  0x26   :  { %s3915_s27 = smov [#allocation19]   ;;  %s3916_s29 = smov [#allocation9]  }
  0x27   :  { %s84_s28 = sshll.u32 %s3915_s27, 4  ;;  %s34_s30 = sshll.u32 %s3916_s29, 4  ;;  %s85_s28 = int_to_ptr.vmem [resolvable:$true] %s84_s28  ;;  %s35_s30 = int_to_ptr.vmem [resolvable:$true] %s34_s30 }
  0x28   :  { %s3701_s18 = scalar_lea.hbm %s4622_s5, 128 }
  0x29   :  { %p3702_p2 = scmp.ne.s32.totalorder %s4622_s5, %s3701_s18  ;;  %p3705_p3 = scmp.lt.u32.totalorder %s3701_s18, %s4622_s5 }
  0x2b   :  { %p3707_p4 = pnand %p3705_p3, %p3702_p2 }
  0x2d   :  { %3710 = shalt.err (!%p3707_p4)
}
  0x2e   :  { %s3711_s3 = scalar_lea.vmem %s85_s28, 128  ;;  %p3716_p6 = scmp.lt.s32.totalorder %s85_s28, %s85_s28 }
  0x2f   :  { %p3712_p5 = scmp.ne.s32.totalorder %s85_s28, %s3711_s3  ;;  %p3717_p7 = scmp.lt.s32.totalorder %s3711_s3, %s3711_s3 }
  0x31   :  { %p3718_p8 = por %p3717_p7, %p3716_p6 }
  0x33   :  { %p3719_p9 = pnand %p3718_p8, %p3712_p5 }
  0x35   :  { %3722 = shalt.err (!%p3719_p9)
}
  0x36   :  { %87 = dma.hbm_to_vmem [thread:$0]  %s4622_s5, 128, %s85_s28, [#allocation20]  }
  0x37   :  { %s3723_s19 = scalar_lea.hbm %s4617_s0, 1152 }
  0x38   :  { %p3724_p10 = scmp.ne.s32.totalorder %s4617_s0, %s3723_s19  ;;  %p3727_p11 = scmp.lt.u32.totalorder %s3723_s19, %s4617_s0 }
  0x3a   :  { %p3729_p12 = pnand %p3727_p11, %p3724_p10 }
  0x3c   :  { %3732 = shalt.err (!%p3729_p12)
}
  0x3d   :  { %s3733_s18 = scalar_lea.vmem %s35_s30, 1152  ;;  %p3738_p0 = scmp.lt.s32.totalorder %s35_s30, %s35_s30 }
  0x3e   :  { %p3734_p13 = scmp.ne.s32.totalorder %s35_s30, %s3733_s18  ;;  %p3739_p1 = scmp.lt.s32.totalorder %s3733_s18, %s3733_s18 }
  0x40   :  { %p3740_p2 = por %p3739_p1, %p3738_p0 }
  0x42   :  { %p3741_p3 = pnand %p3740_p2, %p3734_p13 }
  0x44   :  { %3744 = shalt.err (!%p3741_p3)
}
  0x45   :  { %37 = dma.hbm_to_vmem [thread:$0]  %s4617_s0, 1152, %s35_s30, [#allocation10]  }
  0x46   :  { %s3917_s20 = smov [#allocation15]   ;;  %s3918_s23 = smov [#allocation18]  }
  0x47   :  { %s54_s22 = sshll.u32 %s3917_s20, 4  ;;  %s74_s24 = sshll.u32 %s3918_s23, 4  ;;  %s55_s22 = int_to_ptr.vmem [resolvable:$true] %s54_s22  ;;  %s75_s24 = int_to_ptr.vmem [resolvable:$true] %s74_s24 }
  0x48   :  { %s3745_s25 = scalar_lea.hbm %s4619_s2, 64 }
  0x49   :  { %p3746_p4 = scmp.ne.s32.totalorder %s4619_s2, %s3745_s25  ;;  %p3749_p5 = scmp.lt.u32.totalorder %s3745_s25, %s4619_s2 }
  0x4b   :  { %p3751_p6 = pnand %p3749_p5, %p3746_p4 }
  0x4d   :  { %3754 = shalt.err (!%p3751_p6)
}
  0x4e   :  { %s3755_s0 = scalar_lea.vmem %s55_s22, 64  ;;  %p3760_p8 = scmp.lt.s32.totalorder %s55_s22, %s55_s22 }
  0x4f   :  { %p3756_p7 = scmp.ne.s32.totalorder %s55_s22, %s3755_s0  ;;  %p3761_p9 = scmp.lt.s32.totalorder %s3755_s0, %s3755_s0 }
  0x51   :  { %p3762_p10 = por %p3761_p9, %p3760_p8 }
  0x53   :  { %p3763_p11 = pnand %p3762_p10, %p3756_p7 }
  0x55   :  { %3766 = shalt.err (!%p3763_p11)
}
  0x56   :  { %57 = dma.hbm_to_vmem [thread:$0]  %s4619_s2, 64, %s55_s22, [#allocation14]  }
  0x57   :  { %s3767_s18 = scalar_lea.hbm %s4621_s4, 64 }
  0x58   :  { %p3768_p12 = scmp.ne.s32.totalorder %s4621_s4, %s3767_s18  ;;  %p3771_p13 = scmp.lt.u32.totalorder %s3767_s18, %s4621_s4 }
  0x5a   :  { %p3773_p0 = pnand %p3771_p13, %p3768_p12 }
  0x5c   :  { %3776 = shalt.err (!%p3773_p0)
}
  0x5d   :  { %s3777_s3 = scalar_lea.vmem %s75_s24, 64  ;;  %p3782_p2 = scmp.lt.s32.totalorder %s75_s24, %s75_s24 }
  0x5e   :  { %p3778_p1 = scmp.ne.s32.totalorder %s75_s24, %s3777_s3  ;;  %p3783_p3 = scmp.lt.s32.totalorder %s3777_s3, %s3777_s3 }
  0x60   :  { %p3784_p4 = por %p3783_p3, %p3782_p2 }
  0x62   :  { %p3785_p5 = pnand %p3784_p4, %p3778_p1 }
  0x64   :  { %3788 = shalt.err (!%p3785_p5)
}
  0x65   :  { %77 = dma.hbm_to_vmem [thread:$0]  %s4621_s4, 64, %s75_s24, [#allocation17]  }
  0x66   :  { %s3919_s21 = smov [#allocation21]   ;;  %s3789_s19 = scalar_lea.hbm %s4623_s6, 288 }
  0x67   :  { %s94_s25 = sshll.u32 %s3919_s21, 4  ;;  %p3790_p6 = scmp.ne.s32.totalorder %s4623_s6, %s3789_s19  ;;  %s95_s25 = int_to_ptr.vmem [resolvable:$true] %s94_s25 }
  0x68   :  { %p3793_p7 = scmp.lt.u32.totalorder %s3789_s19, %s4623_s6 }
  0x6a   :  { %p3795_p8 = pnand %p3793_p7, %p3790_p6 }
  0x6c   :  { %3798 = shalt.err (!%p3795_p8)
}
  0x6d   :  { %s3799_s16 = scalar_lea.vmem %s95_s25, 288  ;;  %p3804_p10 = scmp.lt.s32.totalorder %s95_s25, %s95_s25 }
  0x6e   :  { %p3800_p9 = scmp.ne.s32.totalorder %s95_s25, %s3799_s16  ;;  %p3805_p11 = scmp.lt.s32.totalorder %s3799_s16, %s3799_s16 }
  0x70   :  { %p3806_p12 = por %p3805_p11, %p3804_p10 }
  0x72   :  { %p3807_p13 = pnand %p3806_p12, %p3800_p9 }
  0x74   :  { %3810 = shalt.err (!%p3807_p13)
}
  0x75   :  { %97 = dma.hbm_to_vmem [thread:$0]  %s4623_s6, 288, %s95_s25, [#allocation20]  }
  0x76   :  { %s3811_s5 = scalar_lea.hbm %s4624_s7, 16 }
  0x77   :  { %p3812_p0 = scmp.ne.s32.totalorder %s4624_s7, %s3811_s5  ;;  %p3815_p1 = scmp.lt.u32.totalorder %s3811_s5, %s4624_s7 }
  0x79   :  { %p3817_p2 = pnand %p3815_p1, %p3812_p0 }
  0x7b   :  { %3820 = shalt.err (!%p3817_p2)
}
  0x7c   :  { %s3920_s2 = smov [#allocation22]  }
  0x7d   :  { %105 = dma.hbm_to_smem %s4624_s7, 16, %s3920_s2, [#allocation12]  }
  0x7e   :  { %3887 = dma.done.wait [#allocation10], 1152  }
  0x7f   :  { %3888 = vsyncadd [#allocation10], 4294966144 }
  0x80   :  { %3889 = dma.done.wait [#allocation14], 192  }
  0x81   :  { %3890 = vsyncadd [#allocation14], 4294967104 }
  0x82   :  { %3891 = dma.done.wait [#allocation17], 96  }
  0x83   :  { %3892 = vsyncadd [#allocation17], 4294967200 }
  0x84   :  { %3893 = dma.done.wait [#allocation20], 416  }
  0x85   :  { %3894 = vsyncadd [#allocation20], 4294966880 }
  0x86   :  { %3895 = dma.done.wait [#allocation12], 16  }
  0x87   :  { %3896 = vsyncadd [#allocation12], 4294967280 }
  0x88   :  { %130 = sfence }
  0x89   :  { %s136_s6 = sld [smem:[#allocation0]]   ;;  %s3921_s25 = smov [#allocation2]  }
  0x8a   :  { %s144_s26 = sshll.u32 %s3921_s25, 4  ;;  %s3922_s1 = smov 512   ;;  %s145_s26 = int_to_ptr.vmem [resolvable:$true] %s144_s26 }
  0x8b   :  { %148 = sst [smem:[#allocation27]] %s3922_s1  ;;  %s3923_s7 = smov 4  }
  0x8c   :  { %150 = sst [smem:[#allocation27 + $0x1]] %s3922_s1  ;;  %s3924_s19 = smov 64  }
  0x8d   :  { %152 = sst [smem:[#allocation27 + $0x2]] %s3923_s7  ;;  %s3925_s0 = smov 128  }
  0x8e   :  { %154 = sst [smem:[#allocation27 + $0x3]] %s3924_s19  ;;  %s3926_s29 = smov 2  }
  0x8f   :  { %s3405_s27 = sshll.u32 %s136_s6, 26  ;;  %156 = sst [smem:[#allocation27 + $0x4]] %s3925_s0 }
  0x90   :  { %s4131_s30 = sadd.s32 134217728, %s3405_s27  ;;  %158 = sst [smem:[#allocation27 + $0x5]] %s3926_s29 }
  0x91   :  { %s3927_s16 = smov 256   ;;  %162 = sst [smem:[#allocation27 + $0x7]] %s3924_s19 }
  0x92   :  { %160 = sst [smem:[#allocation27 + $0x6]] %s3927_s16  ;;  %s3928_s4 = smov [#allocation8]  }
  0x93   :  { %164 = sst [smem:[#allocation27 + $0x8]] %s3923_s7  ;;  %s3929_s24 = smov [#allocation26]  }
  0x94   :  { %166 = dma.general %s4625_s8, 36864, %s145_s26, %s3928_s4, %s3929_s24, [#allocation27], %s4131_s30, 0  }
  0x95   :  { %183 = sst [smem:[#allocation29]] %s3927_s16  ;;  %s3930_s5 = smov [#allocation3]  }
  0x96   :  { %185 = sst [smem:[#allocation29 + $0x1]] %s3927_s16  ;;  %s179_s28 = sshll.u32 %s3930_s5, 4  ;;  %s180_s28 = int_to_ptr.vmem [resolvable:$true] %s179_s28 }
  0x97   :  { %187 = sst [smem:[#allocation29 + $0x2]] %s3926_s29  ;;  %s3931_s8 = smov [#allocation8 + $0x1]  }
  0x98   :  { %189 = sst [smem:[#allocation29 + $0x3]] %s3924_s19  ;;  %s3932_s20 = smov [#allocation28]  }
  0x99   :  { %191 = sst [smem:[#allocation29 + $0x4]] %s3925_s0  ;;  %s3933_s2 = smov [#allocation4]  }
  0x9a   :  { %193 = sst [smem:[#allocation29 + $0x5]] %s3926_s29  ;;  %s210_s22 = sshll.u32 %s3933_s2, 4  ;;  %s211_s22 = int_to_ptr.vmem [resolvable:$true] %s210_s22 }
  0x9b   :  { %195 = sst [smem:[#allocation29 + $0x6]] %s3925_s0  ;;  %s3934_s21 = smov [#allocation5]  }
  0x9c   :  { %197 = sst [smem:[#allocation29 + $0x7]] %s3924_s19  ;;  %s226_s6 = sshll.u32 %s3934_s21, 4  ;;  %s227_s6 = int_to_ptr.vmem [resolvable:$true] %s226_s6 }
  0x9d   :  { %199 = sst [smem:[#allocation29 + $0x8]] %s3923_s7  ;;  %s3821_s26 = scalar_lea.hbm %s4627_s10, 2048 }
  0x9e   :  { %201 = dma.general %s4626_s9, 8192, %s180_s28, %s3931_s8, %s3932_s20, [#allocation29], %s4131_s30, 0  }
  0x9f   :  { %230 = sst [smem:[#allocation35]] %s3927_s16  ;;  %p3822_p3 = scmp.ne.s32.totalorder %s4627_s10, %s3821_s26 }
  0xa0   :  { %232 = sst [smem:[#allocation35 + $0x1]] %s3927_s16  ;;  %p3825_p4 = scmp.lt.u32.totalorder %s3821_s26, %s4627_s10 }
  0xa1   :  { %234 = sst [smem:[#allocation35 + $0x2]] %s3926_s29 }
  0xa2   :  { %236 = sst [smem:[#allocation35 + $0x3]] %s3924_s19  ;;  %p3827_p5 = pnand %p3825_p4, %p3822_p3 }
  0xa3   :  { %238 = sst [smem:[#allocation35 + $0x4]] %s3925_s0 }
  0xa4   :  { %240 = sst [smem:[#allocation35 + $0x5]] %s3926_s29 }
  0xa5   :  { %242 = sst [smem:[#allocation35 + $0x6]] %s3925_s0 }
  0xa6   :  { %244 = sst [smem:[#allocation35 + $0x7]] %s3924_s19 }
  0xa7   :  { %246 = sst [smem:[#allocation35 + $0x8]] %s3923_s7 }
  0xa8   :  { %3830 = shalt.err (!%p3827_p5)  }
  0xa9   :  { %s3831_s18 = scalar_lea.vmem %s211_s22, 2048  ;;  %p3836_p7 = scmp.lt.s32.totalorder %s211_s22, %s211_s22 }
  0xaa   :  { %p3832_p6 = scmp.ne.s32.totalorder %s211_s22, %s3831_s18  ;;  %p3837_p8 = scmp.lt.s32.totalorder %s3831_s18, %s3831_s18 }
  0xac   :  { %p3838_p9 = por %p3837_p8, %p3836_p7 }
  0xae   :  { %p3839_p10 = pnand %p3838_p9, %p3832_p6 }
  0xb0   :  { %3842 = shalt.err (!%p3839_p10)  }
  0xb1   :  { %213 = dma.hbm_to_vmem [thread:$0]  %s4627_s10, 2048, %s211_s22, [#allocation8 + $0x2] }
  0xb2   :  { %s3935_s8 = smov [#allocation8 + $0x3]   ;;  %s3936_s20 = smov [#allocation34]  }
  0xb3   :  { %248 = dma.general %s4628_s11, 2048, %s227_s6, %s3935_s8, %s3936_s20, [#allocation35], %s4131_s30, 0  }
  0xb4   :  { %265 = sst [smem:[#allocation37]] %s3922_s1  ;;  %s3937_s2 = smov [#allocation6]  }
  0xb5   :  { %s261_s21 = sshll.u32 %s3937_s2, 4  ;;  %267 = sst [smem:[#allocation37 + $0x1]] %s3922_s1  ;;  %s262_s21 = int_to_ptr.vmem [resolvable:$true] %s261_s21 }
  0xb6   :  { %269 = sst [smem:[#allocation37 + $0x2]] %s3923_s7  ;;  %s3938_s10 = smov [#allocation8 + $0x4]  }
  0xb7   :  { %271 = sst [smem:[#allocation37 + $0x3]] %s3924_s19  ;;  %s3939_s11 = smov [#allocation36]  }
  0xb8   :  { %273 = sst [smem:[#allocation37 + $0x4]] %s3925_s0  ;;  %s3940_s1 = smov 1152  }
  0xb9   :  { %275 = sst [smem:[#allocation37 + $0x5]] %s3926_s29  ;;  %s3941_s9 = smov [#allocation7]  }
  0xba   :  { %277 = sst [smem:[#allocation37 + $0x6]] %s3927_s16  ;;  %s296_s25 = sshll.u32 %s3941_s9, 4  ;;  %s297_s25 = int_to_ptr.vmem [resolvable:$true] %s296_s25 }
  0xbb   :  { %279 = sst [smem:[#allocation37 + $0x7]] %s3924_s19  ;;  %s3942_s26 = smov 9  }
  0xbc   :  { %281 = sst [smem:[#allocation37 + $0x8]] %s3923_s7  ;;  %s3943_s16 = smov 576  }
  0xbd   :  { %283 = dma.general %s4629_s12, 8192, %s262_s21, %s3938_s10, %s3939_s11, [#allocation37], %s4131_s30, 0  }
  0xbe   :  { %300 = sst [smem:[#allocation39]] %s3940_s1  ;;  %s3944_s12 = smov [#allocation8 + $0x5]  }
  0xbf   :  { %302 = sst [smem:[#allocation39 + $0x1]] %s3940_s1  ;;  %s3945_s27 = smov [#allocation38]  }
  0xc0   :  { %304 = sst [smem:[#allocation39 + $0x2]] %s3942_s26 }
  0xc1   :  { %306 = sst [smem:[#allocation39 + $0x3]] %s3924_s19 }
  0xc2   :  { %308 = sst [smem:[#allocation39 + $0x4]] %s3925_s0 }
  0xc3   :  { %310 = sst [smem:[#allocation39 + $0x5]] %s3926_s29 }
  0xc4   :  { %312 = sst [smem:[#allocation39 + $0x6]] %s3943_s16 }
  0xc5   :  { %314 = sst [smem:[#allocation39 + $0x7]] %s3924_s19 }
  0xc6   :  { %316 = sst [smem:[#allocation39 + $0x8]] %s3923_s7 }
  0xc7   :  { %318 = dma.general %s4630_s13, 36864, %s297_s25, %s3944_s12, %s3945_s27, [#allocation39], %s4131_s30, 0  }
  0xc8   :  { %v4201_v0 = vld [vmem:[#allocation9] sm:$0xff]  ;;  %v320_v1 = vld [vmem:[#allocation9 + $0x8] sm:$0xff]  ;;  %v4203_v2 = vld [vmem:[#allocation9 + $0x10] sm:$0xff] }
  0xc9   :  { %v4205_v3 = vld [vmem:[#allocation9 + $0x18] sm:$0xff]  ;;  %v4207_v4 = vld [vmem:[#allocation9 + $0x20] sm:$0xff]  ;;  %v4209_v5 = vld [vmem:[#allocation9 + $0x28] sm:$0xff] }
  0xca   :  { %v4211_v6 = vld [vmem:[#allocation9 + $0x30] sm:$0xff]  ;;  %v4213_v7 = vld [vmem:[#allocation9 + $0x38] sm:$0xff]  ;;  %v4215_v8 = vld [vmem:[#allocation9 + $0x40] sm:$0xff] }
  0xcb   :  { %3897 = dma.done.wait [#allocation8], 36864 }
  0xcc   :  { %3898 = vsyncadd [#allocation8], 4294930432  ;;  %v333_v9 = vpack.c.bf16 %v320_v1, %v320_v1  ;;  %v342_v10 = vld [vmem:[#allocation2 + $0x8] sm:$0xff]  ;;  %v344_v11 = vld [vmem:[#allocation2 + $0x18] sm:$0xff] }
  0xcd   :  { %v341_v12 = vld [vmem:[#allocation2] sm:$0xff]  ;;  %629 = vmatprep.subr.bf16.mxu0 %v342_v10  ;;  %834 = vmatprep.subr.bf16.mxu1 %v344_v11  ;;  %v343_v13 = vld [vmem:[#allocation2 + $0x10] sm:$0xff]  ;;  %v346_v14 = vld [vmem:[#allocation2 + $0x28] sm:$0xff] }
  0xce   :  { %661 = vmatprep.mubr.bf16.mxu0 %v333_v9  ;;  %866 = vmatprep.mubr.bf16.mxu1 %v333_v9  ;;  %v348_v15 = vld [vmem:[#allocation2 + $0x38] sm:$0xff]  ;;  %v345_v16 = vld [vmem:[#allocation2 + $0x20] sm:$0xff]  ;;  %v347_v17 = vld [vmem:[#allocation2 + $0x30] sm:$0xff] }
  0xcf   :  { %630 = vmatpush1.bf16.msra.mxu0 %v341_v12  ;;  %835 = vmatpush1.bf16.msra.mxu1 %v343_v13  ;;  %v350_v18 = vld [vmem:[#allocation2 + $0x48] sm:$0xff]  ;;  %v352_v19 = vld [vmem:[#allocation2 + $0x58] sm:$0xff]  ;;  %v349_v20 = vld [vmem:[#allocation2 + $0x40] sm:$0xff] }
  0xd0   :  { %631 = vmatprep.subr.bf16.mxu0 %v346_v14  ;;  %836 = vmatprep.subr.bf16.mxu1 %v348_v15  ;;  %v351_v21 = vld [vmem:[#allocation2 + $0x50] sm:$0xff]  ;;  %v354_v22 = vld [vmem:[#allocation2 + $0x68] sm:$0xff]  ;;  %v356_v23 = vld [vmem:[#allocation2 + $0x78] sm:$0xff] }
  0xd1   :  { %v353_v24 = vld [vmem:[#allocation2 + $0x60] sm:$0xff]  ;;  %v355_v25 = vld [vmem:[#allocation2 + $0x70] sm:$0xff]  ;;  %v358_v26 = vld [vmem:[#allocation2 + $0x88] sm:$0xff] }
  0xd2   :  { %v360_v27 = vld [vmem:[#allocation2 + $0x98] sm:$0xff]  ;;  %v357_v28 = vld [vmem:[#allocation2 + $0x80] sm:$0xff]  ;;  %v359_v29 = vld [vmem:[#allocation2 + $0x90] sm:$0xff] }
  0xd3   :  { %632 = vmatpush1.bf16.msra.mxu0 %v345_v16  ;;  %837 = vmatpush1.bf16.msra.mxu1 %v347_v17  ;;  %v362_v30 = vld [vmem:[#allocation2 + $0xa8] sm:$0xff]  ;;  %v364_v31 = vld [vmem:[#allocation2 + $0xb8] sm:$0xff]  ;;  %v361_v32 = vld [vmem:[#allocation2 + $0xa0] sm:$0xff] }
  0xd4   :  { %633 = vmatprep.subr.bf16.mxu0 %v350_v18  ;;  %838 = vmatprep.subr.bf16.mxu1 %v352_v19  ;;  %v363_v33 = vld [vmem:[#allocation2 + $0xb0] sm:$0xff]  ;;  %v366_v34 = vld [vmem:[#allocation2 + $0xc8] sm:$0xff]  ;;  %v368_v35 = vld [vmem:[#allocation2 + $0xd8] sm:$0xff] }
  0xd5   :  { %v365_v36 = vld [vmem:[#allocation2 + $0xc0] sm:$0xff]  ;;  %v367_v37 = vld [vmem:[#allocation2 + $0xd0] sm:$0xff]  ;;  %v370_v38 = vld [vmem:[#allocation2 + $0xe8] sm:$0xff] }
  0xd6   :  { %v372_v39 = vld [vmem:[#allocation2 + $0xf8] sm:$0xff]  ;;  %v369_v40 = vld [vmem:[#allocation2 + $0xe0] sm:$0xff]  ;;  %v371_v41 = vld [vmem:[#allocation2 + $0xf0] sm:$0xff] }
  0xd7   :  { %634 = vmatpush1.bf16.msra.mxu0 %v349_v20  ;;  %839 = vmatpush1.bf16.msra.mxu1 %v351_v21  ;;  %v374_v42 = vld [vmem:[#allocation2 + $0x108] sm:$0xff]  ;;  %v376_v43 = vld [vmem:[#allocation2 + $0x118] sm:$0xff]  ;;  %v373_v44 = vld [vmem:[#allocation2 + $0x100] sm:$0xff]  ;;  %v332_v20 = vpack.c.bf16 %v4201_v0, %v4201_v0 }
  0xd8   :  { %635 = vmatprep.subr.bf16.mxu0 %v354_v22  ;;  %840 = vmatprep.subr.bf16.mxu1 %v356_v23  ;;  %v375_v45 = vld [vmem:[#allocation2 + $0x110] sm:$0xff]  ;;  %v378_v46 = vld [vmem:[#allocation2 + $0x128] sm:$0xff]  ;;  %v380_v47 = vld [vmem:[#allocation2 + $0x138] sm:$0xff] }
  0xd9   :  { %v377_v48 = vld [vmem:[#allocation2 + $0x120] sm:$0xff]  ;;  %v379_v49 = vld [vmem:[#allocation2 + $0x130] sm:$0xff]  ;;  %v382_v50 = vld [vmem:[#allocation2 + $0x148] sm:$0xff] }
  0xda   :  { %v384_v51 = vld [vmem:[#allocation2 + $0x158] sm:$0xff]  ;;  %v381_v52 = vld [vmem:[#allocation2 + $0x140] sm:$0xff]  ;;  %v383_v53 = vld [vmem:[#allocation2 + $0x150] sm:$0xff] }
  0xdb   :  { %636 = vmatpush1.bf16.msra.mxu0 %v353_v24  ;;  %841 = vmatpush1.bf16.msra.mxu1 %v355_v25  ;;  %v386_v54 = vld [vmem:[#allocation2 + $0x168] sm:$0xff]  ;;  %v388_v55 = vld [vmem:[#allocation2 + $0x178] sm:$0xff]  ;;  %v385_v56 = vld [vmem:[#allocation2 + $0x160] sm:$0xff]  ;;  %v335_v25 = vpack.c.bf16 %v4205_v3, %v4205_v3 }
  0xdc   :  { %637 = vmatprep.subr.bf16.mxu0 %v358_v26  ;;  %842 = vmatprep.subr.bf16.mxu1 %v360_v27  ;;  %v387_v57 = vld [vmem:[#allocation2 + $0x170] sm:$0xff]  ;;  %v390_v58 = vld [vmem:[#allocation2 + $0x188] sm:$0xff]  ;;  %v392_v59 = vld [vmem:[#allocation2 + $0x198] sm:$0xff] }
  0xdd   :  { %v389_v60 = vld [vmem:[#allocation2 + $0x180] sm:$0xff]  ;;  %v391_v61 = vld [vmem:[#allocation2 + $0x190] sm:$0xff]  ;;  %v394_v62 = vld [vmem:[#allocation2 + $0x1a8] sm:$0xff] }
  0xde   :  { %v396_v63 = vld [vmem:[#allocation2 + $0x1b8] sm:$0xff]  ;;  %v393_v1 = vld [vmem:[#allocation2 + $0x1a0] sm:$0xff]  ;;  %v395_v9 = vld [vmem:[#allocation2 + $0x1b0] sm:$0xff] }
  0xdf   :  { %638 = vmatpush1.bf16.msra.mxu0 %v357_v28  ;;  %843 = vmatpush1.bf16.msra.mxu1 %v359_v29  ;;  %v398_v10 = vld [vmem:[#allocation2 + $0x1c8] sm:$0xff]  ;;  %v400_v11 = vld [vmem:[#allocation2 + $0x1d8] sm:$0xff]  ;;  %v397_v12 = vld [vmem:[#allocation2 + $0x1c0] sm:$0xff] }
  0xe0   :  { %639 = vmatprep.subr.bf16.mxu0 %v362_v30  ;;  %844 = vmatprep.subr.bf16.mxu1 %v364_v31  ;;  %v399_v13 = vld [vmem:[#allocation2 + $0x1d0] sm:$0xff]  ;;  %v402_v14 = vld [vmem:[#allocation2 + $0x1e8] sm:$0xff]  ;;  %v404_v15 = vld [vmem:[#allocation2 + $0x1f8] sm:$0xff] }
  0xe1   :  { %v401_v16 = vld [vmem:[#allocation2 + $0x1e0] sm:$0xff]  ;;  %v403_v17 = vld [vmem:[#allocation2 + $0x1f0] sm:$0xff]  ;;  %v406_v18 = vld [vmem:[#allocation2 + $0x208] sm:$0xff] }
  0xe2   :  { %v408_v19 = vld [vmem:[#allocation2 + $0x218] sm:$0xff]  ;;  %v405_v21 = vld [vmem:[#allocation2 + $0x200] sm:$0xff]  ;;  %v407_v22 = vld [vmem:[#allocation2 + $0x210] sm:$0xff] }
  0xe3   :  { %640 = vmatpush1.bf16.msra.mxu0 %v361_v32  ;;  %845 = vmatpush1.bf16.msra.mxu1 %v363_v33  ;;  %v410_v23 = vld [vmem:[#allocation2 + $0x228] sm:$0xff]  ;;  %v412_v24 = vld [vmem:[#allocation2 + $0x238] sm:$0xff]  ;;  %v409_v26 = vld [vmem:[#allocation2 + $0x220] sm:$0xff] }
  0xe4   :  { %641 = vmatprep.subr.bf16.mxu0 %v366_v34  ;;  %846 = vmatprep.subr.bf16.mxu1 %v368_v35  ;;  %v411_v27 = vld [vmem:[#allocation2 + $0x230] sm:$0xff]  ;;  %v414_v0 = vld [vmem:[#allocation2 + $0x248] sm:$0xff]  ;;  %v416_v28 = vld [vmem:[#allocation2 + $0x258] sm:$0xff] }
  0xe5   :  { %v413_v29 = vld [vmem:[#allocation2 + $0x240] sm:$0xff]  ;;  %v415_v30 = vld [vmem:[#allocation2 + $0x250] sm:$0xff]  ;;  %v418_v31 = vld [vmem:[#allocation2 + $0x268] sm:$0xff] }
  0xe6   :  { %v420_v3 = vld [vmem:[#allocation2 + $0x278] sm:$0xff]  ;;  %v417_v32 = vld [vmem:[#allocation2 + $0x260] sm:$0xff]  ;;  %v419_v33 = vld [vmem:[#allocation2 + $0x270] sm:$0xff] }
  0xe7   :  { %642 = vmatpush1.bf16.msra.mxu0 %v365_v36  ;;  %847 = vmatpush1.bf16.msra.mxu1 %v367_v37  ;;  %v422_v34 = vld [vmem:[#allocation2 + $0x288] sm:$0xff]  ;;  %v424_v35 = vld [vmem:[#allocation2 + $0x298] sm:$0xff]  ;;  %v421_v36 = vld [vmem:[#allocation2 + $0x280] sm:$0xff] }
  0xe8   :  { %643 = vmatprep.subr.bf16.mxu0 %v370_v38  ;;  %848 = vmatprep.subr.bf16.mxu1 %v372_v39  ;;  %v423_v37 = vld [vmem:[#allocation2 + $0x290] sm:$0xff]  ;;  %v426_v38 = vld [vmem:[#allocation2 + $0x2a8] sm:$0xff]  ;;  %v428_v39 = vld [vmem:[#allocation2 + $0x2b8] sm:$0xff] }
  0xeb   :  { %644 = vmatpush1.bf16.msra.mxu0 %v369_v40  ;;  %849 = vmatpush1.bf16.msra.mxu1 %v371_v41  ;;  %v425_v40 = vld [vmem:[#allocation2 + $0x2a0] sm:$0xff]  ;;  %v427_v41 = vld [vmem:[#allocation2 + $0x2b0] sm:$0xff] }
  0xec   :  { %645 = vmatprep.subr.bf16.mxu0 %v374_v42  ;;  %850 = vmatprep.subr.bf16.mxu1 %v376_v43  ;;  %v430_v42 = vld [vmem:[#allocation2 + $0x2c8] sm:$0xff]  ;;  %v432_v43 = vld [vmem:[#allocation2 + $0x2d8] sm:$0xff] }
  0xef   :  { %646 = vmatpush1.bf16.msra.mxu0 %v373_v44  ;;  %851 = vmatpush1.bf16.msra.mxu1 %v375_v45  ;;  %v429_v44 = vld [vmem:[#allocation2 + $0x2c0] sm:$0xff]  ;;  %v431_v45 = vld [vmem:[#allocation2 + $0x2d0] sm:$0xff] }
  0xf0   :  { %647 = vmatprep.subr.bf16.mxu0 %v378_v46  ;;  %852 = vmatprep.subr.bf16.mxu1 %v380_v47  ;;  %v434_v46 = vld [vmem:[#allocation2 + $0x2e8] sm:$0xff]  ;;  %v436_v47 = vld [vmem:[#allocation2 + $0x2f8] sm:$0xff] }
  0xf3   :  { %648 = vmatpush1.bf16.msra.mxu0 %v377_v48  ;;  %853 = vmatpush1.bf16.msra.mxu1 %v379_v49  ;;  %v433_v48 = vld [vmem:[#allocation2 + $0x2e0] sm:$0xff]  ;;  %v435_v49 = vld [vmem:[#allocation2 + $0x2f0] sm:$0xff] }
  0xf4   :  { %649 = vmatprep.subr.bf16.mxu0 %v382_v50  ;;  %854 = vmatprep.subr.bf16.mxu1 %v384_v51  ;;  %v438_v50 = vld [vmem:[#allocation2 + $0x308] sm:$0xff]  ;;  %v440_v51 = vld [vmem:[#allocation2 + $0x318] sm:$0xff] }
  0xf7   :  { %650 = vmatpush1.bf16.msra.mxu0 %v381_v52  ;;  %855 = vmatpush1.bf16.msra.mxu1 %v383_v53  ;;  %v437_v52 = vld [vmem:[#allocation2 + $0x300] sm:$0xff]  ;;  %v439_v53 = vld [vmem:[#allocation2 + $0x310] sm:$0xff] }
  0xf8   :  { %651 = vmatprep.subr.bf16.mxu0 %v386_v54  ;;  %856 = vmatprep.subr.bf16.mxu1 %v388_v55  ;;  %v442_v54 = vld [vmem:[#allocation2 + $0x328] sm:$0xff]  ;;  %v444_v55 = vld [vmem:[#allocation2 + $0x338] sm:$0xff] }
  0xfb   :  { %652 = vmatpush1.bf16.msra.mxu0 %v385_v56  ;;  %857 = vmatpush1.bf16.msra.mxu1 %v387_v57  ;;  %v441_v56 = vld [vmem:[#allocation2 + $0x320] sm:$0xff]  ;;  %v443_v57 = vld [vmem:[#allocation2 + $0x330] sm:$0xff] }
  0xfc   :  { %653 = vmatprep.subr.bf16.mxu0 %v390_v58  ;;  %858 = vmatprep.subr.bf16.mxu1 %v392_v59  ;;  %v446_v58 = vld [vmem:[#allocation2 + $0x348] sm:$0xff]  ;;  %v448_v59 = vld [vmem:[#allocation2 + $0x358] sm:$0xff] }
  0xff   :  { %654 = vmatpush1.bf16.msra.mxu0 %v389_v60  ;;  %859 = vmatpush1.bf16.msra.mxu1 %v391_v61  ;;  %v445_v60 = vld [vmem:[#allocation2 + $0x340] sm:$0xff]  ;;  %v447_v61 = vld [vmem:[#allocation2 + $0x350] sm:$0xff] }
 0x100   :  { %655 = vmatprep.subr.bf16.mxu0 %v394_v62  ;;  %860 = vmatprep.subr.bf16.mxu1 %v396_v63  ;;  %v450_v62 = vld [vmem:[#allocation2 + $0x368] sm:$0xff]  ;;  %v452_v63 = vld [vmem:[#allocation2 + $0x378] sm:$0xff] }
 0x103   :  { %656 = vmatpush1.bf16.msra.mxu0 %v393_v1  ;;  %861 = vmatpush1.bf16.msra.mxu1 %v395_v9  ;;  %v449_v1 = vld [vmem:[#allocation2 + $0x360] sm:$0xff]  ;;  %v451_v9 = vld [vmem:[#allocation2 + $0x370] sm:$0xff] }
 0x104   :  { %657 = vmatprep.subr.bf16.mxu0 %v398_v10  ;;  %862 = vmatprep.subr.bf16.mxu1 %v400_v11  ;;  %v454_v10 = vld [vmem:[#allocation2 + $0x388] sm:$0xff]  ;;  %v456_v11 = vld [vmem:[#allocation2 + $0x398] sm:$0xff] }
 0x107   :  { %658 = vmatpush1.bf16.msra.mxu0 %v397_v12  ;;  %863 = vmatpush1.bf16.msra.mxu1 %v399_v13  ;;  %v453_v12 = vld [vmem:[#allocation2 + $0x380] sm:$0xff]  ;;  %v455_v13 = vld [vmem:[#allocation2 + $0x390] sm:$0xff] }
 0x108   :  { %659 = vmatprep.subr.bf16.mxu0 %v402_v14  ;;  %864 = vmatprep.subr.bf16.mxu1 %v404_v15  ;;  %v458_v14 = vld [vmem:[#allocation2 + $0x3a8] sm:$0xff]  ;;  %v460_v15 = vld [vmem:[#allocation2 + $0x3b8] sm:$0xff] }
 0x10b   :  { %660 = vmatpush1.bf16.msra.mxu0 %v401_v16  ;;  %865 = vmatpush1.bf16.msra.mxu1 %v403_v17  ;;  %v457_v16 = vld [vmem:[#allocation2 + $0x3a0] sm:$0xff]  ;;  %v459_v17 = vld [vmem:[#allocation2 + $0x3b0] sm:$0xff] }
 0x10c   :  { %670 = vmatprep.subr.bf16.mxu0 %v406_v18  ;;  %875 = vmatprep.subr.bf16.mxu1 %v408_v19  ;;  %v462_v18 = vld [vmem:[#allocation2 + $0x3c8] sm:$0xff]  ;;  %v464_v19 = vld [vmem:[#allocation2 + $0x3d8] sm:$0xff] }
 0x10e   :  { %662 = vmatmul.mubr.bf16.vlgmr.msra.gmra.mrb[0].mxu0 %v332_v20  ;;  %867 = vmatmul.mubr.bf16.vlgmr.msra.gmra.mrb[0].mxu1 %v332_v20  ;;  %v461_v20 = vld [vmem:[#allocation2 + $0x3c0] sm:$0xff] }
 0x10f   :  { %671 = vmatpush1.bf16.msra.mxu0 %v405_v21  ;;  %876 = vmatpush1.bf16.msra.mxu1 %v407_v22  ;;  %v463_v21 = vld [vmem:[#allocation2 + $0x3d0] sm:$0xff]  ;;  %v466_v22 = vld [vmem:[#allocation2 + $0x3e8] sm:$0xff] }
 0x110   :  { %672 = vmatprep.subr.bf16.mxu0 %v410_v23  ;;  %877 = vmatprep.subr.bf16.mxu1 %v412_v24  ;;  %v468_v23 = vld [vmem:[#allocation2 + $0x3f8] sm:$0xff]  ;;  %v465_v24 = vld [vmem:[#allocation2 + $0x3e0] sm:$0xff] }
 0x111   :  { %702 = vmatprep.mubr.bf16.mxu0 %v335_v25  ;;  %907 = vmatprep.mubr.bf16.mxu1 %v335_v25  ;;  %v467_v25 = vld [vmem:[#allocation2 + $0x3f0] sm:$0xff] }
 0x113   :  { %673 = vmatpush1.bf16.msra.mxu0 %v409_v26  ;;  %878 = vmatpush1.bf16.msra.mxu1 %v411_v27  ;;  %v470_v26 = vld [vmem:[#allocation2 + $0x408] sm:$0xff]  ;;  %v472_v27 = vld [vmem:[#allocation2 + $0x418] sm:$0xff] }
 0x114   :  { %674 = vmatprep.subr.bf16.mxu0 %v414_v0  ;;  %879 = vmatprep.subr.bf16.mxu1 %v416_v28  ;;  %v334_v0 = vpack.c.bf16 %v4203_v2, %v4203_v2  ;;  %v469_v28 = vld [vmem:[#allocation2 + $0x400] sm:$0xff]  ;;  %v478_v2 = vld [vmem:[#allocation2 + $0x448] sm:$0xff] }
 0x117   :  { %675 = vmatpush1.bf16.msra.mxu0 %v413_v29  ;;  %880 = vmatpush1.bf16.msra.mxu1 %v415_v30  ;;  %v471_v29 = vld [vmem:[#allocation2 + $0x410] sm:$0xff]  ;;  %v474_v30 = vld [vmem:[#allocation2 + $0x428] sm:$0xff] }
 0x118   :  { %676 = vmatprep.subr.bf16.mxu0 %v418_v31  ;;  %881 = vmatprep.subr.bf16.mxu1 %v420_v3  ;;  %v476_v31 = vld [vmem:[#allocation2 + $0x438] sm:$0xff]  ;;  %v337_v3 = vpack.c.bf16 %v4209_v5, %v4209_v5 }
 0x119   :  { %v484_v5 = vld [vmem:[#allocation2 + $0x478] sm:$0xff] }
 0x11b   :  { %677 = vmatpush1.bf16.msra.mxu0 %v417_v32  ;;  %882 = vmatpush1.bf16.msra.mxu1 %v419_v33  ;;  %v473_v32 = vld [vmem:[#allocation2 + $0x420] sm:$0xff]  ;;  %v475_v33 = vld [vmem:[#allocation2 + $0x430] sm:$0xff] }
 0x11c   :  { %678 = vmatprep.subr.bf16.mxu0 %v422_v34  ;;  %883 = vmatprep.subr.bf16.mxu1 %v424_v35  ;;  %v480_v34 = vld [vmem:[#allocation2 + $0x458] sm:$0xff]  ;;  %v477_v35 = vld [vmem:[#allocation2 + $0x440] sm:$0xff] }
 0x11f   :  { %679 = vmatpush1.bf16.msra.mxu0 %v421_v36  ;;  %884 = vmatpush1.bf16.msra.mxu1 %v423_v37  ;;  %v479_v36 = vld [vmem:[#allocation2 + $0x450] sm:$0xff]  ;;  %v482_v37 = vld [vmem:[#allocation2 + $0x468] sm:$0xff] }
 0x120   :  { %680 = vmatprep.subr.bf16.mxu0 %v426_v38  ;;  %885 = vmatprep.subr.bf16.mxu1 %v428_v39  ;;  %v481_v38 = vld [vmem:[#allocation2 + $0x460] sm:$0xff]  ;;  %v483_v39 = vld [vmem:[#allocation2 + $0x470] sm:$0xff] }
 0x123   :  { %681 = vmatpush1.bf16.msra.mxu0 %v425_v40  ;;  %886 = vmatpush1.bf16.msra.mxu1 %v427_v41  ;;  %v486_v40 = vld [vmem:[#allocation2 + $0x488] sm:$0xff]  ;;  %v488_v41 = vld [vmem:[#allocation2 + $0x498] sm:$0xff] }
 0x124   :  { %682 = vmatprep.subr.bf16.mxu0 %v430_v42  ;;  %887 = vmatprep.subr.bf16.mxu1 %v432_v43  ;;  %v485_v42 = vld [vmem:[#allocation2 + $0x480] sm:$0xff]  ;;  %v487_v43 = vld [vmem:[#allocation2 + $0x490] sm:$0xff] }
 0x127   :  { %683 = vmatpush1.bf16.msra.mxu0 %v429_v44  ;;  %888 = vmatpush1.bf16.msra.mxu1 %v431_v45  ;;  %v490_v44 = vld [vmem:[#allocation2 + $0x4a8] sm:$0xff]  ;;  %v492_v45 = vld [vmem:[#allocation2 + $0x4b8] sm:$0xff] }
 0x128   :  { %684 = vmatprep.subr.bf16.mxu0 %v434_v46  ;;  %889 = vmatprep.subr.bf16.mxu1 %v436_v47  ;;  %v489_v46 = vld [vmem:[#allocation2 + $0x4a0] sm:$0xff]  ;;  %v491_v47 = vld [vmem:[#allocation2 + $0x4b0] sm:$0xff] }
 0x12b   :  { %685 = vmatpush1.bf16.msra.mxu0 %v433_v48  ;;  %890 = vmatpush1.bf16.msra.mxu1 %v435_v49  ;;  %v494_v48 = vld [vmem:[#allocation2 + $0x4c8] sm:$0xff]  ;;  %v496_v49 = vld [vmem:[#allocation2 + $0x4d8] sm:$0xff] }
 0x12c   :  { %686 = vmatprep.subr.bf16.mxu0 %v438_v50  ;;  %891 = vmatprep.subr.bf16.mxu1 %v440_v51  ;;  %v493_v50 = vld [vmem:[#allocation2 + $0x4c0] sm:$0xff]  ;;  %v495_v51 = vld [vmem:[#allocation2 + $0x4d0] sm:$0xff] }
 0x12f   :  { %687 = vmatpush1.bf16.msra.mxu0 %v437_v52  ;;  %892 = vmatpush1.bf16.msra.mxu1 %v439_v53  ;;  %v498_v52 = vld [vmem:[#allocation2 + $0x4e8] sm:$0xff]  ;;  %v500_v53 = vld [vmem:[#allocation2 + $0x4f8] sm:$0xff] }
 0x130   :  { %688 = vmatprep.subr.bf16.mxu0 %v442_v54  ;;  %893 = vmatprep.subr.bf16.mxu1 %v444_v55  ;;  %v497_v54 = vld [vmem:[#allocation2 + $0x4e0] sm:$0xff]  ;;  %v499_v55 = vld [vmem:[#allocation2 + $0x4f0] sm:$0xff] }
 0x133   :  { %689 = vmatpush1.bf16.msra.mxu0 %v441_v56  ;;  %894 = vmatpush1.bf16.msra.mxu1 %v443_v57  ;;  %v502_v56 = vld [vmem:[#allocation2 + $0x508] sm:$0xff]  ;;  %v504_v57 = vld [vmem:[#allocation2 + $0x518] sm:$0xff] }
 0x134   :  { %690 = vmatprep.subr.bf16.mxu0 %v446_v58  ;;  %895 = vmatprep.subr.bf16.mxu1 %v448_v59  ;;  %v501_v58 = vld [vmem:[#allocation2 + $0x500] sm:$0xff]  ;;  %v503_v59 = vld [vmem:[#allocation2 + $0x510] sm:$0xff] }
 0x137   :  { %691 = vmatpush1.bf16.msra.mxu0 %v445_v60  ;;  %896 = vmatpush1.bf16.msra.mxu1 %v447_v61  ;;  %v506_v60 = vld [vmem:[#allocation2 + $0x528] sm:$0xff]  ;;  %v508_v61 = vld [vmem:[#allocation2 + $0x538] sm:$0xff] }
 0x138   :  { %692 = vmatprep.subr.bf16.mxu0 %v450_v62  ;;  %897 = vmatprep.subr.bf16.mxu1 %v452_v63  ;;  %v505_v62 = vld [vmem:[#allocation2 + $0x520] sm:$0xff]  ;;  %v507_v63 = vld [vmem:[#allocation2 + $0x530] sm:$0xff] }
 0x13b   :  { %693 = vmatpush1.bf16.msra.mxu0 %v449_v1  ;;  %898 = vmatpush1.bf16.msra.mxu1 %v451_v9  ;;  %v510_v1 = vld [vmem:[#allocation2 + $0x548] sm:$0xff]  ;;  %v512_v9 = vld [vmem:[#allocation2 + $0x558] sm:$0xff] }
 0x13c   :  { %694 = vmatprep.subr.bf16.mxu0 %v454_v10  ;;  %899 = vmatprep.subr.bf16.mxu1 %v456_v11  ;;  %v509_v10 = vld [vmem:[#allocation2 + $0x540] sm:$0xff]  ;;  %v511_v11 = vld [vmem:[#allocation2 + $0x550] sm:$0xff] }
 0x13f   :  { %695 = vmatpush1.bf16.msra.mxu0 %v453_v12  ;;  %900 = vmatpush1.bf16.msra.mxu1 %v455_v13  ;;  %v514_v12 = vld [vmem:[#allocation2 + $0x568] sm:$0xff]  ;;  %v516_v13 = vld [vmem:[#allocation2 + $0x578] sm:$0xff] }
 0x140   :  { %696 = vmatprep.subr.bf16.mxu0 %v458_v14  ;;  %901 = vmatprep.subr.bf16.mxu1 %v460_v15  ;;  %v513_v14 = vld [vmem:[#allocation2 + $0x560] sm:$0xff]  ;;  %v515_v15 = vld [vmem:[#allocation2 + $0x570] sm:$0xff] }
 0x143   :  { %697 = vmatpush1.bf16.msra.mxu0 %v457_v16  ;;  %902 = vmatpush1.bf16.msra.mxu1 %v459_v17  ;;  %v518_v16 = vld [vmem:[#allocation2 + $0x588] sm:$0xff]  ;;  %v520_v17 = vld [vmem:[#allocation2 + $0x598] sm:$0xff] }
 0x144   :  { %698 = vmatprep.subr.bf16.mxu0 %v462_v18  ;;  %903 = vmatprep.subr.bf16.mxu1 %v464_v19  ;;  %v517_v18 = vld [vmem:[#allocation2 + $0x580] sm:$0xff]  ;;  %v519_v19 = vld [vmem:[#allocation2 + $0x590] sm:$0xff] }
 0x147   :  { %699 = vmatpush1.bf16.msra.mxu0 %v461_v20  ;;  %904 = vmatpush1.bf16.msra.mxu1 %v463_v21  ;;  %v522_v20 = vld [vmem:[#allocation2 + $0x5a8] sm:$0xff]  ;;  %v524_v21 = vld [vmem:[#allocation2 + $0x5b8] sm:$0xff] }
 0x148   :  { %700 = vmatprep.subr.bf16.mxu0 %v466_v22  ;;  %905 = vmatprep.subr.bf16.mxu1 %v468_v23  ;;  %v521_v22 = vld [vmem:[#allocation2 + $0x5a0] sm:$0xff]  ;;  %v523_v23 = vld [vmem:[#allocation2 + $0x5b0] sm:$0xff] }
 0x14b   :  { %701 = vmatpush1.bf16.msra.mxu0 %v465_v24  ;;  %906 = vmatpush1.bf16.msra.mxu1 %v467_v25  ;;  %v526_v24 = vld [vmem:[#allocation2 + $0x5c8] sm:$0xff]  ;;  %v528_v25 = vld [vmem:[#allocation2 + $0x5d8] sm:$0xff] }
 0x14c   :  { %711 = vmatprep.subr.bf16.mxu0 %v470_v26  ;;  %916 = vmatprep.subr.bf16.mxu1 %v472_v27  ;;  %v525_v26 = vld [vmem:[#allocation2 + $0x5c0] sm:$0xff]  ;;  %v527_v27 = vld [vmem:[#allocation2 + $0x5d0] sm:$0xff] }
 0x14e   :  { %703 = vmatmul.mubr.bf16.vlgmr.msra.gmra.mrb[0].mxu0 %v334_v0  ;;  %908 = vmatmul.mubr.bf16.vlgmr.msra.gmra.mrb[0].mxu1 %v334_v0  ;;  %v530_v0 = vld [vmem:[#allocation2 + $0x5e8] sm:$0xff] }
 0x14f   :  { %712 = vmatpush1.bf16.msra.mxu0 %v469_v28  ;;  %917 = vmatpush1.bf16.msra.mxu1 %v471_v29  ;;  %v532_v28 = vld [vmem:[#allocation2 + $0x5f8] sm:$0xff]  ;;  %v529_v29 = vld [vmem:[#allocation2 + $0x5e0] sm:$0xff] }
 0x150   :  { %713 = vmatprep.subr.bf16.mxu0 %v474_v30  ;;  %918 = vmatprep.subr.bf16.mxu1 %v476_v31  ;;  %v531_v30 = vld [vmem:[#allocation2 + $0x5f0] sm:$0xff]  ;;  %v534_v31 = vld [vmem:[#allocation2 + $0x608] sm:$0xff] }
 0x151   :  { %743 = vmatprep.mubr.bf16.mxu0 %v337_v3  ;;  %948 = vmatprep.mubr.bf16.mxu1 %v337_v3  ;;  %v536_v3 = vld [vmem:[#allocation2 + $0x618] sm:$0xff] }
 0x153   :  { %714 = vmatpush1.bf16.msra.mxu0 %v473_v32  ;;  %919 = vmatpush1.bf16.msra.mxu1 %v475_v33  ;;  %v336_v32 = vpack.c.bf16 %v4207_v4, %v4207_v4  ;;  %v533_v33 = vld [vmem:[#allocation2 + $0x600] sm:$0xff]  ;;  %v542_v4 = vld [vmem:[#allocation2 + $0x648] sm:$0xff] }
 0x154   :  { %715 = vmatprep.subr.bf16.mxu0 %v478_v2  ;;  %920 = vmatprep.subr.bf16.mxu1 %v480_v34  ;;  %v535_v2 = vld [vmem:[#allocation2 + $0x610] sm:$0xff]  ;;  %v538_v34 = vld [vmem:[#allocation2 + $0x628] sm:$0xff] }
 0x157   :  { %716 = vmatpush1.bf16.msra.mxu0 %v477_v35  ;;  %921 = vmatpush1.bf16.msra.mxu1 %v479_v36  ;;  %v540_v35 = vld [vmem:[#allocation2 + $0x638] sm:$0xff]  ;;  %v339_v36 = vpack.c.bf16 %v4213_v7, %v4213_v7 }
 0x158   :  { %717 = vmatprep.subr.bf16.mxu0 %v482_v37  ;;  %922 = vmatprep.subr.bf16.mxu1 %v484_v5  ;;  %v537_v37 = vld [vmem:[#allocation2 + $0x620] sm:$0xff]  ;;  %v539_v5 = vld [vmem:[#allocation2 + $0x630] sm:$0xff]  ;;  %v548_v7 = vld [vmem:[#allocation2 + $0x678] sm:$0xff] }
 0x15b   :  { %718 = vmatpush1.bf16.msra.mxu0 %v481_v38  ;;  %923 = vmatpush1.bf16.msra.mxu1 %v483_v39  ;;  %v544_v38 = vld [vmem:[#allocation2 + $0x658] sm:$0xff]  ;;  %v541_v39 = vld [vmem:[#allocation2 + $0x640] sm:$0xff] }
 0x15c   :  { %719 = vmatprep.subr.bf16.mxu0 %v486_v40  ;;  %924 = vmatprep.subr.bf16.mxu1 %v488_v41  ;;  %v543_v40 = vld [vmem:[#allocation2 + $0x650] sm:$0xff]  ;;  %v546_v41 = vld [vmem:[#allocation2 + $0x668] sm:$0xff] }
 0x15f   :  { %720 = vmatpush1.bf16.msra.mxu0 %v485_v42  ;;  %925 = vmatpush1.bf16.msra.mxu1 %v487_v43  ;;  %v545_v42 = vld [vmem:[#allocation2 + $0x660] sm:$0xff]  ;;  %v547_v43 = vld [vmem:[#allocation2 + $0x670] sm:$0xff] }
 0x160   :  { %721 = vmatprep.subr.bf16.mxu0 %v490_v44  ;;  %926 = vmatprep.subr.bf16.mxu1 %v492_v45  ;;  %v550_v44 = vld [vmem:[#allocation2 + $0x688] sm:$0xff]  ;;  %v552_v45 = vld [vmem:[#allocation2 + $0x698] sm:$0xff] }
 0x163   :  { %722 = vmatpush1.bf16.msra.mxu0 %v489_v46  ;;  %927 = vmatpush1.bf16.msra.mxu1 %v491_v47  ;;  %v549_v46 = vld [vmem:[#allocation2 + $0x680] sm:$0xff]  ;;  %v551_v47 = vld [vmem:[#allocation2 + $0x690] sm:$0xff] }
 0x164   :  { %723 = vmatprep.subr.bf16.mxu0 %v494_v48  ;;  %928 = vmatprep.subr.bf16.mxu1 %v496_v49  ;;  %v554_v48 = vld [vmem:[#allocation2 + $0x6a8] sm:$0xff]  ;;  %v556_v49 = vld [vmem:[#allocation2 + $0x6b8] sm:$0xff] }
 0x167   :  { %724 = vmatpush1.bf16.msra.mxu0 %v493_v50  ;;  %929 = vmatpush1.bf16.msra.mxu1 %v495_v51  ;;  %v553_v50 = vld [vmem:[#allocation2 + $0x6a0] sm:$0xff]  ;;  %v555_v51 = vld [vmem:[#allocation2 + $0x6b0] sm:$0xff] }
 0x168   :  { %725 = vmatprep.subr.bf16.mxu0 %v498_v52  ;;  %930 = vmatprep.subr.bf16.mxu1 %v500_v53  ;;  %v558_v52 = vld [vmem:[#allocation2 + $0x6c8] sm:$0xff]  ;;  %v560_v53 = vld [vmem:[#allocation2 + $0x6d8] sm:$0xff] }
 0x16b   :  { %726 = vmatpush1.bf16.msra.mxu0 %v497_v54  ;;  %931 = vmatpush1.bf16.msra.mxu1 %v499_v55  ;;  %v557_v54 = vld [vmem:[#allocation2 + $0x6c0] sm:$0xff]  ;;  %v559_v55 = vld [vmem:[#allocation2 + $0x6d0] sm:$0xff] }
 0x16c   :  { %727 = vmatprep.subr.bf16.mxu0 %v502_v56  ;;  %932 = vmatprep.subr.bf16.mxu1 %v504_v57  ;;  %v562_v56 = vld [vmem:[#allocation2 + $0x6e8] sm:$0xff]  ;;  %v564_v57 = vld [vmem:[#allocation2 + $0x6f8] sm:$0xff] }
 0x16f   :  { %728 = vmatpush1.bf16.msra.mxu0 %v501_v58  ;;  %933 = vmatpush1.bf16.msra.mxu1 %v503_v59  ;;  %v561_v58 = vld [vmem:[#allocation2 + $0x6e0] sm:$0xff]  ;;  %v563_v59 = vld [vmem:[#allocation2 + $0x6f0] sm:$0xff] }
 0x170   :  { %729 = vmatprep.subr.bf16.mxu0 %v506_v60  ;;  %934 = vmatprep.subr.bf16.mxu1 %v508_v61  ;;  %v566_v60 = vld [vmem:[#allocation2 + $0x708] sm:$0xff]  ;;  %v568_v61 = vld [vmem:[#allocation2 + $0x718] sm:$0xff] }
 0x173   :  { %730 = vmatpush1.bf16.msra.mxu0 %v505_v62  ;;  %935 = vmatpush1.bf16.msra.mxu1 %v507_v63  ;;  %v565_v62 = vld [vmem:[#allocation2 + $0x700] sm:$0xff]  ;;  %v567_v63 = vld [vmem:[#allocation2 + $0x710] sm:$0xff] }
 0x174   :  { %731 = vmatprep.subr.bf16.mxu0 %v510_v1  ;;  %936 = vmatprep.subr.bf16.mxu1 %v512_v9  ;;  %v570_v1 = vld [vmem:[#allocation2 + $0x728] sm:$0xff]  ;;  %v572_v9 = vld [vmem:[#allocation2 + $0x738] sm:$0xff] }
 0x177   :  { %732 = vmatpush1.bf16.msra.mxu0 %v509_v10  ;;  %937 = vmatpush1.bf16.msra.mxu1 %v511_v11  ;;  %v569_v10 = vld [vmem:[#allocation2 + $0x720] sm:$0xff]  ;;  %v571_v11 = vld [vmem:[#allocation2 + $0x730] sm:$0xff] }
 0x178   :  { %733 = vmatprep.subr.bf16.mxu0 %v514_v12  ;;  %938 = vmatprep.subr.bf16.mxu1 %v516_v13  ;;  %v574_v12 = vld [vmem:[#allocation2 + $0x748] sm:$0xff]  ;;  %v576_v13 = vld [vmem:[#allocation2 + $0x758] sm:$0xff] }
 0x17b   :  { %734 = vmatpush1.bf16.msra.mxu0 %v513_v14  ;;  %939 = vmatpush1.bf16.msra.mxu1 %v515_v15  ;;  %v573_v14 = vld [vmem:[#allocation2 + $0x740] sm:$0xff]  ;;  %v575_v15 = vld [vmem:[#allocation2 + $0x750] sm:$0xff] }
 0x17c   :  { %735 = vmatprep.subr.bf16.mxu0 %v518_v16  ;;  %940 = vmatprep.subr.bf16.mxu1 %v520_v17  ;;  %v578_v16 = vld [vmem:[#allocation2 + $0x768] sm:$0xff]  ;;  %v580_v17 = vld [vmem:[#allocation2 + $0x778] sm:$0xff] }
 0x17f   :  { %736 = vmatpush1.bf16.msra.mxu0 %v517_v18  ;;  %941 = vmatpush1.bf16.msra.mxu1 %v519_v19  ;;  %v577_v18 = vld [vmem:[#allocation2 + $0x760] sm:$0xff]  ;;  %v579_v19 = vld [vmem:[#allocation2 + $0x770] sm:$0xff] }
 0x180   :  { %737 = vmatprep.subr.bf16.mxu0 %v522_v20  ;;  %942 = vmatprep.subr.bf16.mxu1 %v524_v21  ;;  %v582_v20 = vld [vmem:[#allocation2 + $0x788] sm:$0xff]  ;;  %v584_v21 = vld [vmem:[#allocation2 + $0x798] sm:$0xff] }
 0x183   :  { %738 = vmatpush1.bf16.msra.mxu0 %v521_v22  ;;  %943 = vmatpush1.bf16.msra.mxu1 %v523_v23  ;;  %v581_v22 = vld [vmem:[#allocation2 + $0x780] sm:$0xff]  ;;  %v583_v23 = vld [vmem:[#allocation2 + $0x790] sm:$0xff] }
 0x184   :  { %739 = vmatprep.subr.bf16.mxu0 %v526_v24  ;;  %944 = vmatprep.subr.bf16.mxu1 %v528_v25  ;;  %v586_v24 = vld [vmem:[#allocation2 + $0x7a8] sm:$0xff]  ;;  %v588_v25 = vld [vmem:[#allocation2 + $0x7b8] sm:$0xff] }
 0x187   :  { %740 = vmatpush1.bf16.msra.mxu0 %v525_v26  ;;  %945 = vmatpush1.bf16.msra.mxu1 %v527_v27  ;;  %v585_v26 = vld [vmem:[#allocation2 + $0x7a0] sm:$0xff]  ;;  %v587_v27 = vld [vmem:[#allocation2 + $0x7b0] sm:$0xff] }
 0x188   :  { %741 = vmatprep.subr.bf16.mxu0 %v530_v0  ;;  %946 = vmatprep.subr.bf16.mxu1 %v532_v28  ;;  %v590_v0 = vld [vmem:[#allocation2 + $0x7c8] sm:$0xff]  ;;  %v592_v28 = vld [vmem:[#allocation2 + $0x7d8] sm:$0xff] }
 0x18b   :  { %742 = vmatpush1.bf16.msra.mxu0 %v529_v29  ;;  %947 = vmatpush1.bf16.msra.mxu1 %v531_v30  ;;  %v589_v29 = vld [vmem:[#allocation2 + $0x7c0] sm:$0xff]  ;;  %v591_v30 = vld [vmem:[#allocation2 + $0x7d0] sm:$0xff] }
 0x18c   :  { %752 = vmatprep.subr.bf16.mxu0 %v534_v31  ;;  %957 = vmatprep.subr.bf16.mxu1 %v536_v3  ;;  %v594_v31 = vld [vmem:[#allocation2 + $0x7e8] sm:$0xff]  ;;  %v596_v3 = vld [vmem:[#allocation2 + $0x7f8] sm:$0xff] }
 0x18e   :  { %744 = vmatmul.mubr.bf16.vlgmr.msra.gmra.mrb[0].mxu0 %v336_v32  ;;  %949 = vmatmul.mubr.bf16.vlgmr.msra.gmra.mrb[0].mxu1 %v336_v32  ;;  %v593_v32 = vld [vmem:[#allocation2 + $0x7e0] sm:$0xff] }
 0x18f   :  { %753 = vmatpush1.bf16.msra.mxu0 %v533_v33  ;;  %958 = vmatpush1.bf16.msra.mxu1 %v535_v2  ;;  %v595_v33 = vld [vmem:[#allocation2 + $0x7f0] sm:$0xff]  ;;  %v598_v2 = vld [vmem:[#allocation2 + $0x808] sm:$0xff] }
 0x190   :  { %754 = vmatprep.subr.bf16.mxu0 %v538_v34  ;;  %959 = vmatprep.subr.bf16.mxu1 %v540_v35  ;;  %v600_v34 = vld [vmem:[#allocation2 + $0x818] sm:$0xff]  ;;  %v338_v35 = vpack.c.bf16 %v4211_v6, %v4211_v6  ;;  %v605_v6 = vld [vmem:[#allocation2 + $0x840] sm:$0xff] }
 0x191   :  { %784 = vmatprep.mubr.bf16.mxu0 %v339_v36  ;;  %989 = vmatprep.mubr.bf16.mxu1 %v339_v36  ;;  %v597_v36 = vld [vmem:[#allocation2 + $0x800] sm:$0xff] }
 0x193   :  { %755 = vmatpush1.bf16.msra.mxu0 %v537_v37  ;;  %960 = vmatpush1.bf16.msra.mxu1 %v539_v5  ;;  %v599_v37 = vld [vmem:[#allocation2 + $0x810] sm:$0xff]  ;;  %v602_v5 = vld [vmem:[#allocation2 + $0x828] sm:$0xff] }
 0x194   :  { %756 = vmatprep.subr.bf16.mxu0 %v542_v4  ;;  %961 = vmatprep.subr.bf16.mxu1 %v544_v38  ;;  %v604_v4 = vld [vmem:[#allocation2 + $0x838] sm:$0xff]  ;;  %v601_v38 = vld [vmem:[#allocation2 + $0x820] sm:$0xff] }
 0x197   :  { %757 = vmatpush1.bf16.msra.mxu0 %v541_v39  ;;  %962 = vmatpush1.bf16.msra.mxu1 %v543_v40  ;;  %v603_v39 = vld [vmem:[#allocation2 + $0x830] sm:$0xff]  ;;  %v606_v40 = vld [vmem:[#allocation2 + $0x848] sm:$0xff] }
 0x198   :  { %758 = vmatprep.subr.bf16.mxu0 %v546_v41  ;;  %963 = vmatprep.subr.bf16.mxu1 %v548_v7  ;;  %v608_v41 = vld [vmem:[#allocation2 + $0x858] sm:$0xff]  ;;  %v3946_v7 = vmov 0  }
 0x19b   :  { %759 = vmatpush1.bf16.msra.mxu0 %v545_v42  ;;  %964 = vmatpush1.bf16.msra.mxu1 %v547_v43  ;;  %v607_v42 = vld [vmem:[#allocation2 + $0x850] sm:$0xff]  ;;  %v610_v43 = vld [vmem:[#allocation2 + $0x868] sm:$0xff] }
 0x19c   :  { %760 = vmatprep.subr.bf16.mxu0 %v550_v44  ;;  %965 = vmatprep.subr.bf16.mxu1 %v552_v45  ;;  %v612_v44 = vld [vmem:[#allocation2 + $0x878] sm:$0xff]  ;;  %v609_v45 = vld [vmem:[#allocation2 + $0x860] sm:$0xff] }
 0x19f   :  { %761 = vmatpush1.bf16.msra.mxu0 %v549_v46  ;;  %966 = vmatpush1.bf16.msra.mxu1 %v551_v47  ;;  %v611_v46 = vld [vmem:[#allocation2 + $0x870] sm:$0xff]  ;;  %v614_v47 = vld [vmem:[#allocation2 + $0x888] sm:$0xff] }
 0x1a0   :  { %762 = vmatprep.subr.bf16.mxu0 %v554_v48  ;;  %967 = vmatprep.subr.bf16.mxu1 %v556_v49  ;;  %v616_v48 = vld [vmem:[#allocation2 + $0x898] sm:$0xff]  ;;  %v613_v49 = vld [vmem:[#allocation2 + $0x880] sm:$0xff] }
 0x1a3   :  { %763 = vmatpush1.bf16.msra.mxu0 %v553_v50  ;;  %968 = vmatpush1.bf16.msra.mxu1 %v555_v51  ;;  %v615_v50 = vld [vmem:[#allocation2 + $0x890] sm:$0xff]  ;;  %v618_v51 = vld [vmem:[#allocation2 + $0x8a8] sm:$0xff] }
 0x1a4   :  { %764 = vmatprep.subr.bf16.mxu0 %v558_v52  ;;  %969 = vmatprep.subr.bf16.mxu1 %v560_v53  ;;  %v620_v52 = vld [vmem:[#allocation2 + $0x8b8] sm:$0xff]  ;;  %v617_v53 = vld [vmem:[#allocation2 + $0x8a0] sm:$0xff] }
 0x1a7   :  { %765 = vmatpush1.bf16.msra.mxu0 %v557_v54  ;;  %970 = vmatpush1.bf16.msra.mxu1 %v559_v55  ;;  %v619_v54 = vld [vmem:[#allocation2 + $0x8b0] sm:$0xff]  ;;  %v622_v55 = vld [vmem:[#allocation2 + $0x8c8] sm:$0xff] }
 0x1a8   :  { %766 = vmatprep.subr.bf16.mxu0 %v562_v56  ;;  %971 = vmatprep.subr.bf16.mxu1 %v564_v57  ;;  %v624_v56 = vld [vmem:[#allocation2 + $0x8d8] sm:$0xff]  ;;  %v621_v57 = vld [vmem:[#allocation2 + $0x8c0] sm:$0xff] }
 0x1ab   :  { %767 = vmatpush1.bf16.msra.mxu0 %v561_v58  ;;  %972 = vmatpush1.bf16.msra.mxu1 %v563_v59  ;;  %v623_v58 = vld [vmem:[#allocation2 + $0x8d0] sm:$0xff]  ;;  %v626_v59 = vld [vmem:[#allocation2 + $0x8e8] sm:$0xff] }
 0x1ac   :  { %768 = vmatprep.subr.bf16.mxu0 %v566_v60  ;;  %973 = vmatprep.subr.bf16.mxu1 %v568_v61  ;;  %v628_v60 = vld [vmem:[#allocation2 + $0x8f8] sm:$0xff]  ;;  %v625_v61 = vld [vmem:[#allocation2 + $0x8e0] sm:$0xff] }
 0x1af   :  { %769 = vmatpush1.bf16.msra.mxu0 %v565_v62  ;;  %974 = vmatpush1.bf16.msra.mxu1 %v567_v63  ;;  %v627_v62 = vld [vmem:[#allocation2 + $0x8f0] sm:$0xff]  ;;  %v340_v63 = vpack.c.bf16 %v4215_v8, %v4215_v8 }
 0x1b0   :  { %770 = vmatprep.subr.bf16.mxu0 %v570_v1  ;;  %975 = vmatprep.subr.bf16.mxu1 %v572_v9 }
 0x1b3   :  { %771 = vmatpush1.bf16.msra.mxu0 %v569_v10  ;;  %976 = vmatpush1.bf16.msra.mxu1 %v571_v11 }
 0x1b4   :  { %772 = vmatprep.subr.bf16.mxu0 %v574_v12  ;;  %977 = vmatprep.subr.bf16.mxu1 %v576_v13 }
 0x1b7   :  { %773 = vmatpush1.bf16.msra.mxu0 %v573_v14  ;;  %978 = vmatpush1.bf16.msra.mxu1 %v575_v15 }
 0x1b8   :  { %774 = vmatprep.subr.bf16.mxu0 %v578_v16  ;;  %979 = vmatprep.subr.bf16.mxu1 %v580_v17 }
 0x1bb   :  { %775 = vmatpush1.bf16.msra.mxu0 %v577_v18  ;;  %980 = vmatpush1.bf16.msra.mxu1 %v579_v19 }
 0x1bc   :  { %776 = vmatprep.subr.bf16.mxu0 %v582_v20  ;;  %981 = vmatprep.subr.bf16.mxu1 %v584_v21 }
 0x1bf   :  { %777 = vmatpush1.bf16.msra.mxu0 %v581_v22  ;;  %982 = vmatpush1.bf16.msra.mxu1 %v583_v23 }
 0x1c0   :  { %778 = vmatprep.subr.bf16.mxu0 %v586_v24  ;;  %983 = vmatprep.subr.bf16.mxu1 %v588_v25 }
 0x1c3   :  { %779 = vmatpush1.bf16.msra.mxu0 %v585_v26  ;;  %984 = vmatpush1.bf16.msra.mxu1 %v587_v27 }
 0x1c4   :  { %780 = vmatprep.subr.bf16.mxu0 %v590_v0  ;;  %985 = vmatprep.subr.bf16.mxu1 %v592_v28 }
 0x1c7   :  { %781 = vmatpush1.bf16.msra.mxu0 %v589_v29  ;;  %986 = vmatpush1.bf16.msra.mxu1 %v591_v30 }
 0x1c8   :  { %782 = vmatprep.subr.bf16.mxu0 %v594_v31  ;;  %987 = vmatprep.subr.bf16.mxu1 %v596_v3 }
 0x1cb   :  { %783 = vmatpush1.bf16.msra.mxu0 %v593_v32  ;;  %988 = vmatpush1.bf16.msra.mxu1 %v595_v33 }
 0x1cc   :  { %793 = vmatprep.subr.bf16.mxu0 %v598_v2  ;;  %998 = vmatprep.subr.bf16.mxu1 %v600_v34 }
 0x1ce   :  { %785 = vmatmul.mubr.bf16.vlgmr.msra.gmra.mrb[0].mxu0 %v338_v35  ;;  %990 = vmatmul.mubr.bf16.vlgmr.msra.gmra.mrb[0].mxu1 %v338_v35 }
 0x1cf   :  { %794 = vmatpush1.bf16.msra.mxu0 %v597_v36  ;;  %999 = vmatpush1.bf16.msra.mxu1 %v599_v37 }
 0x1d0   :  { %795 = vmatprep.subr.bf16.mxu0 %v602_v5  ;;  %1000 = vmatprep.subr.bf16.mxu1 %v604_v4 }
 0x1d1   :  { %825 = vmatprep.mubr.bf16.mxu0 %v3946_v7  ;;  %1030 = vmatprep.mubr.bf16.mxu1 %v3946_v7 }
 0x1d3   :  { %796 = vmatpush1.bf16.msra.mxu0 %v601_v38  ;;  %1001 = vmatpush1.bf16.msra.mxu1 %v603_v39 }
 0x1d4   :  { %797 = vmatprep.subr.bf16.mxu0 %v606_v40  ;;  %1002 = vmatprep.subr.bf16.mxu1 %v608_v41 }
 0x1d7   :  { %798 = vmatpush1.bf16.msra.mxu0 %v605_v6  ;;  %1003 = vmatpush1.bf16.msra.mxu1 %v607_v42 }
 0x1d8   :  { %799 = vmatprep.subr.bf16.mxu0 %v610_v43  ;;  %1004 = vmatprep.subr.bf16.mxu1 %v612_v44 }
 0x1db   :  { %800 = vmatpush1.bf16.msra.mxu0 %v609_v45  ;;  %1005 = vmatpush1.bf16.msra.mxu1 %v611_v46 }
 0x1dc   :  { %801 = vmatprep.subr.bf16.mxu0 %v614_v47  ;;  %1006 = vmatprep.subr.bf16.mxu1 %v616_v48 }
 0x1df   :  { %802 = vmatpush1.bf16.msra.mxu0 %v613_v49  ;;  %1007 = vmatpush1.bf16.msra.mxu1 %v615_v50 }
 0x1e0   :  { %803 = vmatprep.subr.bf16.mxu0 %v618_v51  ;;  %1008 = vmatprep.subr.bf16.mxu1 %v620_v52 }
 0x1e3   :  { %804 = vmatpush1.bf16.msra.mxu0 %v617_v53  ;;  %1009 = vmatpush1.bf16.msra.mxu1 %v619_v54 }
 0x1e4   :  { %805 = vmatprep.subr.bf16.mxu0 %v622_v55  ;;  %1010 = vmatprep.subr.bf16.mxu1 %v624_v56 }
 0x1e7   :  { %806 = vmatpush1.bf16.msra.mxu0 %v621_v57  ;;  %1011 = vmatpush1.bf16.msra.mxu1 %v623_v58 }
 0x1e8   :  { %807 = vmatprep.subr.bf16.mxu0 %v626_v59  ;;  %1012 = vmatprep.subr.bf16.mxu1 %v628_v60 }
 0x1eb   :  { %808 = vmatpush1.bf16.msra.mxu0 %v625_v61  ;;  %1013 = vmatpush1.bf16.msra.mxu1 %v627_v62 }
 0x1ee   :  { %826 = vmatmul.mubr.bf16.vlgmr.msra.gmra.mrb[0].mxu0 %v340_v63  ;;  %1031 = vmatmul.mubr.bf16.vlgmr.msra.gmra.mrb[0].mxu1 %v340_v63 }
 0x2c1   :  { %v4235_v1 = vpop.f32.mrb[0].mxu0  ;;  %v4237_v9 = vpop.f32.mrb[0].mxu1 }
 0x2c2   :  { %v1040_v10 = vrot.slane %v4235_v1, 4  ;;  %v1069_v11 = vmul.f32 %v4235_v1, %v4235_v1  ;;  %v1052_v12 = vrot.slane %v4237_v9, 4  ;;  %v1071_v13 = vmul.f32 %v4237_v9, %v4237_v9  ;;  %v4245_v14 = vpop.f32.mrb[1].mxu0  ;;  %v4247_v8 = vpop.f32.mrb[1].mxu1 }
 0x2c3   :  { %v1046_v15 = vrot.slane %v4245_v14, 4  ;;  %v1070_v16 = vmul.f32 %v4245_v14, %v4245_v14  ;;  %v1058_v17 = vrot.slane %v4247_v8, 4  ;;  %v1072_v18 = vmul.f32 %v4247_v8, %v4247_v8  ;;  %v831_v19 = vpop.f32.mrb[2].mxu0  ;;  %v1036_v20 = vpop.f32.mrb[2].mxu1 }
 0x2c4   :  { %v1041_v21 = vadd.f32 %v1040_v10, %v4235_v1  ;;  %v1073_v22 = vrot.slane %v1069_v11, 4  ;;  %v1053_v23 = vadd.f32 %v1052_v12, %v4237_v9  ;;  %v1085_v24 = vrot.slane %v1071_v13, 4  ;;  %v832_v25 = vpop.f32.mrb[3].mxu0  ;;  %v1037_v26 = vpop.f32.mrb[3].mxu1 }
 0x2c5   :  { %v1047_v27 = vadd.f32 %v1046_v15, %v4245_v14  ;;  %v1079_v0 = vrot.slane %v1070_v16, 4  ;;  %v1059_v28 = vadd.f32 %v1058_v17, %v4247_v8  ;;  %v1091_v29 = vrot.slane %v1072_v18, 4 }
 0x2c6   :  { %v1042_v30 = vrot.slane %v1041_v21, 2  ;;  %v1074_v31 = vadd.f32 %v1073_v22, %v1069_v11  ;;  %v1054_v3 = vrot.slane %v1053_v23, 2  ;;  %v1086_v32 = vadd.f32 %v1085_v24, %v1071_v13 }
 0x2c7   :  { %v1048_v33 = vrot.slane %v1047_v27, 2  ;;  %v1080_v2 = vadd.f32 %v1079_v0, %v1070_v16  ;;  %v1060_v34 = vrot.slane %v1059_v28, 2  ;;  %v1092_v35 = vadd.f32 %v1091_v29, %v1072_v18 }
 0x2c8   :  { %v1043_v36 = vadd.f32 %v1042_v30, %v1041_v21  ;;  %v1075_v37 = vrot.slane %v1074_v31, 2  ;;  %v1055_v5 = vadd.f32 %v1054_v3, %v1053_v23  ;;  %v1087_v4 = vrot.slane %v1086_v32, 2 }
 0x2c9   :  { %v1049_v38 = vadd.f32 %v1048_v33, %v1047_v27  ;;  %v1081_v39 = vrot.slane %v1080_v2, 2  ;;  %v1061_v40 = vadd.f32 %v1060_v34, %v1059_v28  ;;  %v1093_v41 = vrot.slane %v1092_v35, 2 }
 0x2ca   :  { %v1044_v6 = vrot.slane %v1043_v36, 1  ;;  %v1076_v42 = vadd.f32 %v1075_v37, %v1074_v31  ;;  %v1056_v43 = vrot.slane %v1055_v5, 1  ;;  %v1088_v44 = vadd.f32 %v1087_v4, %v1086_v32 }
 0x2cb   :  { %v1050_v45 = vrot.slane %v1049_v38, 1  ;;  %v1082_v46 = vadd.f32 %v1081_v39, %v1080_v2  ;;  %v1062_v47 = vrot.slane %v1061_v40, 1  ;;  %v1094_v48 = vadd.f32 %v1093_v41, %v1092_v35 }
 0x2cc   :  { %v1045_v49 = vadd.f32 %v1044_v6, %v1043_v36  ;;  %v1077_v50 = vrot.slane %v1076_v42, 1  ;;  %v1057_v51 = vadd.f32 %v1056_v43, %v1055_v5  ;;  %v1089_v52 = vrot.slane %v1088_v44, 1  ;;  %v1039_v43 = vld [vmem:[#allocation13] sm:$0xff] }
 0x2cd   :  { %v1051_v53 = vadd.f32 %v1050_v45, %v1049_v38  ;;  %v1083_v54 = vrot.slane %v1082_v46, 1  ;;  %v1063_v55 = vadd.f32 %v1062_v47, %v1061_v40  ;;  %v1095_v56 = vrot.slane %v1094_v48, 1 }
 0x2ce   :  { %v4259_v57 = vmul.f32 0.125, %v1045_v49  ;;  %v1078_v58 = vadd.f32 %v1077_v50, %v1076_v42  ;;  %v4261_v59 = vmul.f32 0.125, %v1057_v51  ;;  %v1090_v60 = vadd.f32 %v1089_v52, %v1088_v44 }
 0x2cf   :  { %v4263_v61 = vmul.f32 0.125, %v1051_v53  ;;  %v1084_v62 = vadd.f32 %v1083_v54, %v1082_v46  ;;  %v4265_v63 = vmul.f32 0.125, %v1063_v55  ;;  %v1096_v10 = vadd.f32 %v1095_v56, %v1094_v48 }
 0x2d0   :  { %v1097_v11 = vmul.f32 0.125, %v1078_v58  ;;  %v1101_v12 = vmul.f32 %v4259_v57, %v4259_v57  ;;  %v1099_v13 = vmul.f32 0.125, %v1090_v60  ;;  %v1103_v15 = vmul.f32 %v4261_v59, %v4261_v59 }
 0x2d1   :  { %v1098_v16 = vmul.f32 0.125, %v1084_v62  ;;  %v1102_v17 = vmul.f32 %v4263_v61, %v4263_v61  ;;  %v1100_v19 = vmul.f32 0.125, %v1096_v10  ;;  %v1104_v20 = vmul.f32 %v4265_v63, %v4265_v63 }
 0x2d2   :  { %v1105_v18 = vsub.f32 %v1097_v11, %v1101_v12  ;;  %v1107_v21 = vsub.f32 %v1099_v13, %v1103_v15  ;;  %v3947_v31 = vmov 1983009808   ;;  %v1130_v32 = vlaneseq }
 0x2d3   :  { %v1106_v22 = vsub.f32 %v1098_v16, %v1102_v17  ;;  %v1108_v24 = vsub.f32 %v1100_v19, %v1104_v20  ;;  %v1128_v3 = vunpack.c.l.s4 %v3947_v31  ;;  %v1144_v13 = vsub.f32 %v4235_v1, %v4259_v57 }
 0x2d4   :  { %v1109_v23 = vmax.f32 %v1105_v18, 0.0  ;;  %v1111_v25 = vmax.f32 %v1107_v21, 0.0  ;;  %v1131_v2 = vshrl.u32 %v1130_v32, 7  ;;  %v1146_v15 = vsub.f32 %v4237_v9, %v4261_v59 }
 0x2d5   :  { %v1110_v26 = vmax.f32 %v1106_v22, 0.0  ;;  %v1112_v0 = vmax.f32 %v1108_v24, 0.0  ;;  %v1129_v33 = vunpack.c.0.s8 %v1128_v3  ;;  %v1145_v16 = vsub.f32 %v4245_v14, %v4263_v61 }
 0x2d6   :  { %v1113_v27 = vadd.f32 1e-05, %v1109_v23  ;;  %v1115_v28 = vadd.f32 1e-05, %v1111_v25  ;;  %v4277_v5 = vsub.s32 1, %v1131_v2  ;;  %v4279_v39 = vsub.s32 3, %v1131_v2 }
 0x2d7   :  { %v1114_v29 = vadd.f32 1e-05, %v1110_v26  ;;  %v1116_v30 = vadd.f32 1e-05, %v1112_v0  ;;  %v4275_v36 = vsub.s32 %v1129_v33, %v1131_v2  ;;  %v4281_v40 = vsub.s32 5, %v1131_v2 }
 0x2d8   :  { %3585 = vrsqrt.f32 %v1113_v27  ;;  %v4283_v41 = vsub.s32 7, %v1131_v2  ;;  %v4287_v45 = vsub.s32 0, %v1131_v2  ;;  %v1193_v46 = vrot.slane %v1039_v43, %v4277_v5 }
 0x2d9   :  { %3587 = vrsqrt.f32 %v1115_v28  ;;  %v1197_v47 = vrot.slane %v1039_v43, %v4279_v39  ;;  %v1201_v48 = vrot.slane %v1039_v43, %v4281_v40  ;;  %v4293_v51 = vsub.s32 2, %v1131_v2 }
 0x2da   :  { %3589 = vrsqrt.f32 %v1114_v29  ;;  %v1205_v49 = vrot.slane %v1039_v43, %v4283_v41  ;;  %v4295_v52 = vsub.s32 4, %v1131_v2  ;;  %v4297_v53 = vsub.s32 6, %v1131_v2 }
 0x2db   :  { %3591 = vrsqrt.f32 %v1116_v30  ;;  %v1213_v55 = vrot.slane %v1193_v46, %v4277_v5  ;;  %v1217_v56 = vrot.slane %v1197_v47, %v4277_v5  ;;  %v1221_v58 = vrot.slane %v1201_v48, %v4277_v5 }
 0x2dc   :  { %v1225_v60 = vrot.slane %v1205_v49, %v4277_v5  ;;  %v1147_v17 = vsub.f32 %v4247_v8, %v4265_v63 }
 0x2e2   :  { %v3586_v34 = vpop.eup %3585 }
 0x2e3   :  { %v3588_v35 = vpop.eup %3587 }
 0x2e4   :  { %v3590_v37 = vpop.eup %3589 }
 0x2e5   :  { %v3592_v4 = vpop.eup %3591  ;;  %v1125_v38 = vcombine.low %v3586_v34, %v3590_v37 }
 0x2e6   :  { %v1126_v6 = vcombine.low %v3588_v35, %v3592_v4 }
 0x2e7   :  { %v1133_v42 = vrot.slane %v1125_v38, %v4275_v36 }
 0x2e8   :  { %v1140_v44 = vrot.slane %v1126_v6, %v4275_v36 }
 0x2ea   :  { %v1141_v50 = vcombine.low %v1133_v42, %v1140_v44 }
 0x2ec   :  { %v1143_v54 = vmul.f32 %v1141_v50, %v1039_v43 }
 0x2ee   :  { %v1152_v62 = vrot.slane %v1143_v54, %v4287_v45  ;;  %v1156_v10 = vrot.slane %v1143_v54, %v4293_v51  ;;  %v1160_v11 = vrot.slane %v1143_v54, %v4295_v52  ;;  %v1164_v12 = vrot.slane %v1143_v54, %v4297_v53 }
 0x2f0   :  { %v1172_v18 = vrot.slane %v1152_v62, %v4287_v45  ;;  %v1176_v19 = vrot.slane %v1156_v10, %v4287_v45  ;;  %v1180_v20 = vrot.slane %v1160_v11, %v4287_v45  ;;  %v1184_v21 = vrot.slane %v1164_v12, %v4287_v45 }
 0x2f2   :  { %v1185_v22 = vmul.f32 %v1172_v18, %v1144_v13  ;;  %v1186_v23 = vmul.f32 %v1176_v19, %v1145_v16  ;;  %v1187_v1 = vmul.f32 %v1180_v20, %v1146_v15  ;;  %v1188_v57 = vmul.f32 %v1184_v21, %v1147_v17 }
 0x2f4   :  { %v1226_v24 = vadd.f32 %v1213_v55, %v1185_v22  ;;  %v1227_v9 = vadd.f32 %v1217_v56, %v1186_v23  ;;  %v1228_v59 = vadd.f32 %v1221_v58, %v1187_v1  ;;  %v1229_v25 = vadd.f32 %v1225_v60, %v1188_v57 }
 0x2f6   :  { %v3415_v14 = vmul.f32 -1.442695, %v1226_v24  ;;  %v3416_v61 = vmul.f32 -1.442695, %v1227_v9  ;;  %v3417_v26 = vmul.f32 -1.442695, %v1228_v59 }
 0x2f7   :  { %v3418_v8 = vmul.f32 -1.442695, %v1229_v25 }
 0x2f8   :  { %3593 = vpow2.f32 %v3415_v14 }
 0x2f9   :  { %3595 = vpow2.f32 %v3416_v61 }
 0x2fa   :  { %3597 = vpow2.f32 %v3417_v26 }
 0x2fb   :  { %3599 = vpow2.f32 %v3418_v8 }
 0x302   :  { %v3594_v63 = vpop.eup %3593 }
 0x303   :  { %v3596_v27 = vpop.eup %3595  ;;  %v1242_v0 = vadd.f32 1.0, %v3594_v63 }
 0x304   :  { %v3598_v28 = vpop.eup %3597  ;;  %v1243_v29 = vadd.f32 1.0, %v3596_v27 }
 0x305   :  { %v3600_v30 = vpop.eup %3599  ;;  %v1244_v31 = vadd.f32 1.0, %v3598_v28  ;;  %3601 = vrcp.f32 %v1242_v0 }
 0x306   :  { %v1245_v3 = vadd.f32 1.0, %v3600_v30  ;;  %3603 = vrcp.f32 %v1243_v29 }
 0x307   :  { %3605 = vrcp.f32 %v1244_v31 }
 0x308   :  { %3607 = vrcp.f32 %v1245_v3 }
 0x30f   :  { %v4319_v32 = vpop.eup %3601 }
 0x310   :  { %v3604_v33 = vpop.eup %3603 }
 0x311   :  { %v4321_v2 = vpop.eup %3605 }
 0x312   :  { %v4323_v34 = vpop.eup %3607 }
 0x313   :  { %3899 = dma.done.wait [#allocation8 + $0x1], 8192 }
 0x314   :  { %3900 = vsyncadd [#allocation8 + $0x1], 4294959104  ;;  %v1259_v35 = vpack.c.bf16 %v3604_v33, %v3604_v33  ;;  %v1263_v37 = vld [vmem:[#allocation3 + $0x8] sm:$0xff]  ;;  %v1262_v4 = vld [vmem:[#allocation3] sm:$0xff]  ;;  %v1258_v24 = vpack.c.bf16 %v4319_v32, %v4319_v32  ;;  %v1261_v9 = vpack.c.bf16 %v4323_v34, %v4323_v34 }
 0x315   :  { %v1265_v38 = vld [vmem:[#allocation3 + $0x18] sm:$0xff]  ;;  %1326 = vmatprep.subr.bf16.mxu0 %v1263_v37  ;;  %v1264_v6 = vld [vmem:[#allocation3 + $0x10] sm:$0xff]  ;;  %v1267_v42 = vld [vmem:[#allocation3 + $0x28] sm:$0xff] }
 0x316   :  { %1358 = vmatprep.mubr.bf16.mxu0 %v1259_v35  ;;  %1327 = vmatpush1.bf16.msra.mxu0 %v1262_v4  ;;  %v1266_v43 = vld [vmem:[#allocation3 + $0x20] sm:$0xff]  ;;  %v1269_v44 = vld [vmem:[#allocation3 + $0x38] sm:$0xff]  ;;  %v1268_v46 = vld [vmem:[#allocation3 + $0x30] sm:$0xff] }
 0x317   :  { %1328 = vmatprep.subr.bf16.mxu0 %v1265_v38  ;;  %v1271_v47 = vld [vmem:[#allocation3 + $0x48] sm:$0xff]  ;;  %v1270_v48 = vld [vmem:[#allocation3 + $0x40] sm:$0xff]  ;;  %v1273_v49 = vld [vmem:[#allocation3 + $0x58] sm:$0xff] }
 0x318   :  { %v1272_v50 = vld [vmem:[#allocation3 + $0x50] sm:$0xff]  ;;  %v1275_v54 = vld [vmem:[#allocation3 + $0x68] sm:$0xff]  ;;  %v1274_v55 = vld [vmem:[#allocation3 + $0x60] sm:$0xff] }
 0x319   :  { %v1277_v56 = vld [vmem:[#allocation3 + $0x78] sm:$0xff]  ;;  %v1276_v58 = vld [vmem:[#allocation3 + $0x70] sm:$0xff]  ;;  %v1279_v60 = vld [vmem:[#allocation3 + $0x88] sm:$0xff] }
 0x31a   :  { %1329 = vmatpush1.bf16.msra.mxu0 %v1264_v6  ;;  %v1278_v62 = vld [vmem:[#allocation3 + $0x80] sm:$0xff]  ;;  %v1281_v10 = vld [vmem:[#allocation3 + $0x98] sm:$0xff]  ;;  %v1280_v11 = vld [vmem:[#allocation3 + $0x90] sm:$0xff] }
 0x31b   :  { %1330 = vmatprep.subr.bf16.mxu0 %v1267_v42  ;;  %v1283_v12 = vld [vmem:[#allocation3 + $0xa8] sm:$0xff]  ;;  %v1282_v13 = vld [vmem:[#allocation3 + $0xa0] sm:$0xff]  ;;  %v1285_v15 = vld [vmem:[#allocation3 + $0xb8] sm:$0xff] }
 0x31c   :  { %v1284_v16 = vld [vmem:[#allocation3 + $0xb0] sm:$0xff]  ;;  %v1287_v17 = vld [vmem:[#allocation3 + $0xc8] sm:$0xff]  ;;  %v1286_v18 = vld [vmem:[#allocation3 + $0xc0] sm:$0xff] }
 0x31d   :  { %v1289_v19 = vld [vmem:[#allocation3 + $0xd8] sm:$0xff]  ;;  %v1288_v20 = vld [vmem:[#allocation3 + $0xd0] sm:$0xff]  ;;  %v1291_v21 = vld [vmem:[#allocation3 + $0xe8] sm:$0xff] }
 0x31e   :  { %1331 = vmatpush1.bf16.msra.mxu0 %v1266_v43  ;;  %v1290_v22 = vld [vmem:[#allocation3 + $0xe0] sm:$0xff]  ;;  %v1293_v23 = vld [vmem:[#allocation3 + $0xf8] sm:$0xff]  ;;  %v1292_v1 = vld [vmem:[#allocation3 + $0xf0] sm:$0xff] }
 0x31f   :  { %1332 = vmatprep.subr.bf16.mxu0 %v1269_v44  ;;  %v1295_v57 = vld [vmem:[#allocation3 + $0x108] sm:$0xff]  ;;  %v1294_v59 = vld [vmem:[#allocation3 + $0x100] sm:$0xff]  ;;  %v1297_v25 = vld [vmem:[#allocation3 + $0x118] sm:$0xff] }
 0x320   :  { %v1296_v14 = vld [vmem:[#allocation3 + $0x110] sm:$0xff]  ;;  %v1299_v61 = vld [vmem:[#allocation3 + $0x128] sm:$0xff]  ;;  %v1298_v26 = vld [vmem:[#allocation3 + $0x120] sm:$0xff] }
 0x321   :  { %v1301_v8 = vld [vmem:[#allocation3 + $0x138] sm:$0xff]  ;;  %v1300_v63 = vld [vmem:[#allocation3 + $0x130] sm:$0xff]  ;;  %v1303_v27 = vld [vmem:[#allocation3 + $0x148] sm:$0xff] }
 0x322   :  { %1333 = vmatpush1.bf16.msra.mxu0 %v1268_v46  ;;  %v1302_v0 = vld [vmem:[#allocation3 + $0x140] sm:$0xff]  ;;  %v1305_v28 = vld [vmem:[#allocation3 + $0x158] sm:$0xff]  ;;  %v1304_v29 = vld [vmem:[#allocation3 + $0x150] sm:$0xff] }
 0x323   :  { %1334 = vmatprep.subr.bf16.mxu0 %v1271_v47  ;;  %v1307_v30 = vld [vmem:[#allocation3 + $0x168] sm:$0xff]  ;;  %v1306_v31 = vld [vmem:[#allocation3 + $0x160] sm:$0xff]  ;;  %v1309_v3 = vld [vmem:[#allocation3 + $0x178] sm:$0xff] }
 0x324   :  { %v1308_v32 = vld [vmem:[#allocation3 + $0x170] sm:$0xff]  ;;  %v1311_v33 = vld [vmem:[#allocation3 + $0x188] sm:$0xff]  ;;  %v1310_v34 = vld [vmem:[#allocation3 + $0x180] sm:$0xff] }
 0x325   :  { %v1313_v35 = vld [vmem:[#allocation3 + $0x198] sm:$0xff]  ;;  %v1312_v37 = vld [vmem:[#allocation3 + $0x190] sm:$0xff]  ;;  %v1315_v4 = vld [vmem:[#allocation3 + $0x1a8] sm:$0xff] }
 0x326   :  { %1335 = vmatpush1.bf16.msra.mxu0 %v1270_v48  ;;  %v1314_v38 = vld [vmem:[#allocation3 + $0x1a0] sm:$0xff]  ;;  %v1317_v6 = vld [vmem:[#allocation3 + $0x1b8] sm:$0xff]  ;;  %v1316_v42 = vld [vmem:[#allocation3 + $0x1b0] sm:$0xff] }
 0x327   :  { %1336 = vmatprep.subr.bf16.mxu0 %v1273_v49  ;;  %v1319_v43 = vld [vmem:[#allocation3 + $0x1c8] sm:$0xff]  ;;  %v1318_v44 = vld [vmem:[#allocation3 + $0x1c0] sm:$0xff]  ;;  %v1321_v46 = vld [vmem:[#allocation3 + $0x1d8] sm:$0xff] }
 0x328   :  { %v1320_v47 = vld [vmem:[#allocation3 + $0x1d0] sm:$0xff]  ;;  %v1323_v48 = vld [vmem:[#allocation3 + $0x1e8] sm:$0xff]  ;;  %v1322_v49 = vld [vmem:[#allocation3 + $0x1e0] sm:$0xff] }
 0x32a   :  { %1337 = vmatpush1.bf16.msra.mxu0 %v1272_v50  ;;  %v1325_v50 = vld [vmem:[#allocation3 + $0x1f8] sm:$0xff] }
 0x32b   :  { %1338 = vmatprep.subr.bf16.mxu0 %v1275_v54  ;;  %v1324_v54 = vld [vmem:[#allocation3 + $0x1f0] sm:$0xff] }
 0x32e   :  { %1339 = vmatpush1.bf16.msra.mxu0 %v1274_v55  ;;  %v1260_v55 = vpack.c.bf16 %v4321_v2, %v4321_v2 }
 0x32f   :  { %1340 = vmatprep.subr.bf16.mxu0 %v1277_v56 }
 0x332   :  { %1341 = vmatpush1.bf16.msra.mxu0 %v1276_v58 }
 0x333   :  { %1342 = vmatprep.subr.bf16.mxu0 %v1279_v60 }
 0x336   :  { %1343 = vmatpush1.bf16.msra.mxu0 %v1278_v62 }
 0x337   :  { %1344 = vmatprep.subr.bf16.mxu0 %v1281_v10 }
 0x33a   :  { %1345 = vmatpush1.bf16.msra.mxu0 %v1280_v11 }
 0x33b   :  { %1346 = vmatprep.subr.bf16.mxu0 %v1283_v12 }
 0x33e   :  { %1347 = vmatpush1.bf16.msra.mxu0 %v1282_v13 }
 0x33f   :  { %1348 = vmatprep.subr.bf16.mxu0 %v1285_v15 }
 0x342   :  { %1349 = vmatpush1.bf16.msra.mxu0 %v1284_v16 }
 0x343   :  { %1350 = vmatprep.subr.bf16.mxu0 %v1287_v17 }
 0x346   :  { %1351 = vmatpush1.bf16.msra.mxu0 %v1286_v18 }
 0x347   :  { %1352 = vmatprep.subr.bf16.mxu0 %v1289_v19 }
 0x34a   :  { %1353 = vmatpush1.bf16.msra.mxu0 %v1288_v20 }
 0x34b   :  { %1354 = vmatprep.subr.bf16.mxu0 %v1291_v21 }
 0x34e   :  { %1355 = vmatpush1.bf16.msra.mxu0 %v1290_v22 }
 0x34f   :  { %1356 = vmatprep.subr.bf16.mxu0 %v1293_v23 }
 0x352   :  { %1357 = vmatpush1.bf16.msra.mxu0 %v1292_v1 }
 0x353   :  { %1367 = vmatprep.subr.bf16.mxu0 %v1295_v57 }
 0x355   :  { %1359 = vmatmul.mubr.bf16.vlgmr.msra.gmra.mrb[4].mxu0 %v1258_v24 }
 0x356   :  { %1368 = vmatpush1.bf16.msra.mxu0 %v1294_v59  ;;  %1399 = vmatprep.mubr.bf16.mxu0 %v1261_v9 }
 0x357   :  { %1369 = vmatprep.subr.bf16.mxu0 %v1297_v25 }
 0x35a   :  { %1370 = vmatpush1.bf16.msra.mxu0 %v1296_v14 }
 0x35b   :  { %1371 = vmatprep.subr.bf16.mxu0 %v1299_v61 }
 0x35e   :  { %1372 = vmatpush1.bf16.msra.mxu0 %v1298_v26 }
 0x35f   :  { %1373 = vmatprep.subr.bf16.mxu0 %v1301_v8 }
 0x362   :  { %1374 = vmatpush1.bf16.msra.mxu0 %v1300_v63 }
 0x363   :  { %1375 = vmatprep.subr.bf16.mxu0 %v1303_v27 }
 0x366   :  { %1376 = vmatpush1.bf16.msra.mxu0 %v1302_v0 }
 0x367   :  { %1377 = vmatprep.subr.bf16.mxu0 %v1305_v28 }
 0x36a   :  { %1378 = vmatpush1.bf16.msra.mxu0 %v1304_v29 }
 0x36b   :  { %1379 = vmatprep.subr.bf16.mxu0 %v1307_v30 }
 0x36e   :  { %1380 = vmatpush1.bf16.msra.mxu0 %v1306_v31 }
 0x36f   :  { %1381 = vmatprep.subr.bf16.mxu0 %v1309_v3 }
 0x372   :  { %1382 = vmatpush1.bf16.msra.mxu0 %v1308_v32 }
 0x373   :  { %1383 = vmatprep.subr.bf16.mxu0 %v1311_v33 }
 0x376   :  { %1384 = vmatpush1.bf16.msra.mxu0 %v1310_v34 }
 0x377   :  { %1385 = vmatprep.subr.bf16.mxu0 %v1313_v35 }
 0x37a   :  { %1386 = vmatpush1.bf16.msra.mxu0 %v1312_v37 }
 0x37b   :  { %1387 = vmatprep.subr.bf16.mxu0 %v1315_v4 }
 0x37e   :  { %1388 = vmatpush1.bf16.msra.mxu0 %v1314_v38 }
 0x37f   :  { %1389 = vmatprep.subr.bf16.mxu0 %v1317_v6 }
 0x382   :  { %1390 = vmatpush1.bf16.msra.mxu0 %v1316_v42 }
 0x383   :  { %1391 = vmatprep.subr.bf16.mxu0 %v1319_v43  ;;  %v1408_v43 = vld [vmem:[#allocation15] sm:$0xf] }
 0x386   :  { %1392 = vmatpush1.bf16.msra.mxu0 %v1318_v44 }
 0x387   :  { %1393 = vmatprep.subr.bf16.mxu0 %v1321_v46  ;;  %v1488_v46 = vrot.slane %v1408_v43, %v4277_v5 }
 0x38a   :  { %1394 = vmatpush1.bf16.msra.mxu0 %v1320_v47  ;;  %v1492_v47 = vrot.slane %v1408_v43, %v4279_v39 }
 0x38b   :  { %1395 = vmatprep.subr.bf16.mxu0 %v1323_v48 }
 0x38e   :  { %1396 = vmatpush1.bf16.msra.mxu0 %v1322_v49 }
 0x38f   :  { %1397 = vmatprep.subr.bf16.mxu0 %v1325_v50 }
 0x392   :  { %1398 = vmatpush1.bf16.msra.mxu0 %v1324_v54  ;;  %v1498_v54 = vrot.slane %v1488_v46, %v4277_v5 }
 0x395   :  { %1400 = vmatmul.mubr.bf16.vlgmr.msra.gmra.mrb[4].mxu0 %v1260_v55  ;;  %v1502_v55 = vrot.slane %v1492_v47, %v4277_v5 }
 0x468   :  { %v1401_v56 = vpop.f32.mrb[4].mxu0 }
 0x469   :  { %v1409_v58 = vrot.slane %v1401_v56, 4  ;;  %v1423_v60 = vmul.f32 %v1401_v56, %v1401_v56  ;;  %v1403_v62 = vpop.f32.mrb[5].mxu0 }
 0x46a   :  { %v1415_v10 = vrot.slane %v1403_v62, 4  ;;  %v1424_v11 = vmul.f32 %v1403_v62, %v1403_v62  ;;  %v1405_v12 = vpop.f32.mrb[6].mxu0 }
 0x46b   :  { %v1410_v13 = vadd.f32 %v1409_v58, %v1401_v56  ;;  %v1425_v15 = vrot.slane %v1423_v60, 4  ;;  %v1406_v16 = vpop.f32.mrb[7].mxu0 }
 0x46c   :  { %v1416_v17 = vadd.f32 %v1415_v10, %v1403_v62  ;;  %v1431_v18 = vrot.slane %v1424_v11, 4 }
 0x46d   :  { %v1411_v19 = vrot.slane %v1410_v13, 2  ;;  %v1426_v20 = vadd.f32 %v1425_v15, %v1423_v60 }
 0x46e   :  { %v1417_v21 = vrot.slane %v1416_v17, 2  ;;  %v1432_v22 = vadd.f32 %v1431_v18, %v1424_v11 }
 0x46f   :  { %v1412_v23 = vadd.f32 %v1411_v19, %v1410_v13  ;;  %v1427_v2 = vrot.slane %v1426_v20, 2 }
 0x470   :  { %v1418_v1 = vadd.f32 %v1417_v21, %v1416_v17  ;;  %v1433_v57 = vrot.slane %v1432_v22, 2 }
 0x471   :  { %v1413_v24 = vrot.slane %v1412_v23, 1  ;;  %v1428_v9 = vadd.f32 %v1427_v2, %v1426_v20 }
 0x472   :  { %v1419_v59 = vrot.slane %v1418_v1, 1  ;;  %v1434_v25 = vadd.f32 %v1433_v57, %v1432_v22 }
 0x473   :  { %v1414_v14 = vadd.f32 %v1413_v24, %v1412_v23  ;;  %v1429_v61 = vrot.slane %v1428_v9, 1 }
 0x474   :  { %v1420_v26 = vadd.f32 %v1419_v59, %v1418_v1  ;;  %v1435_v8 = vrot.slane %v1434_v25, 1 }
 0x475   :  { %v1421_v63 = vmul.f32 0.125, %v1414_v14  ;;  %v1430_v27 = vadd.f32 %v1429_v61, %v1428_v9 }
 0x476   :  { %v1422_v0 = vmul.f32 0.125, %v1420_v26  ;;  %v1436_v28 = vadd.f32 %v1435_v8, %v1434_v25 }
 0x477   :  { %v1437_v29 = vmul.f32 0.125, %v1430_v27  ;;  %v1439_v30 = vmul.f32 %v1421_v63, %v1421_v63  ;;  %v1461_v58 = vsub.f32 %v1401_v56, %v1421_v63 }
 0x478   :  { %v1438_v31 = vmul.f32 0.125, %v1436_v28  ;;  %v1440_v3 = vmul.f32 %v1422_v0, %v1422_v0  ;;  %v1462_v60 = vsub.f32 %v1403_v62, %v1422_v0 }
 0x479   :  { %v1441_v32 = vsub.f32 %v1437_v29, %v1439_v30 }
 0x47a   :  { %v1442_v33 = vsub.f32 %v1438_v31, %v1440_v3 }
 0x47b   :  { %v1443_v34 = vmax.f32 %v1441_v32, 0.0 }
 0x47c   :  { %v1444_v35 = vmax.f32 %v1442_v33, 0.0 }
 0x47d   :  { %v1445_v37 = vadd.f32 1e-05, %v1443_v34 }
 0x47e   :  { %v1446_v4 = vadd.f32 1e-05, %v1444_v35 }
 0x47f   :  { %3609 = vrsqrt.f32 %v1445_v37 }
 0x480   :  { %3611 = vrsqrt.f32 %v1446_v4 }
 0x489   :  { %v3610_v38 = vpop.eup %3609 }
 0x48a   :  { %v3612_v6 = vpop.eup %3611 }
 0x48b   :  { %v1451_v42 = vcombine.low %v3610_v38, %v3612_v6 }
 0x48d   :  { %v1458_v44 = vrot.slane %v1451_v42, %v4275_v36 }
 0x48f   :  { %v1460_v48 = vmul.f32 %v1458_v44, %v1408_v43 }
 0x491   :  { %v1467_v49 = vrot.slane %v1460_v48, %v4287_v45  ;;  %v1471_v50 = vrot.slane %v1460_v48, %v4293_v51 }
 0x493   :  { %v1477_v10 = vrot.slane %v1467_v49, %v4287_v45  ;;  %v1481_v11 = vrot.slane %v1471_v50, %v4287_v45 }
 0x495   :  { %v1482_v12 = vmul.f32 %v1477_v10, %v1461_v58  ;;  %v1483_v13 = vmul.f32 %v1481_v11, %v1462_v60 }
 0x497   :  { %v1503_v15 = vadd.f32 %v1498_v54, %v1482_v12  ;;  %v1504_v16 = vadd.f32 %v1502_v55, %v1483_v13 }
 0x499   :  { %v3419_v17 = vmul.f32 -1.442695, %v1503_v15  ;;  %v3420_v18 = vmul.f32 -1.442695, %v1504_v16 }
 0x49b   :  { %3613 = vpow2.f32 %v3419_v17 }
 0x49c   :  { %3615 = vpow2.f32 %v3420_v18 }
 0x4a5   :  { %v3614_v19 = vpop.eup %3613 }
 0x4a6   :  { %v3616_v20 = vpop.eup %3615  ;;  %v1511_v21 = vadd.f32 1.0, %v3614_v19 }
 0x4a7   :  { %v1512_v22 = vadd.f32 1.0, %v3616_v20 }
 0x4a8   :  { %3617 = vrcp.f32 %v1511_v21 }
 0x4a9   :  { %3619 = vrcp.f32 %v1512_v22 }
 0x4b2   :  { %v3618_v56 = vpop.eup %3617 }
 0x4b3   :  { %v3620_v62 = vpop.eup %3619 }
 0x4b4   :  { %3901 = dma.done.wait [#allocation8 + $0x2], 2048 }
 0x4b5   :  { %3902 = vsyncadd [#allocation8 + $0x2], 4294965248  ;;  %v1522_v23 = vpack.c.bf16 %v3620_v62, %v3620_v62  ;;  %v1531_v2 = vld [vmem:[#allocation4 + $0x40] sm:$0xff]  ;;  %v1532_v57 = vld [vmem:[#allocation4 + $0x48] sm:$0xff]  ;;  %v1521_v30 = vpack.c.bf16 %v3618_v56, %v3618_v56 }
 0x4b6   :  { %v1523_v1 = vld [vmem:[#allocation4] sm:$0xff]  ;;  %3430 = vmatprep.subr.bf16.mxu1 %v1531_v2  ;;  %v1524_v24 = vld [vmem:[#allocation4 + $0x8] sm:$0xff]  ;;  %v1533_v9 = vld [vmem:[#allocation4 + $0x50] sm:$0xff] }
 0x4b7   :  { %1571 = vmatprep.mubr.bf16.mxu1 %v1522_v23  ;;  %3431 = vmatpush3.bf16.msra.mxu1 %v1523_v1  ;;  %v1525_v59 = vld [vmem:[#allocation4 + $0x10] sm:$0xff]  ;;  %v1534_v25 = vld [vmem:[#allocation4 + $0x58] sm:$0xff]  ;;  %v1535_v61 = vld [vmem:[#allocation4 + $0x60] sm:$0xff] }
 0x4b8   :  { %3432 = vmatprep.subr.bf16.mxu1 %v1532_v57  ;;  %v1526_v14 = vld [vmem:[#allocation4 + $0x18] sm:$0xff]  ;;  %v1527_v26 = vld [vmem:[#allocation4 + $0x20] sm:$0xff]  ;;  %v1536_v8 = vld [vmem:[#allocation4 + $0x68] sm:$0xff] }
 0x4b9   :  { %v1528_v63 = vld [vmem:[#allocation4 + $0x28] sm:$0xff]  ;;  %v1537_v27 = vld [vmem:[#allocation4 + $0x70] sm:$0xff]  ;;  %v1538_v28 = vld [vmem:[#allocation4 + $0x78] sm:$0xff] }
 0x4ba   :  { %v1529_v0 = vld [vmem:[#allocation4 + $0x30] sm:$0xff]  ;;  %v1530_v29 = vld [vmem:[#allocation4 + $0x38] sm:$0xff] }
 0x4bb   :  { %3433 = vmatpush3.bf16.msra.mxu1 %v1524_v24  ;;  %v1579_v12 = vld [vmem:[#allocation16] sm:$0x3] }
 0x4bc   :  { %3434 = vmatprep.subr.bf16.mxu1 %v1533_v9  ;;  %v1610_v18 = vrot.slane %v1579_v12, %v4277_v5 }
 0x4bf   :  { %3435 = vmatpush3.bf16.msra.mxu1 %v1525_v59 }
 0x4c0   :  { %3436 = vmatprep.subr.bf16.mxu1 %v1534_v25 }
 0x4c3   :  { %3437 = vmatpush3.bf16.msra.mxu1 %v1526_v14 }
 0x4c4   :  { %3438 = vmatprep.subr.bf16.mxu1 %v1535_v61 }
 0x4c7   :  { %3439 = vmatpush3.bf16.msra.mxu1 %v1527_v26 }
 0x4c8   :  { %3440 = vmatprep.subr.bf16.mxu1 %v1536_v8 }
 0x4cb   :  { %3441 = vmatpush3.bf16.msra.mxu1 %v1528_v63 }
 0x4cc   :  { %3442 = vmatprep.subr.bf16.mxu1 %v1537_v27 }
 0x4cf   :  { %3443 = vmatpush3.bf16.msra.mxu1 %v1529_v0 }
 0x4d0   :  { %3444 = vmatprep.subr.bf16.mxu1 %v1538_v28 }
 0x4d3   :  { %3445 = vmatpush3.bf16.msra.mxu1 %v1530_v29 }
 0x4d6   :  { %1572 = vmatmul.mubr.bf16.vlgmr.msra.gmra.mrb[4].mxu1 %v1521_v30 }
 0x5a9   :  { %v3446_v31 = vpop.f32.mrb[4].mxu1 }
 0x5aa   :  { %v3447_v3 = vpop.f32.mrb[5].mxu1 }
 0x5ab   :  { %v3448_v32 = vadd.f32 %v3447_v3, %v3446_v31  ;;  %v3449_v33 = vpop.f32.mrb[6].mxu1 }
 0x5ac   :  { %v3450_v34 = vpop.f32.mrb[7].mxu1 }
 0x5ad   :  { %v1580_v35 = vrot.slane %v3448_v32, 4  ;;  %v1587_v37 = vmul.f32 %v3448_v32, %v3448_v32 }
 0x5af   :  { %v1581_v4 = vadd.f32 %v3448_v32, %v1580_v35  ;;  %v1588_v38 = vrot.slane %v1587_v37, 4 }
 0x5b1   :  { %v1582_v6 = vrot.slane %v1581_v4, 2  ;;  %v1589_v42 = vadd.f32 %v1588_v38, %v1587_v37 }
 0x5b3   :  { %v1583_v43 = vadd.f32 %v1582_v6, %v1581_v4  ;;  %v1590_v44 = vrot.slane %v1589_v42, 2 }
 0x5b5   :  { %v1584_v46 = vrot.slane %v1583_v43, 1  ;;  %v1591_v47 = vadd.f32 %v1590_v44, %v1589_v42 }
 0x5b7   :  { %v1585_v48 = vadd.f32 %v1584_v46, %v1583_v43  ;;  %v1592_v49 = vrot.slane %v1591_v47, 1 }
 0x5b9   :  { %v1586_v50 = vmul.f32 0.125, %v1585_v48  ;;  %v1593_v54 = vadd.f32 %v1592_v49, %v1591_v47 }
 0x5bb   :  { %v1594_v55 = vmul.f32 0.125, %v1593_v54  ;;  %v1595_v58 = vmul.f32 %v1586_v50, %v1586_v50  ;;  %v1601_v16 = vsub.f32 %v3448_v32, %v1586_v50 }
 0x5bd   :  { %v1596_v60 = vsub.f32 %v1594_v55, %v1595_v58 }
 0x5bf   :  { %v1597_v10 = vmax.f32 %v1596_v60, 0.0 }
 0x5c1   :  { %v1598_v11 = vadd.f32 1e-05, %v1597_v10 }
 0x5c3   :  { %3621 = vrsqrt.f32 %v1598_v11 }
 0x5cd   :  { %v3622_v13 = vpop.eup %3621 }
 0x5ce   :  { %v1600_v15 = vmul.f32 %v3622_v13, %v1579_v12 }
 0x5d0   :  { %v1605_v17 = vrot.slane %v1600_v15, %v4287_v45 }
 0x5d2   :  { %v1606_v19 = vmul.f32 %v1605_v17, %v1601_v16 }
 0x5d4   :  { %v1611_v20 = vadd.f32 %v1610_v18, %v1606_v19 }
 0x5d6   :  { %v3421_v21 = vmul.f32 -1.442695, %v1611_v20 }
 0x5d8   :  { %3623 = vpow2.f32 %v3421_v21 }
 0x5e2   :  { %v3624_v22 = vpop.eup %3623 }
 0x5e3   :  { %v1615_v56 = vadd.f32 1.0, %v3624_v22 }
 0x5e5   :  { %3625 = vrcp.f32 %v1615_v56 }
 0x5ef   :  { %v3626_v62 = vpop.eup %3625 }
 0x5f0   :  { %1618 = vst [vmem:[#allocation23] sm:$0xff] %v3626_v62 }
 0x5f1   :  { %3903 = dma.done.wait [#allocation8 + $0x3], 2048 }
 0x5f2   :  { %3904 = vsyncadd [#allocation8 + $0x3], 4294965248  ;;  %1672 = vmatprep.mubr.bf16.mxu1 %v3946_v7  ;;  %v1625_v23 = vld [vmem:[#allocation5 + $0x8] sm:$0xff]  ;;  %v1624_v2 = vld [vmem:[#allocation5] sm:$0xff]  ;;  %v1623_v28 = vpack.c.bf16 %v3626_v62, %v3626_v62  ;;  %s1778_s13 = sld [smem:[#allocation22]] }
 0x5f3   :  { %v1627_v1 = vld [vmem:[#allocation5 + $0x18] sm:$0xff]  ;;  %1640 = vmatprep.subr.bf16.mxu1 %v1625_v23  ;;  %v1626_v57 = vld [vmem:[#allocation5 + $0x10] sm:$0xff]  ;;  %v1629_v24 = vld [vmem:[#allocation5 + $0x28] sm:$0xff] }
 0x5f4   :  { %1641 = vmatpush1.bf16.msra.mxu1 %v1624_v2  ;;  %v1628_v9 = vld [vmem:[#allocation5 + $0x20] sm:$0xff]  ;;  %v1631_v59 = vld [vmem:[#allocation5 + $0x38] sm:$0xff]  ;;  %v1630_v25 = vld [vmem:[#allocation5 + $0x30] sm:$0xff] }
 0x5f5   :  { %1642 = vmatprep.subr.bf16.mxu1 %v1627_v1  ;;  %v1633_v14 = vld [vmem:[#allocation5 + $0x48] sm:$0xff]  ;;  %v1632_v61 = vld [vmem:[#allocation5 + $0x40] sm:$0xff]  ;;  %v1635_v7 = vld [vmem:[#allocation5 + $0x58] sm:$0xff] }
 0x5f6   :  { %v1634_v26 = vld [vmem:[#allocation5 + $0x50] sm:$0xff]  ;;  %v1637_v8 = vld [vmem:[#allocation5 + $0x68] sm:$0xff]  ;;  %v1636_v63 = vld [vmem:[#allocation5 + $0x60] sm:$0xff] }
 0x5f7   :  { %v1639_v27 = vld [vmem:[#allocation5 + $0x78] sm:$0xff]  ;;  %v1638_v0 = vld [vmem:[#allocation5 + $0x70] sm:$0xff] }
 0x5f8   :  { %1643 = vmatpush1.bf16.msra.mxu1 %v1626_v57 }
 0x5f9   :  { %1644 = vmatprep.subr.bf16.mxu1 %v1629_v24 }
 0x5fc   :  { %1645 = vmatpush1.bf16.msra.mxu1 %v1628_v9 }
 0x5fd   :  { %1646 = vmatprep.subr.bf16.mxu1 %v1631_v59 }
 0x600   :  { %1647 = vmatpush1.bf16.msra.mxu1 %v1630_v25  ;;  %v1681_v25 = vld [vmem:[#allocation18] sm:$0xf] }
 0x601   :  { %1648 = vmatprep.subr.bf16.mxu1 %v1633_v14 }
 0x604   :  { %1649 = vmatpush1.bf16.msra.mxu1 %v1632_v61  ;;  %v1761_v61 = vrot.slane %v1681_v25, %v4277_v5 }
 0x605   :  { %1650 = vmatprep.subr.bf16.mxu1 %v1635_v7  ;;  %v1765_v7 = vrot.slane %v1681_v25, %v4279_v39 }
 0x608   :  { %1651 = vmatpush1.bf16.msra.mxu1 %v1634_v26 }
 0x609   :  { %1652 = vmatprep.subr.bf16.mxu1 %v1637_v8 }
 0x60c   :  { %1653 = vmatpush1.bf16.msra.mxu1 %v1636_v63 }
 0x60d   :  { %1654 = vmatprep.subr.bf16.mxu1 %v1639_v27  ;;  %v1771_v27 = vrot.slane %v1761_v61, %v4277_v5 }
 0x610   :  { %1655 = vmatpush1.bf16.msra.mxu1 %v1638_v0  ;;  %v1775_v0 = vrot.slane %v1765_v7, %v4277_v5 }
 0x613   :  { %1673 = vmatmul.mubr.bf16.vlgmr.msra.gmra.mrb[8].mxu1 %v1623_v28 }
 0x6e6   :  { %v1674_v29 = vpop.f32.mrb[8].mxu1 }
 0x6e7   :  { %v1682_v30 = vrot.slane %v1674_v29, 4  ;;  %v1696_v31 = vmul.f32 %v1674_v29, %v1674_v29  ;;  %v1676_v3 = vpop.f32.mrb[9].mxu1 }
 0x6e8   :  { %v1688_v32 = vrot.slane %v1676_v3, 4  ;;  %v1697_v33 = vmul.f32 %v1676_v3, %v1676_v3  ;;  %v1678_v34 = vpop.f32.mrb[10].mxu1 }
 0x6e9   :  { %v1683_v35 = vadd.f32 %v1682_v30, %v1674_v29  ;;  %v1698_v37 = vrot.slane %v1696_v31, 4  ;;  %v1679_v4 = vpop.f32.mrb[11].mxu1 }
 0x6ea   :  { %v1689_v38 = vadd.f32 %v1688_v32, %v1676_v3  ;;  %v1704_v6 = vrot.slane %v1697_v33, 4  ;;  %v1783_v4 = vstv %s1778_s13 }
 0x6eb   :  { %v1684_v42 = vrot.slane %v1683_v35, 2  ;;  %v1699_v43 = vadd.f32 %v1698_v37, %v1696_v31 }
 0x6ec   :  { %v1690_v44 = vrot.slane %v1689_v38, 2  ;;  %v1705_v46 = vadd.f32 %v1704_v6, %v1697_v33 }
 0x6ed   :  { %v1685_v47 = vadd.f32 %v1684_v42, %v1683_v35  ;;  %v1700_v48 = vrot.slane %v1699_v43, 2 }
 0x6ee   :  { %v1691_v49 = vadd.f32 %v1690_v44, %v1689_v38  ;;  %v1706_v50 = vrot.slane %v1705_v46, 2 }
 0x6ef   :  { %v1686_v54 = vrot.slane %v1685_v47, 1  ;;  %v1701_v55 = vadd.f32 %v1700_v48, %v1699_v43 }
 0x6f0   :  { %v1692_v58 = vrot.slane %v1691_v49, 1  ;;  %v1707_v60 = vadd.f32 %v1706_v50, %v1705_v46 }
 0x6f1   :  { %v1687_v10 = vadd.f32 %v1686_v54, %v1685_v47  ;;  %v1702_v11 = vrot.slane %v1701_v55, 1 }
 0x6f2   :  { %v1693_v12 = vadd.f32 %v1692_v58, %v1691_v49  ;;  %v1708_v13 = vrot.slane %v1707_v60, 1 }
 0x6f3   :  { %v1694_v15 = vmul.f32 0.125, %v1687_v10  ;;  %v1703_v16 = vadd.f32 %v1702_v11, %v1701_v55 }
 0x6f4   :  { %v1695_v17 = vmul.f32 0.125, %v1693_v12  ;;  %v1709_v18 = vadd.f32 %v1708_v13, %v1707_v60 }
 0x6f5   :  { %v1710_v19 = vmul.f32 0.125, %v1703_v16  ;;  %v1712_v20 = vmul.f32 %v1694_v15, %v1694_v15  ;;  %v1734_v28 = vsub.f32 %v1674_v29, %v1694_v15 }
 0x6f6   :  { %v1711_v21 = vmul.f32 0.125, %v1709_v18  ;;  %v1713_v22 = vmul.f32 %v1695_v17, %v1695_v17  ;;  %v1735_v30 = vsub.f32 %v1676_v3, %v1695_v17 }
 0x6f7   :  { %v1714_v56 = vsub.f32 %v1710_v19, %v1712_v20 }
 0x6f8   :  { %v1715_v62 = vsub.f32 %v1711_v21, %v1713_v22 }
 0x6f9   :  { %v1716_v23 = vmax.f32 %v1714_v56, 0.0 }
 0x6fa   :  { %v1717_v2 = vmax.f32 %v1715_v62, 0.0 }
 0x6fb   :  { %v1718_v1 = vadd.f32 1e-05, %v1716_v23 }
 0x6fc   :  { %v1719_v57 = vadd.f32 1e-05, %v1717_v2 }
 0x6fd   :  { %3627 = vrsqrt.f32 %v1718_v1 }
 0x6fe   :  { %3629 = vrsqrt.f32 %v1719_v57 }
 0x707   :  { %v3628_v24 = vpop.eup %3627 }
 0x708   :  { %v3630_v9 = vpop.eup %3629 }
 0x709   :  { %v1724_v59 = vcombine.low %v3628_v24, %v3630_v9 }
 0x70b   :  { %v1731_v14 = vrot.slane %v1724_v59, %v4275_v36 }
 0x70d   :  { %v1733_v26 = vmul.f32 %v1731_v14, %v1681_v25 }
 0x70f   :  { %v1740_v8 = vrot.slane %v1733_v26, %v4287_v45  ;;  %v1744_v63 = vrot.slane %v1733_v26, %v4293_v51 }
 0x711   :  { %v1750_v31 = vrot.slane %v1740_v8, %v4287_v45  ;;  %v1754_v32 = vrot.slane %v1744_v63, %v4287_v45 }
 0x713   :  { %v1755_v33 = vmul.f32 %v1750_v31, %v1734_v28  ;;  %v1756_v34 = vmul.f32 %v1754_v32, %v1735_v30 }
 0x715   :  { %v1776_v35 = vadd.f32 %v1771_v27, %v1755_v33  ;;  %v1777_v37 = vadd.f32 %v1775_v0, %v1756_v34 }
 0x717   :  { %v1781_v38 = vmin.f32 %v1776_v35, 0.0  ;;  %v1782_v6 = vmin.f32 %v1777_v37, 0.0  ;;  %v1779_v42 = vmax.f32 %v1776_v35, 0.0  ;;  %v1780_v43 = vmax.f32 %v1777_v37, 0.0 }
 0x719   :  { %v1784_v44 = vmul.f32 %v1783_v4, %v1781_v38  ;;  %v1785_v46 = vmul.f32 %v1783_v4, %v1782_v6 }
 0x71b   :  { %v4352_v47 = vadd.f32 %v1784_v44, %v1779_v42  ;;  %v1787_v48 = vadd.f32 %v1785_v46, %v1780_v43 }
 0x71c   :  { %3905 = dma.done.wait [#allocation8 + $0x4], 8192 }
 0x71d   :  { %3906 = vsyncadd [#allocation8 + $0x4], 4294959104  ;;  %v1792_v29 = vpack.c.bf16 %v1787_v48, %v1787_v48  ;;  %v1794_v3 = vld [vmem:[#allocation6 + $0x8] sm:$0xff]  ;;  %v1796_v49 = vld [vmem:[#allocation6 + $0x18] sm:$0xff]  ;;  %s3422_s7 = sld [smem:[#allocation22 + $0x1]] }
 0x71e   :  { %v1793_v50 = vld [vmem:[#allocation6] sm:$0xff]  ;;  %1857 = vmatprep.subr.bf16.mxu1 %v1794_v3  ;;  %1898 = vmatprep.subr.bf16.mxu0 %v1796_v49  ;;  %v1795_v54 = vld [vmem:[#allocation6 + $0x10] sm:$0xff]  ;;  %v1798_v55 = vld [vmem:[#allocation6 + $0x28] sm:$0xff] }
 0x71f   :  { %1889 = vmatprep.mubr.bf16.mxu1 %v1792_v29  ;;  %1930 = vmatprep.mubr.bf16.mxu0 %v1792_v29  ;;  %v1800_v58 = vld [vmem:[#allocation6 + $0x38] sm:$0xff]  ;;  %v1797_v60 = vld [vmem:[#allocation6 + $0x20] sm:$0xff]  ;;  %v1799_v10 = vld [vmem:[#allocation6 + $0x30] sm:$0xff] }
 0x720   :  { %1858 = vmatpush1.bf16.msra.mxu1 %v1793_v50  ;;  %1899 = vmatpush1.bf16.msra.mxu0 %v1795_v54  ;;  %v1802_v11 = vld [vmem:[#allocation6 + $0x48] sm:$0xff]  ;;  %v1804_v12 = vld [vmem:[#allocation6 + $0x58] sm:$0xff]  ;;  %v1801_v13 = vld [vmem:[#allocation6 + $0x40] sm:$0xff] }
 0x721   :  { %1859 = vmatprep.subr.bf16.mxu1 %v1798_v55  ;;  %1900 = vmatprep.subr.bf16.mxu0 %v1800_v58  ;;  %v1803_v15 = vld [vmem:[#allocation6 + $0x50] sm:$0xff]  ;;  %v1806_v16 = vld [vmem:[#allocation6 + $0x68] sm:$0xff]  ;;  %v1808_v17 = vld [vmem:[#allocation6 + $0x78] sm:$0xff] }
 0x722   :  { %v1805_v18 = vld [vmem:[#allocation6 + $0x60] sm:$0xff]  ;;  %v1807_v19 = vld [vmem:[#allocation6 + $0x70] sm:$0xff]  ;;  %v1810_v20 = vld [vmem:[#allocation6 + $0x88] sm:$0xff] }
 0x723   :  { %v1812_v21 = vld [vmem:[#allocation6 + $0x98] sm:$0xff]  ;;  %v1809_v22 = vld [vmem:[#allocation6 + $0x80] sm:$0xff]  ;;  %v1811_v56 = vld [vmem:[#allocation6 + $0x90] sm:$0xff] }
 0x724   :  { %1860 = vmatpush1.bf16.msra.mxu1 %v1797_v60  ;;  %1901 = vmatpush1.bf16.msra.mxu0 %v1799_v10  ;;  %v1814_v62 = vld [vmem:[#allocation6 + $0xa8] sm:$0xff]  ;;  %v1816_v23 = vld [vmem:[#allocation6 + $0xb8] sm:$0xff]  ;;  %v1813_v2 = vld [vmem:[#allocation6 + $0xa0] sm:$0xff] }
 0x725   :  { %1861 = vmatprep.subr.bf16.mxu1 %v1802_v11  ;;  %1902 = vmatprep.subr.bf16.mxu0 %v1804_v12  ;;  %v1815_v1 = vld [vmem:[#allocation6 + $0xb0] sm:$0xff]  ;;  %v1818_v57 = vld [vmem:[#allocation6 + $0xc8] sm:$0xff]  ;;  %v1820_v24 = vld [vmem:[#allocation6 + $0xd8] sm:$0xff] }
 0x726   :  { %v1817_v9 = vld [vmem:[#allocation6 + $0xc0] sm:$0xff]  ;;  %v1819_v59 = vld [vmem:[#allocation6 + $0xd0] sm:$0xff]  ;;  %v1822_v25 = vld [vmem:[#allocation6 + $0xe8] sm:$0xff] }
 0x727   :  { %v1824_v14 = vld [vmem:[#allocation6 + $0xf8] sm:$0xff]  ;;  %v1821_v61 = vld [vmem:[#allocation6 + $0xe0] sm:$0xff]  ;;  %v1823_v7 = vld [vmem:[#allocation6 + $0xf0] sm:$0xff] }
 0x728   :  { %1862 = vmatpush1.bf16.msra.mxu1 %v1801_v13  ;;  %1903 = vmatpush1.bf16.msra.mxu0 %v1803_v15  ;;  %v1826_v26 = vld [vmem:[#allocation6 + $0x108] sm:$0xff]  ;;  %v1828_v8 = vld [vmem:[#allocation6 + $0x118] sm:$0xff]  ;;  %v1825_v63 = vld [vmem:[#allocation6 + $0x100] sm:$0xff]  ;;  %v1791_v13 = vpack.c.bf16 %v4352_v47, %v4352_v47 }
 0x729   :  { %1863 = vmatprep.subr.bf16.mxu1 %v1806_v16  ;;  %1904 = vmatprep.subr.bf16.mxu0 %v1808_v17  ;;  %v1827_v27 = vld [vmem:[#allocation6 + $0x110] sm:$0xff]  ;;  %v1830_v0 = vld [vmem:[#allocation6 + $0x128] sm:$0xff]  ;;  %v1832_v28 = vld [vmem:[#allocation6 + $0x138] sm:$0xff] }
 0x72a   :  { %v1829_v30 = vld [vmem:[#allocation6 + $0x120] sm:$0xff]  ;;  %v1831_v31 = vld [vmem:[#allocation6 + $0x130] sm:$0xff]  ;;  %v1834_v32 = vld [vmem:[#allocation6 + $0x148] sm:$0xff] }
 0x72b   :  { %v1836_v33 = vld [vmem:[#allocation6 + $0x158] sm:$0xff]  ;;  %v1833_v34 = vld [vmem:[#allocation6 + $0x140] sm:$0xff]  ;;  %v1835_v35 = vld [vmem:[#allocation6 + $0x150] sm:$0xff] }
 0x72c   :  { %1864 = vmatpush1.bf16.msra.mxu1 %v1805_v18  ;;  %1905 = vmatpush1.bf16.msra.mxu0 %v1807_v19  ;;  %v1838_v37 = vld [vmem:[#allocation6 + $0x168] sm:$0xff]  ;;  %v1840_v4 = vld [vmem:[#allocation6 + $0x178] sm:$0xff]  ;;  %v1837_v38 = vld [vmem:[#allocation6 + $0x160] sm:$0xff] }
 0x72d   :  { %1865 = vmatprep.subr.bf16.mxu1 %v1810_v20  ;;  %1906 = vmatprep.subr.bf16.mxu0 %v1812_v21  ;;  %v1839_v6 = vld [vmem:[#allocation6 + $0x170] sm:$0xff]  ;;  %v1842_v42 = vld [vmem:[#allocation6 + $0x188] sm:$0xff]  ;;  %v1844_v43 = vld [vmem:[#allocation6 + $0x198] sm:$0xff] }
 0x72e   :  { %v1841_v44 = vld [vmem:[#allocation6 + $0x180] sm:$0xff]  ;;  %v1843_v46 = vld [vmem:[#allocation6 + $0x190] sm:$0xff]  ;;  %v1846_v48 = vld [vmem:[#allocation6 + $0x1a8] sm:$0xff] }
 0x72f   :  { %v1848_v29 = vld [vmem:[#allocation6 + $0x1b8] sm:$0xff]  ;;  %v1845_v3 = vld [vmem:[#allocation6 + $0x1a0] sm:$0xff]  ;;  %v1847_v49 = vld [vmem:[#allocation6 + $0x1b0] sm:$0xff] }
 0x730   :  { %1866 = vmatpush1.bf16.msra.mxu1 %v1809_v22  ;;  %1907 = vmatpush1.bf16.msra.mxu0 %v1811_v56  ;;  %v1850_v50 = vld [vmem:[#allocation6 + $0x1c8] sm:$0xff]  ;;  %v1852_v54 = vld [vmem:[#allocation6 + $0x1d8] sm:$0xff]  ;;  %v1849_v55 = vld [vmem:[#allocation6 + $0x1c0] sm:$0xff] }
 0x731   :  { %1867 = vmatprep.subr.bf16.mxu1 %v1814_v62  ;;  %1908 = vmatprep.subr.bf16.mxu0 %v1816_v23  ;;  %v1851_v58 = vld [vmem:[#allocation6 + $0x1d0] sm:$0xff]  ;;  %v1854_v60 = vld [vmem:[#allocation6 + $0x1e8] sm:$0xff]  ;;  %v1856_v10 = vld [vmem:[#allocation6 + $0x1f8] sm:$0xff] }
 0x732   :  { %v1853_v11 = vld [vmem:[#allocation6 + $0x1e0] sm:$0xff]  ;;  %v1855_v12 = vld [vmem:[#allocation6 + $0x1f0] sm:$0xff] }
 0x734   :  { %1868 = vmatpush1.bf16.msra.mxu1 %v1813_v2  ;;  %1909 = vmatpush1.bf16.msra.mxu0 %v1815_v1 }
 0x735   :  { %1869 = vmatprep.subr.bf16.mxu1 %v1818_v57  ;;  %1910 = vmatprep.subr.bf16.mxu0 %v1820_v24 }
 0x738   :  { %1870 = vmatpush1.bf16.msra.mxu1 %v1817_v9  ;;  %1911 = vmatpush1.bf16.msra.mxu0 %v1819_v59 }
 0x739   :  { %1871 = vmatprep.subr.bf16.mxu1 %v1822_v25  ;;  %1912 = vmatprep.subr.bf16.mxu0 %v1824_v14 }
 0x73c   :  { %1872 = vmatpush1.bf16.msra.mxu1 %v1821_v61  ;;  %1913 = vmatpush1.bf16.msra.mxu0 %v1823_v7 }
 0x73d   :  { %1873 = vmatprep.subr.bf16.mxu1 %v1826_v26  ;;  %1914 = vmatprep.subr.bf16.mxu0 %v1828_v8 }
 0x740   :  { %1874 = vmatpush1.bf16.msra.mxu1 %v1825_v63  ;;  %1915 = vmatpush1.bf16.msra.mxu0 %v1827_v27 }
 0x741   :  { %1875 = vmatprep.subr.bf16.mxu1 %v1830_v0  ;;  %1916 = vmatprep.subr.bf16.mxu0 %v1832_v28 }
 0x744   :  { %1876 = vmatpush1.bf16.msra.mxu1 %v1829_v30  ;;  %1917 = vmatpush1.bf16.msra.mxu0 %v1831_v31 }
 0x745   :  { %1877 = vmatprep.subr.bf16.mxu1 %v1834_v32  ;;  %1918 = vmatprep.subr.bf16.mxu0 %v1836_v33 }
 0x748   :  { %1878 = vmatpush1.bf16.msra.mxu1 %v1833_v34  ;;  %1919 = vmatpush1.bf16.msra.mxu0 %v1835_v35 }
 0x749   :  { %1879 = vmatprep.subr.bf16.mxu1 %v1838_v37  ;;  %1920 = vmatprep.subr.bf16.mxu0 %v1840_v4 }
 0x74c   :  { %1880 = vmatpush1.bf16.msra.mxu1 %v1837_v38  ;;  %1921 = vmatpush1.bf16.msra.mxu0 %v1839_v6 }
 0x74d   :  { %1881 = vmatprep.subr.bf16.mxu1 %v1842_v42  ;;  %1922 = vmatprep.subr.bf16.mxu0 %v1844_v43 }
 0x750   :  { %1882 = vmatpush1.bf16.msra.mxu1 %v1841_v44  ;;  %1923 = vmatpush1.bf16.msra.mxu0 %v1843_v46 }
 0x751   :  { %1883 = vmatprep.subr.bf16.mxu1 %v1846_v48  ;;  %1924 = vmatprep.subr.bf16.mxu0 %v1848_v29 }
 0x754   :  { %1884 = vmatpush1.bf16.msra.mxu1 %v1845_v3  ;;  %1925 = vmatpush1.bf16.msra.mxu0 %v1847_v49 }
 0x755   :  { %1885 = vmatprep.subr.bf16.mxu1 %v1850_v50  ;;  %1926 = vmatprep.subr.bf16.mxu0 %v1852_v54 }
 0x758   :  { %1886 = vmatpush1.bf16.msra.mxu1 %v1849_v55  ;;  %1927 = vmatpush1.bf16.msra.mxu0 %v1851_v58 }
 0x759   :  { %1887 = vmatprep.subr.bf16.mxu1 %v1854_v60  ;;  %1928 = vmatprep.subr.bf16.mxu0 %v1856_v10 }
 0x75c   :  { %1888 = vmatpush1.bf16.msra.mxu1 %v1853_v11  ;;  %1929 = vmatpush1.bf16.msra.mxu0 %v1855_v12 }
 0x75f   :  { %1890 = vmatmul.mubr.bf16.vlgmr.msra.gmra.mrb[12].mxu1 %v1791_v13  ;;  %1931 = vmatmul.mubr.bf16.vlgmr.msra.gmra.mrb[8].mxu0 %v1791_v13 }
 0x832   :  { %v4356_v15 = vpop.f32.mrb[12].mxu1  ;;  %v4358_v16 = vpop.f32.mrb[8].mxu0 }
 0x833   :  { %v1940_v17 = vrot.slane %v4356_v15, 4  ;;  %v1968_v18 = vmul.f32 %v4356_v15, %v4356_v15  ;;  %v1952_v19 = vrot.slane %v4358_v16, 4  ;;  %v1970_v20 = vmul.f32 %v4358_v16, %v4358_v16  ;;  %v4366_v21 = vpop.f32.mrb[13].mxu1  ;;  %v4368_v47 = vpop.f32.mrb[9].mxu0 }
 0x834   :  { %v1946_v22 = vrot.slane %v4366_v21, 4  ;;  %v1969_v56 = vmul.f32 %v4366_v21, %v4366_v21  ;;  %v1958_v62 = vrot.slane %v4368_v47, 4  ;;  %v1971_v23 = vmul.f32 %v4368_v47, %v4368_v47  ;;  %v1895_v2 = vpop.f32.mrb[14].mxu1  ;;  %v1936_v1 = vpop.f32.mrb[10].mxu0 }
 0x835   :  { %v1941_v57 = vadd.f32 %v1940_v17, %v4356_v15  ;;  %v1972_v24 = vrot.slane %v1968_v18, 4  ;;  %v1953_v9 = vadd.f32 %v1952_v19, %v4358_v16  ;;  %v1984_v59 = vrot.slane %v1970_v20, 4  ;;  %v1896_v25 = vpop.f32.mrb[15].mxu1  ;;  %v1937_v14 = vpop.f32.mrb[11].mxu0 }
 0x836   :  { %v1947_v61 = vadd.f32 %v1946_v22, %v4366_v21  ;;  %v1978_v7 = vrot.slane %v1969_v56, 4  ;;  %v1959_v26 = vadd.f32 %v1958_v62, %v4368_v47  ;;  %v1990_v8 = vrot.slane %v1971_v23, 4 }
 0x837   :  { %v1942_v63 = vrot.slane %v1941_v57, 2  ;;  %v1973_v27 = vadd.f32 %v1972_v24, %v1968_v18  ;;  %v1954_v0 = vrot.slane %v1953_v9, 2  ;;  %v1985_v28 = vadd.f32 %v1984_v59, %v1970_v20 }
 0x838   :  { %v1948_v30 = vrot.slane %v1947_v61, 2  ;;  %v1979_v31 = vadd.f32 %v1978_v7, %v1969_v56  ;;  %v1960_v32 = vrot.slane %v1959_v26, 2  ;;  %v1991_v33 = vadd.f32 %v1990_v8, %v1971_v23 }
 0x839   :  { %v1943_v34 = vadd.f32 %v1942_v63, %v1941_v57  ;;  %v1974_v35 = vrot.slane %v1973_v27, 2  ;;  %v1955_v37 = vadd.f32 %v1954_v0, %v1953_v9  ;;  %v1986_v4 = vrot.slane %v1985_v28, 2 }
 0x83a   :  { %v1949_v38 = vadd.f32 %v1948_v30, %v1947_v61  ;;  %v1980_v6 = vrot.slane %v1979_v31, 2  ;;  %v1961_v42 = vadd.f32 %v1960_v32, %v1959_v26  ;;  %v1992_v43 = vrot.slane %v1991_v33, 2 }
 0x83b   :  { %v1944_v44 = vrot.slane %v1943_v34, 1  ;;  %v1975_v46 = vadd.f32 %v1974_v35, %v1973_v27  ;;  %v1956_v48 = vrot.slane %v1955_v37, 1  ;;  %v1987_v29 = vadd.f32 %v1986_v4, %v1985_v28 }
 0x83c   :  { %v1950_v3 = vrot.slane %v1949_v38, 1  ;;  %v1981_v49 = vadd.f32 %v1980_v6, %v1979_v31  ;;  %v1962_v50 = vrot.slane %v1961_v42, 1  ;;  %v1993_v54 = vadd.f32 %v1992_v43, %v1991_v33 }
 0x83d   :  { %v1945_v55 = vadd.f32 %v1944_v44, %v1943_v34  ;;  %v1976_v58 = vrot.slane %v1975_v46, 1  ;;  %v1957_v60 = vadd.f32 %v1956_v48, %v1955_v37  ;;  %v1988_v10 = vrot.slane %v1987_v29, 1  ;;  %v1939_v44 = vld [vmem:[#allocation19] sm:$0xff] }
 0x83e   :  { %v1951_v11 = vadd.f32 %v1950_v3, %v1949_v38  ;;  %v1982_v12 = vrot.slane %v1981_v49, 1  ;;  %v1963_v13 = vadd.f32 %v1962_v50, %v1961_v42  ;;  %v1994_v17 = vrot.slane %v1993_v54, 1 }
 0x83f   :  { %v4380_v18 = vmul.f32 0.125, %v1945_v55  ;;  %v1977_v19 = vadd.f32 %v1976_v58, %v1975_v46  ;;  %v4382_v20 = vmul.f32 0.125, %v1957_v60  ;;  %v1989_v22 = vadd.f32 %v1988_v10, %v1987_v29 }
 0x840   :  { %v1965_v56 = vmul.f32 0.125, %v1951_v11  ;;  %v1983_v62 = vadd.f32 %v1982_v12, %v1981_v49  ;;  %v1967_v23 = vmul.f32 0.125, %v1963_v13  ;;  %v1995_v2 = vadd.f32 %v1994_v17, %v1993_v54 }
 0x841   :  { %v1996_v1 = vmul.f32 0.125, %v1977_v19  ;;  %v2000_v57 = vmul.f32 %v4380_v18, %v4380_v18  ;;  %v1998_v24 = vmul.f32 0.125, %v1989_v22  ;;  %v2002_v9 = vmul.f32 %v4382_v20, %v4382_v20 }
 0x842   :  { %v1997_v59 = vmul.f32 0.125, %v1983_v62  ;;  %v2001_v25 = vmul.f32 %v1965_v56, %v1965_v56  ;;  %v1999_v61 = vmul.f32 0.125, %v1995_v2  ;;  %v2003_v7 = vmul.f32 %v1967_v23, %v1967_v23 }
 0x843   :  { %v2004_v14 = vsub.f32 %v1996_v1, %v2000_v57  ;;  %v2006_v26 = vsub.f32 %v1998_v24, %v2002_v9  ;;  %v2092_v48 = vrot.slane %v1939_v44, %v4277_v5  ;;  %v2096_v29 = vrot.slane %v1939_v44, %v4279_v39 }
 0x844   :  { %v2005_v8 = vsub.f32 %v1997_v59, %v2001_v25  ;;  %v2007_v27 = vsub.f32 %v1999_v61, %v2003_v7  ;;  %v2100_v3 = vrot.slane %v1939_v44, %v4281_v40  ;;  %v2104_v49 = vrot.slane %v1939_v44, %v4283_v41 }
 0x845   :  { %v2008_v63 = vmax.f32 %v2004_v14, 0.0  ;;  %v2010_v0 = vmax.f32 %v2006_v26, 0.0  ;;  %v2112_v55 = vrot.slane %v2092_v48, %v4277_v5  ;;  %v2116_v58 = vrot.slane %v2096_v29, %v4277_v5 }
 0x846   :  { %v2009_v28 = vmax.f32 %v2005_v8, 0.0  ;;  %v2011_v31 = vmax.f32 %v2007_v27, 0.0  ;;  %v2120_v60 = vrot.slane %v2100_v3, %v4277_v5  ;;  %v2124_v10 = vrot.slane %v2104_v49, %v4277_v5 }
 0x847   :  { %v2012_v30 = vadd.f32 1e-05, %v2008_v63  ;;  %v2014_v32 = vadd.f32 1e-05, %v2010_v0  ;;  %v2043_v19 = vsub.f32 %v4356_v15, %v4380_v18  ;;  %v2045_v22 = vsub.f32 %v4358_v16, %v4382_v20 }
 0x848   :  { %v2013_v33 = vadd.f32 1e-05, %v2009_v28  ;;  %v2015_v34 = vadd.f32 1e-05, %v2011_v31  ;;  %v2044_v62 = vsub.f32 %v4366_v21, %v1965_v56  ;;  %v2046_v2 = vsub.f32 %v4368_v47, %v1967_v23 }
 0x849   :  { %3631 = vrsqrt.f32 %v2012_v30  ;;  %v2138_v20 = vstv %s3422_s7 }
 0x84a   :  { %3633 = vrsqrt.f32 %v2014_v32 }
 0x84b   :  { %3635 = vrsqrt.f32 %v2013_v33 }
 0x84c   :  { %3637 = vrsqrt.f32 %v2015_v34 }
 0x853   :  { %v3632_v35 = vpop.eup %3631 }
 0x854   :  { %v3634_v37 = vpop.eup %3633 }
 0x855   :  { %v3636_v4 = vpop.eup %3635 }
 0x856   :  { %v3638_v38 = vpop.eup %3637  ;;  %v2024_v6 = vcombine.low %v3632_v35, %v3636_v4 }
 0x857   :  { %v2025_v42 = vcombine.low %v3634_v37, %v3638_v38 }
 0x858   :  { %v2032_v43 = vrot.slane %v2024_v6, %v4275_v36 }
 0x859   :  { %v2039_v46 = vrot.slane %v2025_v42, %v4275_v36 }
 0x85b   :  { %v2040_v50 = vcombine.low %v2032_v43, %v2039_v46 }
 0x85d   :  { %v2042_v54 = vmul.f32 %v2040_v50, %v1939_v44 }
 0x85f   :  { %v2051_v11 = vrot.slane %v2042_v54, %v4287_v45  ;;  %v2055_v12 = vrot.slane %v2042_v54, %v4293_v51  ;;  %v2059_v13 = vrot.slane %v2042_v54, %v4295_v52  ;;  %v2063_v17 = vrot.slane %v2042_v54, %v4297_v53 }
 0x861   :  { %v2071_v1 = vrot.slane %v2051_v11, %v4287_v45  ;;  %v2075_v57 = vrot.slane %v2055_v12, %v4287_v45  ;;  %v2079_v24 = vrot.slane %v2059_v13, %v4287_v45  ;;  %v2083_v9 = vrot.slane %v2063_v17, %v4287_v45 }
 0x863   :  { %v2084_v59 = vmul.f32 %v2071_v1, %v2043_v19  ;;  %v2085_v25 = vmul.f32 %v2075_v57, %v2044_v62  ;;  %v2086_v14 = vmul.f32 %v2079_v24, %v2045_v22  ;;  %v2087_v61 = vmul.f32 %v2083_v9, %v2046_v2 }
 0x865   :  { %v2125_v15 = vadd.f32 %v2112_v55, %v2084_v59  ;;  %v2126_v18 = vadd.f32 %v2116_v58, %v2085_v25  ;;  %v2127_v7 = vadd.f32 %v2120_v60, %v2086_v14  ;;  %v2128_v16 = vadd.f32 %v2124_v10, %v2087_v61 }
 0x867   :  { %v2134_v21 = vmin.f32 %v2125_v15, 0.0  ;;  %v2135_v56 = vmin.f32 %v2126_v18, 0.0  ;;  %v2136_v47 = vmin.f32 %v2127_v7, 0.0  ;;  %v2137_v23 = vmin.f32 %v2128_v16, 0.0 }
 0x868   :  { %v2130_v26 = vmax.f32 %v2125_v15, 0.0  ;;  %v2131_v8 = vmax.f32 %v2126_v18, 0.0  ;;  %v2132_v63 = vmax.f32 %v2127_v7, 0.0  ;;  %v2133_v27 = vmax.f32 %v2128_v16, 0.0 }
 0x869   :  { %v2139_v0 = vmul.f32 %v2138_v20, %v2134_v21  ;;  %v2140_v28 = vmul.f32 %v2138_v20, %v2135_v56  ;;  %v2141_v30 = vmul.f32 %v2138_v20, %v2136_v47  ;;  %v2142_v31 = vmul.f32 %v2138_v20, %v2137_v23 }
 0x86b   :  { %v4412_v32 = vadd.f32 %v2139_v0, %v2130_v26  ;;  %v2144_v33 = vadd.f32 %v2140_v28, %v2131_v8  ;;  %v4414_v34 = vadd.f32 %v2141_v30, %v2132_v63  ;;  %v4416_v35 = vadd.f32 %v2142_v31, %v2133_v27 }
 0x86c   :  { %3907 = dma.done.wait [#allocation8 + $0x5], 36864 }
 0x86d   :  { %3908 = vsyncadd [#allocation8 + $0x5], 4294930432  ;;  %v4418_v37 = vpack.c.bf16 %v2144_v33, %v2144_v33  ;;  %v2155_v4 = vld [vmem:[#allocation7 + $0x8] sm:$0xff]  ;;  %v2157_v38 = vld [vmem:[#allocation7 + $0x18] sm:$0xff]  ;;  %s3423_s19 = sld [smem:[#allocation22 + $0x2]]  ;;  %s3948_s0 = smov [#allocation23]  }
 0x86e   :  { %v2154_v6 = vld [vmem:[#allocation7] sm:$0xff]  ;;  %2442 = vmatprep.subr.bf16.mxu1 %v2155_v4  ;;  %2524 = vmatprep.subr.bf16.mxu0 %v2157_v38  ;;  %v2156_v42 = vld [vmem:[#allocation7 + $0x10] sm:$0xff]  ;;  %v2163_v46 = vld [vmem:[#allocation7 + $0x48] sm:$0xff]  ;;  %s3337_s30 = sshll.u32 %s3948_s0, 4  ;;  %s3338_s30 = int_to_ptr.vmem [resolvable:$true] %s3337_s30 }
 0x86f   :  { %2474 = vmatprep.mubr.bf16.mxu1 %v4418_v37  ;;  %2556 = vmatprep.mubr.bf16.mxu0 %v4418_v37  ;;  %v2164_v43 = vld [vmem:[#allocation7 + $0x50] sm:$0xff]  ;;  %v2166_v44 = vld [vmem:[#allocation7 + $0x60] sm:$0xff]  ;;  %v2165_v48 = vld [vmem:[#allocation7 + $0x58] sm:$0xff]  ;;  %s3843_s29 = scalar_lea.vmem %s3338_s30, 128  ;;  %p3848_p12 = scmp.lt.s32.totalorder %s3338_s30, %s3338_s30 }
 0x870   :  { %2443 = vmatpush1.bf16.msra.mxu1 %v2154_v6  ;;  %2525 = vmatpush1.bf16.msra.mxu0 %v2156_v42  ;;  %v2173_v29 = vld [vmem:[#allocation7 + $0x98] sm:$0xff]  ;;  %v2175_v3 = vld [vmem:[#allocation7 + $0xa8] sm:$0xff]  ;;  %v2172_v49 = vld [vmem:[#allocation7 + $0x90] sm:$0xff]  ;;  %p3844_p11 = scmp.ne.s32.totalorder %s3338_s30, %s3843_s29  ;;  %p3849_p13 = scmp.lt.s32.totalorder %s3843_s29, %s3843_s29 }
 0x871   :  { %2444 = vmatprep.subr.bf16.mxu1 %v2164_v43  ;;  %2526 = vmatprep.subr.bf16.mxu0 %v2166_v44  ;;  %v2174_v50 = vld [vmem:[#allocation7 + $0xa0] sm:$0xff]  ;;  %v2184_v55 = vld [vmem:[#allocation7 + $0xf0] sm:$0xff]  ;;  %v2181_v58 = vld [vmem:[#allocation7 + $0xd8] sm:$0xff] }
 0x872   :  { %v2182_v54 = vld [vmem:[#allocation7 + $0xe0] sm:$0xff]  ;;  %v2183_v60 = vld [vmem:[#allocation7 + $0xe8] sm:$0xff]  ;;  %v2193_v11 = vld [vmem:[#allocation7 + $0x138] sm:$0xff]  ;;  %p3850_p0 = por %p3849_p13, %p3848_p12 }
 0x873   :  { %v2191_v10 = vld [vmem:[#allocation7 + $0x128] sm:$0xff]  ;;  %v2190_v12 = vld [vmem:[#allocation7 + $0x120] sm:$0xff]  ;;  %v2192_v13 = vld [vmem:[#allocation7 + $0x130] sm:$0xff] }
 0x874   :  { %2445 = vmatpush1.bf16.msra.mxu1 %v2163_v46  ;;  %2527 = vmatpush1.bf16.msra.mxu0 %v2165_v48  ;;  %v2200_v17 = vld [vmem:[#allocation7 + $0x170] sm:$0xff]  ;;  %v2202_v19 = vld [vmem:[#allocation7 + $0x180] sm:$0xff]  ;;  %v2199_v22 = vld [vmem:[#allocation7 + $0x168] sm:$0xff]  ;;  %p3851_p1 = pnand %p3850_p0, %p3844_p11 }
 0x875   :  { %2446 = vmatprep.subr.bf16.mxu1 %v2173_v29  ;;  %2528 = vmatprep.subr.bf16.mxu0 %v2175_v3  ;;  %v2201_v62 = vld [vmem:[#allocation7 + $0x178] sm:$0xff]  ;;  %v2211_v1 = vld [vmem:[#allocation7 + $0x1c8] sm:$0xff]  ;;  %v2208_v57 = vld [vmem:[#allocation7 + $0x1b0] sm:$0xff] }
 0x876   :  { %v2209_v2 = vld [vmem:[#allocation7 + $0x1b8] sm:$0xff]  ;;  %v2210_v24 = vld [vmem:[#allocation7 + $0x1c0] sm:$0xff]  ;;  %v2220_v59 = vld [vmem:[#allocation7 + $0x210] sm:$0xff] }
 0x877   :  { %v2218_v9 = vld [vmem:[#allocation7 + $0x200] sm:$0xff]  ;;  %v2217_v25 = vld [vmem:[#allocation7 + $0x1f8] sm:$0xff]  ;;  %v2219_v14 = vld [vmem:[#allocation7 + $0x208] sm:$0xff] }
 0x878   :  { %2447 = vmatpush1.bf16.msra.mxu1 %v2172_v49  ;;  %2529 = vmatpush1.bf16.msra.mxu0 %v2174_v50  ;;  %v2227_v61 = vld [vmem:[#allocation7 + $0x248] sm:$0xff]  ;;  %v2229_v15 = vld [vmem:[#allocation7 + $0x258] sm:$0xff]  ;;  %v2226_v18 = vld [vmem:[#allocation7 + $0x240] sm:$0xff] }
 0x879   :  { %2448 = vmatprep.subr.bf16.mxu1 %v2182_v54  ;;  %2530 = vmatprep.subr.bf16.mxu0 %v2184_v55  ;;  %v2228_v7 = vld [vmem:[#allocation7 + $0x250] sm:$0xff]  ;;  %v2238_v20 = vld [vmem:[#allocation7 + $0x2a0] sm:$0xff]  ;;  %v2235_v21 = vld [vmem:[#allocation7 + $0x288] sm:$0xff] }
 0x87a   :  { %v2236_v16 = vld [vmem:[#allocation7 + $0x290] sm:$0xff]  ;;  %v2237_v56 = vld [vmem:[#allocation7 + $0x298] sm:$0xff]  ;;  %v2247_v23 = vld [vmem:[#allocation7 + $0x2e8] sm:$0xff] }
 0x87b   :  { %v2245_v47 = vld [vmem:[#allocation7 + $0x2d8] sm:$0xff]  ;;  %v2244_v26 = vld [vmem:[#allocation7 + $0x2d0] sm:$0xff]  ;;  %v2246_v8 = vld [vmem:[#allocation7 + $0x2e0] sm:$0xff] }
 0x87c   :  { %2449 = vmatpush1.bf16.msra.mxu1 %v2181_v58  ;;  %2531 = vmatpush1.bf16.msra.mxu0 %v2183_v60  ;;  %v2254_v63 = vld [vmem:[#allocation7 + $0x320] sm:$0xff]  ;;  %v2256_v27 = vld [vmem:[#allocation7 + $0x330] sm:$0xff]  ;;  %v2253_v0 = vld [vmem:[#allocation7 + $0x318] sm:$0xff]  ;;  %v4424_v60 = vpack.c.bf16 %v4412_v32, %v4412_v32 }
 0x87d   :  { %2450 = vmatprep.subr.bf16.mxu1 %v2191_v10  ;;  %2532 = vmatprep.subr.bf16.mxu0 %v2193_v11  ;;  %v2255_v28 = vld [vmem:[#allocation7 + $0x328] sm:$0xff]  ;;  %v2265_v31 = vld [vmem:[#allocation7 + $0x378] sm:$0xff]  ;;  %v2262_v33 = vld [vmem:[#allocation7 + $0x360] sm:$0xff] }
 0x87e   :  { %v2263_v30 = vld [vmem:[#allocation7 + $0x368] sm:$0xff]  ;;  %v2264_v4 = vld [vmem:[#allocation7 + $0x370] sm:$0xff]  ;;  %v2274_v6 = vld [vmem:[#allocation7 + $0x3c0] sm:$0xff] }
 0x87f   :  { %v2272_v38 = vld [vmem:[#allocation7 + $0x3b0] sm:$0xff]  ;;  %v2271_v42 = vld [vmem:[#allocation7 + $0x3a8] sm:$0xff]  ;;  %v2273_v43 = vld [vmem:[#allocation7 + $0x3b8] sm:$0xff] }
 0x880   :  { %2451 = vmatpush1.bf16.msra.mxu1 %v2190_v12  ;;  %2533 = vmatpush1.bf16.msra.mxu0 %v2192_v13  ;;  %v2281_v44 = vld [vmem:[#allocation7 + $0x3f8] sm:$0xff]  ;;  %v2283_v46 = vld [vmem:[#allocation7 + $0x408] sm:$0xff]  ;;  %v2280_v48 = vld [vmem:[#allocation7 + $0x3f0] sm:$0xff] }
 0x881   :  { %2452 = vmatprep.subr.bf16.mxu1 %v2200_v17  ;;  %2534 = vmatprep.subr.bf16.mxu0 %v2202_v19  ;;  %v2282_v29 = vld [vmem:[#allocation7 + $0x400] sm:$0xff]  ;;  %v2292_v49 = vld [vmem:[#allocation7 + $0x450] sm:$0xff]  ;;  %v2289_v50 = vld [vmem:[#allocation7 + $0x438] sm:$0xff]  ;;  %v4428_v17 = vpack.c.bf16 %v4416_v35, %v4416_v35 }
 0x882   :  { %v2290_v3 = vld [vmem:[#allocation7 + $0x440] sm:$0xff]  ;;  %v2291_v54 = vld [vmem:[#allocation7 + $0x448] sm:$0xff]  ;;  %v2301_v58 = vld [vmem:[#allocation7 + $0x498] sm:$0xff] }
 0x883   :  { %v2299_v55 = vld [vmem:[#allocation7 + $0x488] sm:$0xff]  ;;  %v2298_v10 = vld [vmem:[#allocation7 + $0x480] sm:$0xff]  ;;  %v2300_v11 = vld [vmem:[#allocation7 + $0x490] sm:$0xff] }
 0x884   :  { %2453 = vmatpush1.bf16.msra.mxu1 %v2199_v22  ;;  %2535 = vmatpush1.bf16.msra.mxu0 %v2201_v62  ;;  %v2308_v12 = vld [vmem:[#allocation7 + $0x4d0] sm:$0xff]  ;;  %v2310_v13 = vld [vmem:[#allocation7 + $0x4e0] sm:$0xff]  ;;  %v2307_v32 = vld [vmem:[#allocation7 + $0x4c8] sm:$0xff] }
 0x885   :  { %2454 = vmatprep.subr.bf16.mxu1 %v2209_v2  ;;  %2536 = vmatprep.subr.bf16.mxu0 %v2211_v1  ;;  %v2309_v19 = vld [vmem:[#allocation7 + $0x4d8] sm:$0xff]  ;;  %v2319_v62 = vld [vmem:[#allocation7 + $0x528] sm:$0xff]  ;;  %v2316_v35 = vld [vmem:[#allocation7 + $0x510] sm:$0xff] }
 0x886   :  { %v2317_v22 = vld [vmem:[#allocation7 + $0x518] sm:$0xff]  ;;  %v2318_v2 = vld [vmem:[#allocation7 + $0x520] sm:$0xff] }
 0x887   :  { %v2326_v1 = vld [vmem:[#allocation7 + $0x560] sm:$0xff] }
 0x888   :  { %2455 = vmatpush1.bf16.msra.mxu1 %v2208_v57  ;;  %2537 = vmatpush1.bf16.msra.mxu0 %v2210_v24  ;;  %v2328_v57 = vld [vmem:[#allocation7 + $0x570] sm:$0xff]  ;;  %v2325_v24 = vld [vmem:[#allocation7 + $0x558] sm:$0xff] }
 0x889   :  { %2456 = vmatprep.subr.bf16.mxu1 %v2218_v9  ;;  %2538 = vmatprep.subr.bf16.mxu0 %v2220_v59  ;;  %v2327_v9 = vld [vmem:[#allocation7 + $0x568] sm:$0xff] }
 0x88a   :  { %v2335_v59 = vld [vmem:[#allocation7 + $0x5a8] sm:$0xff] }
 0x88c   :  { %2457 = vmatpush1.bf16.msra.mxu1 %v2217_v25  ;;  %2539 = vmatpush1.bf16.msra.mxu0 %v2219_v14  ;;  %v2337_v25 = vld [vmem:[#allocation7 + $0x5b8] sm:$0xff]  ;;  %v2334_v14 = vld [vmem:[#allocation7 + $0x5a0] sm:$0xff] }
 0x88d   :  { %2458 = vmatprep.subr.bf16.mxu1 %v2227_v61  ;;  %2540 = vmatprep.subr.bf16.mxu0 %v2229_v15  ;;  %v2336_v61 = vld [vmem:[#allocation7 + $0x5b0] sm:$0xff] }
 0x88e   :  { %v2344_v15 = vld [vmem:[#allocation7 + $0x5f0] sm:$0xff] }
 0x890   :  { %2459 = vmatpush1.bf16.msra.mxu1 %v2226_v18  ;;  %2541 = vmatpush1.bf16.msra.mxu0 %v2228_v7  ;;  %v2346_v18 = vld [vmem:[#allocation7 + $0x600] sm:$0xff]  ;;  %v2343_v7 = vld [vmem:[#allocation7 + $0x5e8] sm:$0xff] }
 0x891   :  { %2460 = vmatprep.subr.bf16.mxu1 %v2236_v16  ;;  %2542 = vmatprep.subr.bf16.mxu0 %v2238_v20  ;;  %v2345_v16 = vld [vmem:[#allocation7 + $0x5f8] sm:$0xff] }
 0x892   :  { %v2353_v20 = vld [vmem:[#allocation7 + $0x638] sm:$0xff] }
 0x894   :  { %2461 = vmatpush1.bf16.msra.mxu1 %v2235_v21  ;;  %2543 = vmatpush1.bf16.msra.mxu0 %v2237_v56  ;;  %v2355_v21 = vld [vmem:[#allocation7 + $0x648] sm:$0xff]  ;;  %v2352_v56 = vld [vmem:[#allocation7 + $0x630] sm:$0xff] }
 0x895   :  { %2462 = vmatprep.subr.bf16.mxu1 %v2245_v47  ;;  %2544 = vmatprep.subr.bf16.mxu0 %v2247_v23  ;;  %v2354_v47 = vld [vmem:[#allocation7 + $0x640] sm:$0xff] }
 0x896   :  { %v2362_v23 = vld [vmem:[#allocation7 + $0x680] sm:$0xff] }
 0x898   :  { %2463 = vmatpush1.bf16.msra.mxu1 %v2244_v26  ;;  %2545 = vmatpush1.bf16.msra.mxu0 %v2246_v8  ;;  %v2364_v26 = vld [vmem:[#allocation7 + $0x690] sm:$0xff]  ;;  %v2361_v8 = vld [vmem:[#allocation7 + $0x678] sm:$0xff] }
 0x899   :  { %2464 = vmatprep.subr.bf16.mxu1 %v2254_v63  ;;  %2546 = vmatprep.subr.bf16.mxu0 %v2256_v27  ;;  %v2363_v63 = vld [vmem:[#allocation7 + $0x688] sm:$0xff] }
 0x89a   :  { %v2371_v27 = vld [vmem:[#allocation7 + $0x6c8] sm:$0xff] }
 0x89c   :  { %2465 = vmatpush1.bf16.msra.mxu1 %v2253_v0  ;;  %2547 = vmatpush1.bf16.msra.mxu0 %v2255_v28  ;;  %v2373_v0 = vld [vmem:[#allocation7 + $0x6d8] sm:$0xff]  ;;  %v2370_v28 = vld [vmem:[#allocation7 + $0x6c0] sm:$0xff] }
 0x89d   :  { %2466 = vmatprep.subr.bf16.mxu1 %v2263_v30  ;;  %2548 = vmatprep.subr.bf16.mxu0 %v2265_v31  ;;  %v2372_v30 = vld [vmem:[#allocation7 + $0x6d0] sm:$0xff] }
 0x89e   :  { %v2380_v31 = vld [vmem:[#allocation7 + $0x710] sm:$0xff] }
 0x8a0   :  { %2467 = vmatpush1.bf16.msra.mxu1 %v2262_v33  ;;  %2549 = vmatpush1.bf16.msra.mxu0 %v2264_v4  ;;  %v2382_v33 = vld [vmem:[#allocation7 + $0x720] sm:$0xff]  ;;  %v2379_v4 = vld [vmem:[#allocation7 + $0x708] sm:$0xff] }
 0x8a1   :  { %2468 = vmatprep.subr.bf16.mxu1 %v2272_v38  ;;  %2550 = vmatprep.subr.bf16.mxu0 %v2274_v6  ;;  %v2381_v38 = vld [vmem:[#allocation7 + $0x718] sm:$0xff] }
 0x8a2   :  { %v2389_v6 = vld [vmem:[#allocation7 + $0x758] sm:$0xff] }
 0x8a4   :  { %2469 = vmatpush1.bf16.msra.mxu1 %v2271_v42  ;;  %2551 = vmatpush1.bf16.msra.mxu0 %v2273_v43  ;;  %v2391_v42 = vld [vmem:[#allocation7 + $0x768] sm:$0xff]  ;;  %v2388_v43 = vld [vmem:[#allocation7 + $0x750] sm:$0xff] }
 0x8a5   :  { %2470 = vmatprep.subr.bf16.mxu1 %v2281_v44  ;;  %2552 = vmatprep.subr.bf16.mxu0 %v2283_v46  ;;  %v2390_v44 = vld [vmem:[#allocation7 + $0x760] sm:$0xff] }
 0x8a6   :  { %v2398_v46 = vld [vmem:[#allocation7 + $0x7a0] sm:$0xff] }
 0x8a8   :  { %2471 = vmatpush1.bf16.msra.mxu1 %v2280_v48  ;;  %2553 = vmatpush1.bf16.msra.mxu0 %v2282_v29  ;;  %v2400_v48 = vld [vmem:[#allocation7 + $0x7b0] sm:$0xff]  ;;  %v2397_v29 = vld [vmem:[#allocation7 + $0x798] sm:$0xff] }
 0x8a9   :  { %2472 = vmatprep.subr.bf16.mxu1 %v2290_v3  ;;  %2554 = vmatprep.subr.bf16.mxu0 %v2292_v49  ;;  %v2399_v3 = vld [vmem:[#allocation7 + $0x7a8] sm:$0xff] }
 0x8aa   :  { %v2407_v49 = vld [vmem:[#allocation7 + $0x7e8] sm:$0xff] }
 0x8ac   :  { %2473 = vmatpush1.bf16.msra.mxu1 %v2289_v50  ;;  %2555 = vmatpush1.bf16.msra.mxu0 %v2291_v54  ;;  %v2409_v50 = vld [vmem:[#allocation7 + $0x7f8] sm:$0xff]  ;;  %v2406_v54 = vld [vmem:[#allocation7 + $0x7e0] sm:$0xff] }
 0x8ad   :  { %2483 = vmatprep.subr.bf16.mxu1 %v2299_v55  ;;  %2565 = vmatprep.subr.bf16.mxu0 %v2301_v58  ;;  %v2408_v55 = vld [vmem:[#allocation7 + $0x7f0] sm:$0xff] }
 0x8ae   :  { %v2416_v58 = vld [vmem:[#allocation7 + $0x830] sm:$0xff] }
 0x8af   :  { %2475 = vmatmul.mubr.bf16.vlgmr.msra.gmra.mrb[16].mxu1 %v4424_v60  ;;  %2557 = vmatmul.mubr.bf16.vlgmr.msra.gmra.mrb[12].mxu0 %v4424_v60 }
 0x8b0   :  { %2484 = vmatpush1.bf16.msra.mxu1 %v2298_v10  ;;  %2566 = vmatpush1.bf16.msra.mxu0 %v2300_v11  ;;  %v2418_v10 = vld [vmem:[#allocation7 + $0x840] sm:$0xff]  ;;  %v2415_v11 = vld [vmem:[#allocation7 + $0x828] sm:$0xff] }
 0x8b1   :  { %2485 = vmatprep.subr.bf16.mxu1 %v2308_v12  ;;  %2567 = vmatprep.subr.bf16.mxu0 %v2310_v13  ;;  %v2417_v12 = vld [vmem:[#allocation7 + $0x838] sm:$0xff] }
 0x8b2   :  { %2515 = vmatprep.mubr.bf16.mxu1 %v4428_v17  ;;  %2597 = vmatprep.mubr.bf16.mxu0 %v4428_v17  ;;  %v2425_v13 = vld [vmem:[#allocation7 + $0x878] sm:$0xff] }
 0x8b4   :  { %2486 = vmatpush1.bf16.msra.mxu1 %v2307_v32  ;;  %2568 = vmatpush1.bf16.msra.mxu0 %v2309_v19  ;;  %v2427_v32 = vld [vmem:[#allocation7 + $0x888] sm:$0xff]  ;;  %v2424_v19 = vld [vmem:[#allocation7 + $0x870] sm:$0xff] }
 0x8b5   :  { %2487 = vmatprep.subr.bf16.mxu1 %v2317_v22  ;;  %2569 = vmatprep.subr.bf16.mxu0 %v2319_v62  ;;  %v2426_v22 = vld [vmem:[#allocation7 + $0x880] sm:$0xff] }
 0x8b6   :  { %v2434_v62 = vld [vmem:[#allocation7 + $0x8c0] sm:$0xff] }
 0x8b8   :  { %2488 = vmatpush1.bf16.msra.mxu1 %v2316_v35  ;;  %2570 = vmatpush1.bf16.msra.mxu0 %v2318_v2  ;;  %v2436_v35 = vld [vmem:[#allocation7 + $0x8d0] sm:$0xff]  ;;  %v2433_v2 = vld [vmem:[#allocation7 + $0x8b8] sm:$0xff] }
 0x8b9   :  { %2489 = vmatprep.subr.bf16.mxu1 %v2326_v1  ;;  %2571 = vmatprep.subr.bf16.mxu0 %v2328_v57  ;;  %v2435_v1 = vld [vmem:[#allocation7 + $0x8c8] sm:$0xff] }
 0x8ba   :  { %v2159_v57 = vld [vmem:[#allocation7 + $0x28] sm:$0xff] }
 0x8bc   :  { %2490 = vmatpush1.bf16.msra.mxu1 %v2325_v24  ;;  %2572 = vmatpush1.bf16.msra.mxu0 %v2327_v9  ;;  %v2161_v24 = vld [vmem:[#allocation7 + $0x38] sm:$0xff]  ;;  %v4436_v9 = vpack.c.bf16 %v4414_v34, %v4414_v34 }
 0x8bd   :  { %2491 = vmatprep.subr.bf16.mxu1 %v2335_v59  ;;  %2573 = vmatprep.subr.bf16.mxu0 %v2337_v25  ;;  %v2158_v59 = vld [vmem:[#allocation7 + $0x20] sm:$0xff]  ;;  %v2160_v25 = vld [vmem:[#allocation7 + $0x30] sm:$0xff]  ;;  %v2177_v34 = vld [vmem:[#allocation7 + $0xb8] sm:$0xff] }
 0x8c0   :  { %2492 = vmatpush1.bf16.msra.mxu1 %v2334_v14  ;;  %2574 = vmatpush1.bf16.msra.mxu0 %v2336_v61  ;;  %v2168_v14 = vld [vmem:[#allocation7 + $0x70] sm:$0xff]  ;;  %v2170_v61 = vld [vmem:[#allocation7 + $0x80] sm:$0xff] }
 0x8c1   :  { %2493 = vmatprep.subr.bf16.mxu1 %v2344_v15  ;;  %2575 = vmatprep.subr.bf16.mxu0 %v2346_v18  ;;  %v2167_v15 = vld [vmem:[#allocation7 + $0x68] sm:$0xff]  ;;  %v2169_v18 = vld [vmem:[#allocation7 + $0x78] sm:$0xff] }
 0x8c4   :  { %2494 = vmatpush1.bf16.msra.mxu1 %v2343_v7  ;;  %2576 = vmatpush1.bf16.msra.mxu0 %v2345_v16  ;;  %v2179_v7 = vld [vmem:[#allocation7 + $0xc8] sm:$0xff]  ;;  %v2176_v16 = vld [vmem:[#allocation7 + $0xb0] sm:$0xff] }
 0x8c5   :  { %2495 = vmatprep.subr.bf16.mxu1 %v2353_v20  ;;  %2577 = vmatprep.subr.bf16.mxu0 %v2355_v21  ;;  %v2178_v20 = vld [vmem:[#allocation7 + $0xc0] sm:$0xff] }
 0x8c6   :  { %v2186_v21 = vld [vmem:[#allocation7 + $0x100] sm:$0xff] }
 0x8c8   :  { %2496 = vmatpush1.bf16.msra.mxu1 %v2352_v56  ;;  %2578 = vmatpush1.bf16.msra.mxu0 %v2354_v47  ;;  %v2188_v56 = vld [vmem:[#allocation7 + $0x110] sm:$0xff]  ;;  %v2185_v47 = vld [vmem:[#allocation7 + $0xf8] sm:$0xff] }
 0x8c9   :  { %2497 = vmatprep.subr.bf16.mxu1 %v2362_v23  ;;  %2579 = vmatprep.subr.bf16.mxu0 %v2364_v26  ;;  %v2187_v23 = vld [vmem:[#allocation7 + $0x108] sm:$0xff] }
 0x8ca   :  { %v2195_v26 = vld [vmem:[#allocation7 + $0x148] sm:$0xff] }
 0x8cc   :  { %2498 = vmatpush1.bf16.msra.mxu1 %v2361_v8  ;;  %2580 = vmatpush1.bf16.msra.mxu0 %v2363_v63  ;;  %v2197_v8 = vld [vmem:[#allocation7 + $0x158] sm:$0xff]  ;;  %v2194_v63 = vld [vmem:[#allocation7 + $0x140] sm:$0xff] }
 0x8cd   :  { %2499 = vmatprep.subr.bf16.mxu1 %v2371_v27  ;;  %2581 = vmatprep.subr.bf16.mxu0 %v2373_v0  ;;  %v2196_v27 = vld [vmem:[#allocation7 + $0x150] sm:$0xff] }
 0x8ce   :  { %v2204_v0 = vld [vmem:[#allocation7 + $0x190] sm:$0xff] }
 0x8d0   :  { %2500 = vmatpush1.bf16.msra.mxu1 %v2370_v28  ;;  %2582 = vmatpush1.bf16.msra.mxu0 %v2372_v30  ;;  %v2206_v28 = vld [vmem:[#allocation7 + $0x1a0] sm:$0xff]  ;;  %v2203_v30 = vld [vmem:[#allocation7 + $0x188] sm:$0xff] }
 0x8d1   :  { %2501 = vmatprep.subr.bf16.mxu1 %v2380_v31  ;;  %2583 = vmatprep.subr.bf16.mxu0 %v2382_v33  ;;  %v2205_v31 = vld [vmem:[#allocation7 + $0x198] sm:$0xff] }
 0x8d2   :  { %v2213_v33 = vld [vmem:[#allocation7 + $0x1d8] sm:$0xff] }
 0x8d4   :  { %2502 = vmatpush1.bf16.msra.mxu1 %v2379_v4  ;;  %2584 = vmatpush1.bf16.msra.mxu0 %v2381_v38  ;;  %v2215_v4 = vld [vmem:[#allocation7 + $0x1e8] sm:$0xff]  ;;  %v2212_v38 = vld [vmem:[#allocation7 + $0x1d0] sm:$0xff] }
 0x8d5   :  { %2503 = vmatprep.subr.bf16.mxu1 %v2389_v6  ;;  %2585 = vmatprep.subr.bf16.mxu0 %v2391_v42  ;;  %v2214_v6 = vld [vmem:[#allocation7 + $0x1e0] sm:$0xff] }
 0x8d6   :  { %v2222_v42 = vld [vmem:[#allocation7 + $0x220] sm:$0xff] }
 0x8d8   :  { %2504 = vmatpush1.bf16.msra.mxu1 %v2388_v43  ;;  %2586 = vmatpush1.bf16.msra.mxu0 %v2390_v44  ;;  %v2224_v43 = vld [vmem:[#allocation7 + $0x230] sm:$0xff]  ;;  %v2221_v44 = vld [vmem:[#allocation7 + $0x218] sm:$0xff] }
 0x8d9   :  { %2505 = vmatprep.subr.bf16.mxu1 %v2398_v46  ;;  %2587 = vmatprep.subr.bf16.mxu0 %v2400_v48  ;;  %v2223_v46 = vld [vmem:[#allocation7 + $0x228] sm:$0xff] }
 0x8da   :  { %v2231_v48 = vld [vmem:[#allocation7 + $0x268] sm:$0xff] }
 0x8dc   :  { %2506 = vmatpush1.bf16.msra.mxu1 %v2397_v29  ;;  %2588 = vmatpush1.bf16.msra.mxu0 %v2399_v3  ;;  %v2233_v29 = vld [vmem:[#allocation7 + $0x278] sm:$0xff]  ;;  %v2230_v3 = vld [vmem:[#allocation7 + $0x260] sm:$0xff] }
 0x8dd   :  { %2507 = vmatprep.subr.bf16.mxu1 %v2407_v49  ;;  %2589 = vmatprep.subr.bf16.mxu0 %v2409_v50  ;;  %v2232_v49 = vld [vmem:[#allocation7 + $0x270] sm:$0xff] }
 0x8de   :  { %v2240_v50 = vld [vmem:[#allocation7 + $0x2b0] sm:$0xff] }
 0x8e0   :  { %2508 = vmatpush1.bf16.msra.mxu1 %v2406_v54  ;;  %2590 = vmatpush1.bf16.msra.mxu0 %v2408_v55  ;;  %v2242_v54 = vld [vmem:[#allocation7 + $0x2c0] sm:$0xff]  ;;  %v2239_v55 = vld [vmem:[#allocation7 + $0x2a8] sm:$0xff] }
 0x8e1   :  { %2509 = vmatprep.subr.bf16.mxu1 %v2416_v58  ;;  %2591 = vmatprep.subr.bf16.mxu0 %v2418_v10  ;;  %v2241_v58 = vld [vmem:[#allocation7 + $0x2b8] sm:$0xff] }
 0x8e2   :  { %v2249_v10 = vld [vmem:[#allocation7 + $0x2f8] sm:$0xff] }
 0x8e4   :  { %2510 = vmatpush1.bf16.msra.mxu1 %v2415_v11  ;;  %2592 = vmatpush1.bf16.msra.mxu0 %v2417_v12  ;;  %v2251_v11 = vld [vmem:[#allocation7 + $0x308] sm:$0xff]  ;;  %v2248_v12 = vld [vmem:[#allocation7 + $0x2f0] sm:$0xff] }
 0x8e5   :  { %2511 = vmatprep.subr.bf16.mxu1 %v2425_v13  ;;  %2593 = vmatprep.subr.bf16.mxu0 %v2427_v32  ;;  %v2250_v13 = vld [vmem:[#allocation7 + $0x300] sm:$0xff] }
 0x8e6   :  { %v2258_v32 = vld [vmem:[#allocation7 + $0x340] sm:$0xff] }
 0x8e8   :  { %2512 = vmatpush1.bf16.msra.mxu1 %v2424_v19  ;;  %2594 = vmatpush1.bf16.msra.mxu0 %v2426_v22  ;;  %v2260_v19 = vld [vmem:[#allocation7 + $0x350] sm:$0xff]  ;;  %v2257_v22 = vld [vmem:[#allocation7 + $0x338] sm:$0xff] }
 0x8e9   :  { %2513 = vmatprep.subr.bf16.mxu1 %v2434_v62  ;;  %2595 = vmatprep.subr.bf16.mxu0 %v2436_v35  ;;  %v2259_v62 = vld [vmem:[#allocation7 + $0x348] sm:$0xff] }
 0x8ea   :  { %v2267_v35 = vld [vmem:[#allocation7 + $0x388] sm:$0xff] }
 0x8ec   :  { %2514 = vmatpush1.bf16.msra.mxu1 %v2433_v2  ;;  %2596 = vmatpush1.bf16.msra.mxu0 %v2435_v1  ;;  %v2269_v2 = vld [vmem:[#allocation7 + $0x398] sm:$0xff]  ;;  %v2266_v1 = vld [vmem:[#allocation7 + $0x380] sm:$0xff] }
 0x8ed   :  { %2606 = vmatprep.subr.bf16.mxu1 %v2159_v57  ;;  %2688 = vmatprep.subr.bf16.mxu0 %v2161_v24  ;;  %v2268_v57 = vld [vmem:[#allocation7 + $0x390] sm:$0xff] }
 0x8ee   :  { %v2276_v24 = vld [vmem:[#allocation7 + $0x3d0] sm:$0xff] }
 0x8ef   :  { %2516 = vmatmul.mubr.bf16.vlgmr.msra.gmra.mrb[16].mxu1 %v4436_v9  ;;  %2598 = vmatmul.mubr.bf16.vlgmr.msra.gmra.mrb[12].mxu0 %v4436_v9 }
 0x8f0   :  { %2607 = vmatpush1.bf16.msra.mxu1 %v2158_v59  ;;  %2689 = vmatpush1.bf16.msra.mxu0 %v2160_v25  ;;  %v2278_v59 = vld [vmem:[#allocation7 + $0x3e0] sm:$0xff]  ;;  %v2275_v25 = vld [vmem:[#allocation7 + $0x3c8] sm:$0xff] }
 0x8f1   :  { %2608 = vmatprep.subr.bf16.mxu1 %v2168_v14  ;;  %2690 = vmatprep.subr.bf16.mxu0 %v2170_v61  ;;  %v2277_v14 = vld [vmem:[#allocation7 + $0x3d8] sm:$0xff] }
 0x8f2   :  { %2638 = vmatprep.mubr.bf16.mxu1 %v4418_v37  ;;  %2720 = vmatprep.mubr.bf16.mxu0 %v4418_v37  ;;  %v2285_v61 = vld [vmem:[#allocation7 + $0x418] sm:$0xff] }
 0x8f4   :  { %2609 = vmatpush1.bf16.msra.mxu1 %v2167_v15  ;;  %2691 = vmatpush1.bf16.msra.mxu0 %v2169_v18  ;;  %v2287_v15 = vld [vmem:[#allocation7 + $0x428] sm:$0xff]  ;;  %v2284_v18 = vld [vmem:[#allocation7 + $0x410] sm:$0xff] }
 0x8f5   :  { %2610 = vmatprep.subr.bf16.mxu1 %v2177_v34  ;;  %2692 = vmatprep.subr.bf16.mxu0 %v2179_v7  ;;  %v2286_v34 = vld [vmem:[#allocation7 + $0x420] sm:$0xff] }
 0x8f6   :  { %v2294_v7 = vld [vmem:[#allocation7 + $0x460] sm:$0xff] }
 0x8f8   :  { %2611 = vmatpush1.bf16.msra.mxu1 %v2176_v16  ;;  %2693 = vmatpush1.bf16.msra.mxu0 %v2178_v20  ;;  %v2296_v16 = vld [vmem:[#allocation7 + $0x470] sm:$0xff]  ;;  %v2293_v20 = vld [vmem:[#allocation7 + $0x458] sm:$0xff] }
 0x8f9   :  { %2612 = vmatprep.subr.bf16.mxu1 %v2186_v21  ;;  %2694 = vmatprep.subr.bf16.mxu0 %v2188_v56  ;;  %v2295_v21 = vld [vmem:[#allocation7 + $0x468] sm:$0xff] }
 0x8fa   :  { %v2303_v56 = vld [vmem:[#allocation7 + $0x4a8] sm:$0xff] }
 0x8fc   :  { %2613 = vmatpush1.bf16.msra.mxu1 %v2185_v47  ;;  %2695 = vmatpush1.bf16.msra.mxu0 %v2187_v23  ;;  %v2305_v47 = vld [vmem:[#allocation7 + $0x4b8] sm:$0xff]  ;;  %v2302_v23 = vld [vmem:[#allocation7 + $0x4a0] sm:$0xff] }
 0x8fd   :  { %2614 = vmatprep.subr.bf16.mxu1 %v2195_v26  ;;  %2696 = vmatprep.subr.bf16.mxu0 %v2197_v8  ;;  %v2304_v26 = vld [vmem:[#allocation7 + $0x4b0] sm:$0xff] }
 0x8fe   :  { %v2312_v8 = vld [vmem:[#allocation7 + $0x4f0] sm:$0xff] }
 0x900   :  { %2615 = vmatpush1.bf16.msra.mxu1 %v2194_v63  ;;  %2697 = vmatpush1.bf16.msra.mxu0 %v2196_v27  ;;  %v2314_v63 = vld [vmem:[#allocation7 + $0x500] sm:$0xff]  ;;  %v2311_v27 = vld [vmem:[#allocation7 + $0x4e8] sm:$0xff] }
 0x901   :  { %2616 = vmatprep.subr.bf16.mxu1 %v2204_v0  ;;  %2698 = vmatprep.subr.bf16.mxu0 %v2206_v28  ;;  %v2313_v0 = vld [vmem:[#allocation7 + $0x4f8] sm:$0xff] }
 0x902   :  { %v2321_v28 = vld [vmem:[#allocation7 + $0x538] sm:$0xff] }
 0x904   :  { %2617 = vmatpush1.bf16.msra.mxu1 %v2203_v30  ;;  %2699 = vmatpush1.bf16.msra.mxu0 %v2205_v31  ;;  %v2323_v30 = vld [vmem:[#allocation7 + $0x548] sm:$0xff]  ;;  %v2320_v31 = vld [vmem:[#allocation7 + $0x530] sm:$0xff] }
 0x905   :  { %2618 = vmatprep.subr.bf16.mxu1 %v2213_v33  ;;  %2700 = vmatprep.subr.bf16.mxu0 %v2215_v4  ;;  %v2322_v33 = vld [vmem:[#allocation7 + $0x540] sm:$0xff] }
 0x906   :  { %v2330_v4 = vld [vmem:[#allocation7 + $0x580] sm:$0xff] }
 0x908   :  { %2619 = vmatpush1.bf16.msra.mxu1 %v2212_v38  ;;  %2701 = vmatpush1.bf16.msra.mxu0 %v2214_v6  ;;  %v2332_v38 = vld [vmem:[#allocation7 + $0x590] sm:$0xff]  ;;  %v2329_v6 = vld [vmem:[#allocation7 + $0x578] sm:$0xff] }
 0x909   :  { %2620 = vmatprep.subr.bf16.mxu1 %v2222_v42  ;;  %2702 = vmatprep.subr.bf16.mxu0 %v2224_v43  ;;  %v2331_v42 = vld [vmem:[#allocation7 + $0x588] sm:$0xff] }
 0x90a   :  { %v2339_v43 = vld [vmem:[#allocation7 + $0x5c8] sm:$0xff] }
 0x90c   :  { %2621 = vmatpush1.bf16.msra.mxu1 %v2221_v44  ;;  %2703 = vmatpush1.bf16.msra.mxu0 %v2223_v46  ;;  %v2341_v44 = vld [vmem:[#allocation7 + $0x5d8] sm:$0xff]  ;;  %v2338_v46 = vld [vmem:[#allocation7 + $0x5c0] sm:$0xff] }
 0x90d   :  { %2622 = vmatprep.subr.bf16.mxu1 %v2231_v48  ;;  %2704 = vmatprep.subr.bf16.mxu0 %v2233_v29  ;;  %v2340_v48 = vld [vmem:[#allocation7 + $0x5d0] sm:$0xff] }
 0x90e   :  { %v2348_v29 = vld [vmem:[#allocation7 + $0x610] sm:$0xff] }
 0x910   :  { %2623 = vmatpush1.bf16.msra.mxu1 %v2230_v3  ;;  %2705 = vmatpush1.bf16.msra.mxu0 %v2232_v49  ;;  %v2350_v3 = vld [vmem:[#allocation7 + $0x620] sm:$0xff]  ;;  %v2347_v49 = vld [vmem:[#allocation7 + $0x608] sm:$0xff] }
 0x911   :  { %2624 = vmatprep.subr.bf16.mxu1 %v2240_v50  ;;  %2706 = vmatprep.subr.bf16.mxu0 %v2242_v54  ;;  %v2349_v50 = vld [vmem:[#allocation7 + $0x618] sm:$0xff] }
 0x912   :  { %v2357_v54 = vld [vmem:[#allocation7 + $0x658] sm:$0xff] }
 0x914   :  { %2625 = vmatpush1.bf16.msra.mxu1 %v2239_v55  ;;  %2707 = vmatpush1.bf16.msra.mxu0 %v2241_v58  ;;  %v2359_v55 = vld [vmem:[#allocation7 + $0x668] sm:$0xff]  ;;  %v2356_v58 = vld [vmem:[#allocation7 + $0x650] sm:$0xff] }
 0x915   :  { %2626 = vmatprep.subr.bf16.mxu1 %v2249_v10  ;;  %2708 = vmatprep.subr.bf16.mxu0 %v2251_v11  ;;  %v2358_v10 = vld [vmem:[#allocation7 + $0x660] sm:$0xff] }
 0x916   :  { %v2366_v11 = vld [vmem:[#allocation7 + $0x6a0] sm:$0xff] }
 0x918   :  { %2627 = vmatpush1.bf16.msra.mxu1 %v2248_v12  ;;  %2709 = vmatpush1.bf16.msra.mxu0 %v2250_v13  ;;  %v2368_v12 = vld [vmem:[#allocation7 + $0x6b0] sm:$0xff]  ;;  %v2365_v13 = vld [vmem:[#allocation7 + $0x698] sm:$0xff] }
 0x919   :  { %2628 = vmatprep.subr.bf16.mxu1 %v2258_v32  ;;  %2710 = vmatprep.subr.bf16.mxu0 %v2260_v19  ;;  %v2367_v32 = vld [vmem:[#allocation7 + $0x6a8] sm:$0xff] }
 0x91a   :  { %v2375_v19 = vld [vmem:[#allocation7 + $0x6e8] sm:$0xff] }
 0x91c   :  { %2629 = vmatpush1.bf16.msra.mxu1 %v2257_v22  ;;  %2711 = vmatpush1.bf16.msra.mxu0 %v2259_v62  ;;  %v2377_v22 = vld [vmem:[#allocation7 + $0x6f8] sm:$0xff]  ;;  %v2374_v62 = vld [vmem:[#allocation7 + $0x6e0] sm:$0xff] }
 0x91d   :  { %2630 = vmatprep.subr.bf16.mxu1 %v2267_v35  ;;  %2712 = vmatprep.subr.bf16.mxu0 %v2269_v2  ;;  %v2376_v35 = vld [vmem:[#allocation7 + $0x6f0] sm:$0xff] }
 0x91e   :  { %v2384_v2 = vld [vmem:[#allocation7 + $0x730] sm:$0xff] }
 0x920   :  { %2631 = vmatpush1.bf16.msra.mxu1 %v2266_v1  ;;  %2713 = vmatpush1.bf16.msra.mxu0 %v2268_v57  ;;  %v2386_v1 = vld [vmem:[#allocation7 + $0x740] sm:$0xff]  ;;  %v2383_v57 = vld [vmem:[#allocation7 + $0x728] sm:$0xff] }
 0x921   :  { %2632 = vmatprep.subr.bf16.mxu1 %v2276_v24  ;;  %2714 = vmatprep.subr.bf16.mxu0 %v2278_v59  ;;  %v2385_v24 = vld [vmem:[#allocation7 + $0x738] sm:$0xff] }
 0x922   :  { %v2393_v59 = vld [vmem:[#allocation7 + $0x778] sm:$0xff] }
 0x924   :  { %2633 = vmatpush1.bf16.msra.mxu1 %v2275_v25  ;;  %2715 = vmatpush1.bf16.msra.mxu0 %v2277_v14  ;;  %v2395_v25 = vld [vmem:[#allocation7 + $0x788] sm:$0xff]  ;;  %v2392_v14 = vld [vmem:[#allocation7 + $0x770] sm:$0xff] }
 0x925   :  { %2634 = vmatprep.subr.bf16.mxu1 %v2285_v61  ;;  %2716 = vmatprep.subr.bf16.mxu0 %v2287_v15  ;;  %v2394_v61 = vld [vmem:[#allocation7 + $0x780] sm:$0xff] }
 0x926   :  { %v2402_v15 = vld [vmem:[#allocation7 + $0x7c0] sm:$0xff] }
 0x928   :  { %2635 = vmatpush1.bf16.msra.mxu1 %v2284_v18  ;;  %2717 = vmatpush1.bf16.msra.mxu0 %v2286_v34  ;;  %v2404_v18 = vld [vmem:[#allocation7 + $0x7d0] sm:$0xff]  ;;  %v2401_v34 = vld [vmem:[#allocation7 + $0x7b8] sm:$0xff] }
 0x929   :  { %2636 = vmatprep.subr.bf16.mxu1 %v2294_v7  ;;  %2718 = vmatprep.subr.bf16.mxu0 %v2296_v16  ;;  %v2403_v7 = vld [vmem:[#allocation7 + $0x7c8] sm:$0xff] }
 0x92a   :  { %v2411_v16 = vld [vmem:[#allocation7 + $0x808] sm:$0xff] }
 0x92c   :  { %2637 = vmatpush1.bf16.msra.mxu1 %v2293_v20  ;;  %2719 = vmatpush1.bf16.msra.mxu0 %v2295_v21  ;;  %v2413_v20 = vld [vmem:[#allocation7 + $0x818] sm:$0xff]  ;;  %v2410_v21 = vld [vmem:[#allocation7 + $0x800] sm:$0xff] }
 0x92d   :  { %2647 = vmatprep.subr.bf16.mxu1 %v2303_v56  ;;  %2729 = vmatprep.subr.bf16.mxu0 %v2305_v47  ;;  %v2412_v56 = vld [vmem:[#allocation7 + $0x810] sm:$0xff] }
 0x92e   :  { %v2420_v47 = vld [vmem:[#allocation7 + $0x850] sm:$0xff] }
 0x92f   :  { %2639 = vmatmul.mubr.bf16.vlgmr.msra.gmra.mrb[20].mxu1 %v4424_v60  ;;  %2721 = vmatmul.mubr.bf16.vlgmr.msra.gmra.mrb[16].mxu0 %v4424_v60 }
 0x930   :  { %2648 = vmatpush1.bf16.msra.mxu1 %v2302_v23  ;;  %2730 = vmatpush1.bf16.msra.mxu0 %v2304_v26  ;;  %v2422_v23 = vld [vmem:[#allocation7 + $0x860] sm:$0xff]  ;;  %v2419_v26 = vld [vmem:[#allocation7 + $0x848] sm:$0xff] }
 0x931   :  { %2649 = vmatprep.subr.bf16.mxu1 %v2312_v8  ;;  %2731 = vmatprep.subr.bf16.mxu0 %v2314_v63  ;;  %v2421_v8 = vld [vmem:[#allocation7 + $0x858] sm:$0xff] }
 0x932   :  { %2679 = vmatprep.mubr.bf16.mxu1 %v4428_v17  ;;  %2761 = vmatprep.mubr.bf16.mxu0 %v4428_v17  ;;  %v2429_v63 = vld [vmem:[#allocation7 + $0x898] sm:$0xff] }
 0x934   :  { %2650 = vmatpush1.bf16.msra.mxu1 %v2311_v27  ;;  %2732 = vmatpush1.bf16.msra.mxu0 %v2313_v0  ;;  %v2431_v27 = vld [vmem:[#allocation7 + $0x8a8] sm:$0xff]  ;;  %v2428_v0 = vld [vmem:[#allocation7 + $0x890] sm:$0xff] }
 0x935   :  { %2651 = vmatprep.subr.bf16.mxu1 %v2321_v28  ;;  %2733 = vmatprep.subr.bf16.mxu0 %v2323_v30  ;;  %v2430_v28 = vld [vmem:[#allocation7 + $0x8a0] sm:$0xff] }
 0x936   :  { %v2438_v30 = vld [vmem:[#allocation7 + $0x8e0] sm:$0xff] }
 0x938   :  { %2652 = vmatpush1.bf16.msra.mxu1 %v2320_v31  ;;  %2734 = vmatpush1.bf16.msra.mxu0 %v2322_v33  ;;  %v2440_v31 = vld [vmem:[#allocation7 + $0x8f0] sm:$0xff]  ;;  %v2437_v33 = vld [vmem:[#allocation7 + $0x8d8] sm:$0xff] }
 0x939   :  { %2653 = vmatprep.subr.bf16.mxu1 %v2330_v4  ;;  %2735 = vmatprep.subr.bf16.mxu0 %v2332_v38  ;;  %v2439_v4 = vld [vmem:[#allocation7 + $0x8e8] sm:$0xff]  ;;  %v2234_v38 = vld [vmem:[#allocation7 + $0x280] sm:$0xff] }
 0x93c   :  { %2654 = vmatpush1.bf16.msra.mxu1 %v2329_v6  ;;  %2736 = vmatpush1.bf16.msra.mxu0 %v2331_v42  ;;  %v2162_v6 = vld [vmem:[#allocation7 + $0x40] sm:$0xff]  ;;  %v2243_v42 = vld [vmem:[#allocation7 + $0x2c8] sm:$0xff] }
 0x93d   :  { %2655 = vmatprep.subr.bf16.mxu1 %v2339_v43  ;;  %2737 = vmatprep.subr.bf16.mxu0 %v2341_v44  ;;  %v2171_v43 = vld [vmem:[#allocation7 + $0x88] sm:$0xff]  ;;  %v2252_v44 = vld [vmem:[#allocation7 + $0x310] sm:$0xff] }
 0x940   :  { %2656 = vmatpush1.bf16.msra.mxu1 %v2338_v46  ;;  %2738 = vmatpush1.bf16.msra.mxu0 %v2340_v48  ;;  %v2180_v46 = vld [vmem:[#allocation7 + $0xd0] sm:$0xff]  ;;  %v2261_v48 = vld [vmem:[#allocation7 + $0x358] sm:$0xff] }
 0x941   :  { %2657 = vmatprep.subr.bf16.mxu1 %v2348_v29  ;;  %2739 = vmatprep.subr.bf16.mxu0 %v2350_v3  ;;  %v2189_v29 = vld [vmem:[#allocation7 + $0x118] sm:$0xff]  ;;  %v2270_v3 = vld [vmem:[#allocation7 + $0x3a0] sm:$0xff] }
 0x944   :  { %2658 = vmatpush1.bf16.msra.mxu1 %v2347_v49  ;;  %2740 = vmatpush1.bf16.msra.mxu0 %v2349_v50  ;;  %v2198_v49 = vld [vmem:[#allocation7 + $0x160] sm:$0xff]  ;;  %v2279_v50 = vld [vmem:[#allocation7 + $0x3e8] sm:$0xff] }
 0x945   :  { %2659 = vmatprep.subr.bf16.mxu1 %v2357_v54  ;;  %2741 = vmatprep.subr.bf16.mxu0 %v2359_v55  ;;  %v2207_v54 = vld [vmem:[#allocation7 + $0x1a8] sm:$0xff]  ;;  %v2288_v55 = vld [vmem:[#allocation7 + $0x430] sm:$0xff] }
 0x948   :  { %2660 = vmatpush1.bf16.msra.mxu1 %v2356_v58  ;;  %2742 = vmatpush1.bf16.msra.mxu0 %v2358_v10  ;;  %v2297_v58 = vld [vmem:[#allocation7 + $0x478] sm:$0xff] }
 0x949   :  { %2661 = vmatprep.subr.bf16.mxu1 %v2366_v11  ;;  %2743 = vmatprep.subr.bf16.mxu0 %v2368_v12  ;;  %v2225_v10 = vld [vmem:[#allocation7 + $0x238] sm:$0xff]  ;;  %v2378_v11 = vld [vmem:[#allocation7 + $0x700] sm:$0xff] }
 0x94a   :  { %v2306_v12 = vld [vmem:[#allocation7 + $0x4c0] sm:$0xff] }
 0x94c   :  { %2662 = vmatpush1.bf16.msra.mxu1 %v2365_v13  ;;  %2744 = vmatpush1.bf16.msra.mxu0 %v2367_v32  ;;  %v2387_v13 = vld [vmem:[#allocation7 + $0x748] sm:$0xff] }
 0x94d   :  { %2663 = vmatprep.subr.bf16.mxu1 %v2375_v19  ;;  %2745 = vmatprep.subr.bf16.mxu0 %v2377_v22  ;;  %v2315_v32 = vld [vmem:[#allocation7 + $0x508] sm:$0xff]  ;;  %v2396_v19 = vld [vmem:[#allocation7 + $0x790] sm:$0xff] }
 0x94e   :  { %v2324_v22 = vld [vmem:[#allocation7 + $0x550] sm:$0xff] }
 0x950   :  { %2664 = vmatpush1.bf16.msra.mxu1 %v2374_v62  ;;  %2746 = vmatpush1.bf16.msra.mxu0 %v2376_v35  ;;  %v2405_v62 = vld [vmem:[#allocation7 + $0x7d8] sm:$0xff] }
 0x951   :  { %2665 = vmatprep.subr.bf16.mxu1 %v2384_v2  ;;  %2747 = vmatprep.subr.bf16.mxu0 %v2386_v1  ;;  %v2333_v35 = vld [vmem:[#allocation7 + $0x598] sm:$0xff]  ;;  %v2414_v2 = vld [vmem:[#allocation7 + $0x820] sm:$0xff] }
 0x952   :  { %v2342_v1 = vld [vmem:[#allocation7 + $0x5e0] sm:$0xff] }
 0x954   :  { %2666 = vmatpush1.bf16.msra.mxu1 %v2383_v57  ;;  %2748 = vmatpush1.bf16.msra.mxu0 %v2385_v24  ;;  %v2423_v57 = vld [vmem:[#allocation7 + $0x868] sm:$0xff]  ;;  %v2432_v24 = vld [vmem:[#allocation7 + $0x8b0] sm:$0xff] }
 0x955   :  { %2667 = vmatprep.subr.bf16.mxu1 %v2393_v59  ;;  %2749 = vmatprep.subr.bf16.mxu0 %v2395_v25  ;;  %v2441_v59 = vld [vmem:[#allocation7 + $0x8f8] sm:$0xff] }
 0x956   :  { %v2369_v25 = vld [vmem:[#allocation7 + $0x6b8] sm:$0xff] }
 0x958   :  { %2668 = vmatpush1.bf16.msra.mxu1 %v2392_v14  ;;  %2750 = vmatpush1.bf16.msra.mxu0 %v2394_v61 }
 0x959   :  { %2669 = vmatprep.subr.bf16.mxu1 %v2402_v15  ;;  %2751 = vmatprep.subr.bf16.mxu0 %v2404_v18 }
 0x95c   :  { %2670 = vmatpush1.bf16.msra.mxu1 %v2401_v34  ;;  %2752 = vmatpush1.bf16.msra.mxu0 %v2403_v7 }
 0x95d   :  { %2671 = vmatprep.subr.bf16.mxu1 %v2411_v16  ;;  %2753 = vmatprep.subr.bf16.mxu0 %v2413_v20 }
 0x960   :  { %2672 = vmatpush1.bf16.msra.mxu1 %v2410_v21  ;;  %2754 = vmatpush1.bf16.msra.mxu0 %v2412_v56 }
 0x961   :  { %2673 = vmatprep.subr.bf16.mxu1 %v2420_v47  ;;  %2755 = vmatprep.subr.bf16.mxu0 %v2422_v23 }
 0x964   :  { %2674 = vmatpush1.bf16.msra.mxu1 %v2419_v26  ;;  %2756 = vmatpush1.bf16.msra.mxu0 %v2421_v8 }
 0x965   :  { %2675 = vmatprep.subr.bf16.mxu1 %v2429_v63  ;;  %2757 = vmatprep.subr.bf16.mxu0 %v2431_v27 }
 0x968   :  { %2676 = vmatpush1.bf16.msra.mxu1 %v2428_v0  ;;  %2758 = vmatpush1.bf16.msra.mxu0 %v2430_v28 }
 0x969   :  { %2677 = vmatprep.subr.bf16.mxu1 %v2438_v30  ;;  %2759 = vmatprep.subr.bf16.mxu0 %v2440_v31 }
 0x96c   :  { %2678 = vmatpush1.bf16.msra.mxu1 %v2437_v33  ;;  %2760 = vmatpush1.bf16.msra.mxu0 %v2439_v4 }
 0x96d   :  { %3452 = vmatprep.subr.bf16.mxu1 %v2234_v38 }
 0x96f   :  { %2680 = vmatmul.mubr.bf16.vlgmr.msra.gmra.mrb[20].mxu1 %v4436_v9  ;;  %2762 = vmatmul.mubr.bf16.vlgmr.msra.gmra.mrb[16].mxu0 %v4436_v9 }
 0x970   :  { %3453 = vmatpush3.bf16.msra.mxu1 %v2162_v6  ;;  %2802 = vmatprep.mubr.bf16.mxu1 %v4418_v37  ;;  %v2216_v37 = vld [vmem:[#allocation7 + $0x1f0] sm:$0xff] }
 0x971   :  { %3454 = vmatprep.subr.bf16.mxu1 %v2243_v42 }
 0x974   :  { %3455 = vmatpush3.bf16.msra.mxu1 %v2171_v43 }
 0x975   :  { %3456 = vmatprep.subr.bf16.mxu1 %v2252_v44 }
 0x978   :  { %3457 = vmatpush3.bf16.msra.mxu1 %v2180_v46 }
 0x979   :  { %3458 = vmatprep.subr.bf16.mxu1 %v2261_v48 }
 0x97c   :  { %3459 = vmatpush3.bf16.msra.mxu1 %v2189_v29 }
 0x97d   :  { %3460 = vmatprep.subr.bf16.mxu1 %v2270_v3 }
 0x980   :  { %3461 = vmatpush3.bf16.msra.mxu1 %v2198_v49 }
 0x981   :  { %3462 = vmatprep.subr.bf16.mxu1 %v2279_v50 }
 0x984   :  { %3463 = vmatpush3.bf16.msra.mxu1 %v2207_v54 }
 0x985   :  { %3464 = vmatprep.subr.bf16.mxu1 %v2288_v55 }
 0x988   :  { %3465 = vmatpush3.bf16.msra.mxu1 %v2216_v37 }
 0x989   :  { %3466 = vmatprep.subr.bf16.mxu1 %v2297_v58 }
 0x98c   :  { %3467 = vmatpush3.bf16.msra.mxu1 %v2225_v10 }
 0x98d   :  { %3474 = vmatprep.subr.bf16.mxu1 %v2378_v11 }
 0x98f   :  { %2803 = vmatmul.mubr.bf16.vlgmr.msra.gmra.mrb[24].mxu1 %v4424_v60  ;;  %v2351_v60 = vld [vmem:[#allocation7 + $0x628] sm:$0xff] }
 0x990   :  { %3475 = vmatpush3.bf16.msra.mxu1 %v2306_v12  ;;  %2842 = vmatprep.mubr.bf16.mxu1 %v4428_v17  ;;  %v2360_v17 = vld [vmem:[#allocation7 + $0x670] sm:$0xff] }
 0x991   :  { %3476 = vmatprep.subr.bf16.mxu1 %v2387_v13 }
 0x994   :  { %3477 = vmatpush3.bf16.msra.mxu1 %v2315_v32 }
 0x995   :  { %3478 = vmatprep.subr.bf16.mxu1 %v2396_v19 }
 0x998   :  { %3479 = vmatpush3.bf16.msra.mxu1 %v2324_v22 }
 0x999   :  { %3480 = vmatprep.subr.bf16.mxu1 %v2405_v62 }
 0x99c   :  { %3481 = vmatpush3.bf16.msra.mxu1 %v2333_v35 }
 0x99d   :  { %3482 = vmatprep.subr.bf16.mxu1 %v2414_v2 }
 0x9a0   :  { %3483 = vmatpush3.bf16.msra.mxu1 %v2342_v1 }
 0x9a1   :  { %3484 = vmatprep.subr.bf16.mxu1 %v2423_v57 }
 0x9a4   :  { %3485 = vmatpush3.bf16.msra.mxu1 %v2351_v60 }
 0x9a5   :  { %3486 = vmatprep.subr.bf16.mxu1 %v2432_v24 }
 0x9a8   :  { %3487 = vmatpush3.bf16.msra.mxu1 %v2360_v17 }
 0x9a9   :  { %3488 = vmatprep.subr.bf16.mxu1 %v2441_v59 }
 0x9ac   :  { %3489 = vmatpush3.bf16.msra.mxu1 %v2369_v25 }
 0x9af   :  { %2843 = vmatmul.mubr.bf16.vlgmr.msra.gmra.mrb[28].mxu1 %v4436_v9 }
 0x9c2   :  { %v4452_v14 = vpop.f32.mrb[16].mxu1  ;;  %v4454_v61 = vpop.f32.mrb[12].mxu0 }
 0x9c3   :  { %v2853_v15 = vrot.slane %v4452_v14, 4  ;;  %v2916_v18 = vmul.f32 %v4452_v14, %v4452_v14  ;;  %v2865_v34 = vrot.slane %v4454_v61, 4  ;;  %v2918_v7 = vmul.f32 %v4454_v61, %v4454_v61  ;;  %v4462_v16 = vpop.f32.mrb[17].mxu1  ;;  %v4464_v20 = vpop.f32.mrb[13].mxu0 }
 0x9c4   :  { %v2859_v9 = vrot.slane %v4462_v16, 4  ;;  %v2917_v21 = vmul.f32 %v4462_v16, %v4462_v16  ;;  %v2871_v56 = vrot.slane %v4464_v20, 4  ;;  %v2919_v47 = vmul.f32 %v4464_v20, %v4464_v20  ;;  %v2521_v23 = vpop.f32.mrb[18].mxu1  ;;  %v2603_v26 = vpop.f32.mrb[14].mxu0 }
 0x9c5   :  { %v2854_v8 = vadd.f32 %v2853_v15, %v4452_v14  ;;  %v2925_v63 = vrot.slane %v2916_v18, 4  ;;  %v2866_v27 = vadd.f32 %v2865_v34, %v4454_v61  ;;  %v2937_v0 = vrot.slane %v2918_v7, 4  ;;  %v2522_v28 = vpop.f32.mrb[19].mxu1  ;;  %v2604_v30 = vpop.f32.mrb[15].mxu0 }
 0x9c6   :  { %v2860_v31 = vadd.f32 %v2859_v9, %v4462_v16  ;;  %v2931_v33 = vrot.slane %v2917_v21, 4  ;;  %v2872_v4 = vadd.f32 %v2871_v56, %v4464_v20  ;;  %v2943_v38 = vrot.slane %v2919_v47, 4 }
 0x9c7   :  { %v2855_v6 = vrot.slane %v2854_v8, 2  ;;  %v2926_v42 = vadd.f32 %v2925_v63, %v2916_v18  ;;  %v2867_v43 = vrot.slane %v2866_v27, 2  ;;  %v2938_v44 = vadd.f32 %v2937_v0, %v2918_v7 }
 0x9c8   :  { %v2861_v46 = vrot.slane %v2860_v31, 2  ;;  %v2932_v48 = vadd.f32 %v2931_v33, %v2917_v21  ;;  %v2873_v29 = vrot.slane %v2872_v4, 2  ;;  %v2944_v3 = vadd.f32 %v2943_v38, %v2919_v47 }
 0x9c9   :  { %v2856_v49 = vadd.f32 %v2855_v6, %v2854_v8  ;;  %v2927_v50 = vrot.slane %v2926_v42, 2  ;;  %v2868_v54 = vadd.f32 %v2867_v43, %v2866_v27  ;;  %v2939_v55 = vrot.slane %v2938_v44, 2 }
 0x9ca   :  { %v2862_v37 = vadd.f32 %v2861_v46, %v2860_v31  ;;  %v2933_v58 = vrot.slane %v2932_v48, 2  ;;  %v2874_v10 = vadd.f32 %v2873_v29, %v2872_v4  ;;  %v2945_v11 = vrot.slane %v2944_v3, 2 }
 0x9cb   :  { %v2857_v12 = vrot.slane %v2856_v49, 1  ;;  %v2928_v13 = vadd.f32 %v2927_v50, %v2926_v42  ;;  %v2869_v32 = vrot.slane %v2868_v54, 1  ;;  %v2940_v19 = vadd.f32 %v2939_v55, %v2938_v44 }
 0x9cc   :  { %v2863_v22 = vrot.slane %v2862_v37, 1  ;;  %v2934_v62 = vadd.f32 %v2933_v58, %v2932_v48  ;;  %v2875_v35 = vrot.slane %v2874_v10, 1  ;;  %v2946_v2 = vadd.f32 %v2945_v11, %v2944_v3 }
 0x9cd   :  { %v2858_v1 = vadd.f32 %v2857_v12, %v2856_v49  ;;  %v2929_v57 = vrot.slane %v2928_v13, 1  ;;  %v2870_v60 = vadd.f32 %v2869_v32, %v2868_v54  ;;  %v2941_v24 = vrot.slane %v2940_v19, 1  ;;  %v2850_v12 = vld [vmem:[#allocation21] sm:$0xff] }
 0x9ce   :  { %v2864_v17 = vadd.f32 %v2863_v22, %v2862_v37  ;;  %v2935_v59 = vrot.slane %v2934_v62, 1  ;;  %v2876_v25 = vadd.f32 %v2875_v35, %v2874_v10  ;;  %v2947_v15 = vrot.slane %v2946_v2, 1 }
 0x9cf   :  { %v4476_v18 = vmul.f32 0.125, %v2858_v1  ;;  %v2930_v34 = vadd.f32 %v2929_v57, %v2928_v13  ;;  %v4478_v7 = vmul.f32 0.125, %v2870_v60  ;;  %v2942_v9 = vadd.f32 %v2941_v24, %v2940_v19 }
 0x9d0   :  { %v2908_v21 = vmul.f32 0.125, %v2864_v17  ;;  %v2936_v56 = vadd.f32 %v2935_v59, %v2934_v62  ;;  %v2910_v47 = vmul.f32 0.125, %v2876_v25  ;;  %v2948_v23 = vadd.f32 %v2947_v15, %v2946_v2 }
 0x9d1   :  { %v2979_v26 = vmul.f32 0.125, %v2930_v34  ;;  %v2988_v8 = vmul.f32 %v4476_v18, %v4476_v18  ;;  %v2981_v63 = vmul.f32 0.125, %v2942_v9  ;;  %v2990_v27 = vmul.f32 %v4478_v7, %v4478_v7 }
 0x9d2   :  { %v2980_v0 = vmul.f32 0.125, %v2936_v56  ;;  %v2989_v28 = vmul.f32 %v2908_v21, %v2908_v21  ;;  %v2982_v31 = vmul.f32 0.125, %v2948_v23  ;;  %v2991_v33 = vmul.f32 %v2910_v47, %v2910_v47 }
 0x9d3   :  { %v2997_v30 = vsub.f32 %v2979_v26, %v2988_v8  ;;  %v2999_v4 = vsub.f32 %v2981_v63, %v2990_v27  ;;  %v3197_v32 = vrot.slane %v2850_v12, %v4277_v5  ;;  %v3201_v19 = vrot.slane %v2850_v12, %v4279_v39 }
 0x9d4   :  { %v2998_v38 = vsub.f32 %v2980_v0, %v2989_v28  ;;  %v3000_v42 = vsub.f32 %v2982_v31, %v2991_v33  ;;  %v3205_v22 = vrot.slane %v2850_v12, %v4281_v40  ;;  %v3209_v62 = vrot.slane %v2850_v12, %v4283_v41 }
 0x9d5   :  { %v3006_v6 = vmax.f32 %v2997_v30, 0.0  ;;  %v3008_v43 = vmax.f32 %v2999_v4, 0.0  ;;  %v3242_v1 = vrot.slane %v3197_v32, %v4277_v5  ;;  %v3246_v57 = vrot.slane %v3201_v19, %v4277_v5 }
 0x9d6   :  { %v3007_v44 = vmax.f32 %v2998_v38, 0.0  ;;  %v3009_v48 = vmax.f32 %v3000_v42, 0.0  ;;  %v3250_v60 = vrot.slane %v3205_v22, %v4277_v5  ;;  %v3254_v24 = vrot.slane %v3209_v62, %v4277_v5 }
 0x9d7   :  { %v3015_v46 = vadd.f32 1e-05, %v3006_v6  ;;  %v3017_v29 = vadd.f32 1e-05, %v3008_v43  ;;  %v3089_v34 = vsub.f32 %v4452_v14, %v4476_v18  ;;  %v3091_v9 = vsub.f32 %v4454_v61, %v4478_v7 }
 0x9d8   :  { %v3016_v3 = vadd.f32 1e-05, %v3007_v44  ;;  %v3018_v49 = vadd.f32 1e-05, %v3009_v48  ;;  %v3090_v56 = vsub.f32 %v4462_v16, %v2908_v21  ;;  %v3092_v23 = vsub.f32 %v4464_v20, %v2910_v47 }
 0x9d9   :  { %3639 = vrsqrt.f32 %v3015_v46  ;;  %v4508_v7 = vstv %s3423_s19 }
 0x9da   :  { %3641 = vrsqrt.f32 %v3017_v29 }
 0x9db   :  { %3643 = vrsqrt.f32 %v3016_v3 }
 0x9dc   :  { %3645 = vrsqrt.f32 %v3018_v49 }
 0x9e3   :  { %v3640_v50 = vpop.eup %3639 }
 0x9e4   :  { %v3642_v54 = vpop.eup %3641 }
 0x9e5   :  { %v3644_v55 = vpop.eup %3643 }
 0x9e6   :  { %v3646_v37 = vpop.eup %3645  ;;  %v3042_v58 = vcombine.low %v3640_v50, %v3644_v55 }
 0x9e7   :  { %v3043_v10 = vcombine.low %v3642_v54, %v3646_v37 }
 0x9e8   :  { %v3050_v11 = vrot.slane %v3042_v58, %v4275_v36 }
 0x9e9   :  { %v3057_v13 = vrot.slane %v3043_v10, %v4275_v36 }
 0x9eb   :  { %v3058_v35 = vcombine.low %v3050_v11, %v3057_v13 }
 0x9ed   :  { %v3086_v2 = vmul.f32 %v3058_v35, %v2850_v12 }
 0x9ef   :  { %v3104_v17 = vrot.slane %v3086_v2, %v4287_v45  ;;  %v3108_v59 = vrot.slane %v3086_v2, %v4293_v51  ;;  %v3112_v25 = vrot.slane %v3086_v2, %v4295_v52  ;;  %v3116_v15 = vrot.slane %v3086_v2, %v4297_v53 }
 0x9f1   :  { %v3149_v26 = vrot.slane %v3104_v17, %v4287_v45  ;;  %v3153_v8 = vrot.slane %v3108_v59, %v4287_v45  ;;  %v3157_v63 = vrot.slane %v3112_v25, %v4287_v45  ;;  %v3161_v27 = vrot.slane %v3116_v15, %v4287_v45 }
 0x9f3   :  { %v3182_v0 = vmul.f32 %v3149_v26, %v3089_v34  ;;  %v3183_v28 = vmul.f32 %v3153_v8, %v3090_v56  ;;  %v3184_v30 = vmul.f32 %v3157_v63, %v3091_v9  ;;  %v3185_v31 = vmul.f32 %v3161_v27, %v3092_v23 }
 0x9f5   :  { %v3275_v14 = vadd.f32 %v3242_v1, %v3182_v0  ;;  %v3276_v18 = vadd.f32 %v3246_v57, %v3183_v28  ;;  %v3277_v33 = vadd.f32 %v3250_v60, %v3184_v30  ;;  %v3278_v61 = vadd.f32 %v3254_v24, %v3185_v31 }
 0x9f7   :  { %v3294_v16 = vmin.f32 %v3275_v14, 0.0  ;;  %v3295_v20 = vmin.f32 %v3276_v18, 0.0  ;;  %v3296_v21 = vmin.f32 %v3277_v33, 0.0  ;;  %v3297_v47 = vmin.f32 %v3278_v61, 0.0 }
 0x9f8   :  { %v3285_v4 = vmax.f32 %v3275_v14, 0.0  ;;  %v3286_v38 = vmax.f32 %v3276_v18, 0.0  ;;  %v3287_v6 = vmax.f32 %v3277_v33, 0.0  ;;  %v3288_v42 = vmax.f32 %v3278_v61, 0.0 }
 0x9f9   :  { %v3304_v43 = vmul.f32 %v4508_v7, %v3294_v16  ;;  %v3305_v44 = vmul.f32 %v4508_v7, %v3295_v20  ;;  %v3306_v46 = vmul.f32 %v4508_v7, %v3296_v21  ;;  %v3307_v48 = vmul.f32 %v4508_v7, %v3297_v47 }
 0x9fb   :  { %v3313_v29 = vadd.f32 %v3304_v43, %v3285_v4  ;;  %v3314_v3 = vadd.f32 %v3305_v44, %v3286_v38  ;;  %v3315_v49 = vadd.f32 %v3306_v46, %v3287_v6  ;;  %v3316_v50 = vadd.f32 %v3307_v48, %v3288_v42 }
 0x9fd   :  { %3325 = vst [vmem:[#allocation24 + $0x18] sm:$0xff] %v3316_v50  ;;  %3322 = vst [vmem:[#allocation24] sm:$0xff] %v3313_v29 }
 0x9fe   :  { %3323 = vst [vmem:[#allocation24 + $0x8] sm:$0xff] %v3314_v3  ;;  %3324 = vst [vmem:[#allocation24 + $0x10] sm:$0xff] %v3315_v49 }
 0x9ff   :  { %3854 = shalt.err (!%p3851_p1)
}
 0xa00   :  { %s3855_s5 = scalar_lea.hbm %s4631_s14, 128 }
 0xa01   :  { %p3856_p2 = scmp.ne.s32.totalorder %s4631_s14, %s3855_s5  ;;  %p3859_p3 = scmp.lt.u32.totalorder %s3855_s5, %s4631_s14 }
 0xa03   :  { %p3861_p4 = pnand %p3859_p3, %p3856_p2 }
 0xa05   :  { %3864 = shalt.err (!%p3861_p4)
}
 0xa06   :  { %3340 = dma.vmem_to_hbm [thread:$0]  %s3338_s30, 128, %s4631_s14, [#allocation11]  }
 0xa07   :  { %s3949_s14 = smov [#allocation24]  }
 0xa08   :  { %s3347_s21 = sshll.u32 %s3949_s14, 4  ;;  %s3348_s21 = int_to_ptr.vmem [resolvable:$true] %s3347_s21 }
 0xa09   :  { %s3865_s10 = scalar_lea.vmem %s3348_s21, 1152  ;;  %p3870_p6 = scmp.lt.s32.totalorder %s3348_s21, %s3348_s21 }
 0xa0a   :  { %p3866_p5 = scmp.ne.s32.totalorder %s3348_s21, %s3865_s10  ;;  %p3871_p7 = scmp.lt.s32.totalorder %s3865_s10, %s3865_s10 }
 0xa0c   :  { %p3872_p8 = por %p3871_p7, %p3870_p6 }
 0xa0e   :  { %p3873_p9 = pnand %p3872_p8, %p3866_p5 }
 0xa42   :  { %v4526_v54 = vpop.f32.mrb[20].mxu1  ;;  %v4528_v55 = vpop.f32.mrb[16].mxu0 }
 0xa43   :  { %v2877_v37 = vrot.slane %v4526_v54, 4  ;;  %v2920_v58 = vmul.f32 %v4526_v54, %v4526_v54  ;;  %v2889_v10 = vrot.slane %v4528_v55, 4  ;;  %v2922_v11 = vmul.f32 %v4528_v55, %v4528_v55  ;;  %v4536_v12 = vpop.f32.mrb[21].mxu1  ;;  %v4538_v13 = vpop.f32.mrb[17].mxu0 }
 0xa44   :  { %v2883_v32 = vrot.slane %v4536_v12, 4  ;;  %v2921_v19 = vmul.f32 %v4536_v12, %v4536_v12  ;;  %v2895_v22 = vrot.slane %v4538_v13, 4  ;;  %v2923_v62 = vmul.f32 %v4538_v13, %v4538_v13  ;;  %v2685_v35 = vpop.f32.mrb[22].mxu1  ;;  %v2767_v2 = vpop.f32.mrb[18].mxu0 }
 0xa45   :  { %v2878_v1 = vadd.f32 %v2877_v37, %v4526_v54  ;;  %v2949_v57 = vrot.slane %v2920_v58, 4  ;;  %v2890_v60 = vadd.f32 %v2889_v10, %v4528_v55  ;;  %v2961_v24 = vrot.slane %v2922_v11, 4  ;;  %v2686_v17 = vpop.f32.mrb[23].mxu1  ;;  %v2768_v59 = vpop.f32.mrb[19].mxu0 }
 0xa46   :  { %v2884_v25 = vadd.f32 %v2883_v32, %v4536_v12  ;;  %v2955_v15 = vrot.slane %v2921_v19, 4  ;;  %v2896_v34 = vadd.f32 %v2895_v22, %v4538_v13  ;;  %v2967_v9 = vrot.slane %v2923_v62, 4 }
 0xa47   :  { %v2879_v56 = vrot.slane %v2878_v1, 2  ;;  %v2950_v23 = vadd.f32 %v2949_v57, %v2920_v58  ;;  %v2891_v26 = vrot.slane %v2890_v60, 2  ;;  %v2962_v8 = vadd.f32 %v2961_v24, %v2922_v11 }
 0xa48   :  { %v2885_v63 = vrot.slane %v2884_v25, 2  ;;  %v2956_v27 = vadd.f32 %v2955_v15, %v2921_v19  ;;  %v2897_v0 = vrot.slane %v2896_v34, 2  ;;  %v2968_v28 = vadd.f32 %v2967_v9, %v2923_v62 }
 0xa49   :  { %v2880_v30 = vadd.f32 %v2879_v56, %v2878_v1  ;;  %v2951_v31 = vrot.slane %v2950_v23, 2  ;;  %v2892_v14 = vadd.f32 %v2891_v26, %v2890_v60  ;;  %v2963_v18 = vrot.slane %v2962_v8, 2 }
 0xa4a   :  { %v2886_v33 = vadd.f32 %v2885_v63, %v2884_v25  ;;  %v2957_v61 = vrot.slane %v2956_v27, 2  ;;  %v2898_v16 = vadd.f32 %v2897_v0, %v2896_v34  ;;  %v2969_v20 = vrot.slane %v2968_v28, 2 }
 0xa4b   :  { %v2881_v21 = vrot.slane %v2880_v30, 1  ;;  %v2952_v47 = vadd.f32 %v2951_v31, %v2950_v23  ;;  %v2893_v4 = vrot.slane %v2892_v14, 1  ;;  %v2964_v38 = vadd.f32 %v2963_v18, %v2962_v8 }
 0xa4c   :  { %v2887_v6 = vrot.slane %v2886_v33, 1  ;;  %v2958_v42 = vadd.f32 %v2957_v61, %v2956_v27  ;;  %v2899_v43 = vrot.slane %v2898_v16, 1  ;;  %v2970_v44 = vadd.f32 %v2969_v20, %v2968_v28 }
 0xa4d   :  { %v2882_v46 = vadd.f32 %v2881_v21, %v2880_v30  ;;  %v2953_v48 = vrot.slane %v2952_v47, 1  ;;  %v2894_v29 = vadd.f32 %v2893_v4, %v2892_v14  ;;  %v2965_v3 = vrot.slane %v2964_v38, 1 }
 0xa4e   :  { %v2888_v49 = vadd.f32 %v2887_v6, %v2886_v33  ;;  %v2959_v50 = vrot.slane %v2958_v42, 1  ;;  %v2900_v37 = vadd.f32 %v2899_v43, %v2898_v16  ;;  %v2971_v58 = vrot.slane %v2970_v44, 1  ;;  %v2851_v43 = vld [vmem:[#allocation21 + $0x8] sm:$0xff] }
 0xa4f   :  { %v4550_v10 = vmul.f32 0.125, %v2882_v46  ;;  %v2954_v11 = vadd.f32 %v2953_v48, %v2952_v47  ;;  %v4552_v32 = vmul.f32 0.125, %v2894_v29  ;;  %v2966_v19 = vadd.f32 %v2965_v3, %v2964_v38 }
 0xa50   :  { %v4554_v22 = vmul.f32 0.125, %v2888_v49  ;;  %v2960_v62 = vadd.f32 %v2959_v50, %v2958_v42  ;;  %v4556_v35 = vmul.f32 0.125, %v2900_v37  ;;  %v2972_v2 = vadd.f32 %v2971_v58, %v2970_v44 }
 0xa51   :  { %v2983_v1 = vmul.f32 0.125, %v2954_v11  ;;  %v2992_v57 = vmul.f32 %v4550_v10, %v4550_v10  ;;  %v2985_v60 = vmul.f32 0.125, %v2966_v19  ;;  %v2994_v24 = vmul.f32 %v4552_v32, %v4552_v32 }
 0xa52   :  { %v2984_v17 = vmul.f32 0.125, %v2960_v62  ;;  %v2993_v59 = vmul.f32 %v4554_v22, %v4554_v22  ;;  %v2986_v15 = vmul.f32 0.125, %v2972_v2  ;;  %v2995_v34 = vmul.f32 %v4556_v35, %v4556_v35 }
 0xa53   :  { %v3001_v25 = vsub.f32 %v2983_v1, %v2992_v57  ;;  %v3003_v9 = vsub.f32 %v2985_v60, %v2994_v24  ;;  %v3213_v46 = vrot.slane %v2851_v43, %v4277_v5  ;;  %v3217_v48 = vrot.slane %v2851_v43, %v4279_v39 }
 0xa54   :  { %v3002_v56 = vsub.f32 %v2984_v17, %v2993_v59  ;;  %v3004_v26 = vsub.f32 %v2986_v15, %v2995_v34  ;;  %v3221_v29 = vrot.slane %v2851_v43, %v4281_v40  ;;  %v3225_v3 = vrot.slane %v2851_v43, %v4283_v41 }
 0xa55   :  { %v3010_v23 = vmax.f32 %v3001_v25, 0.0  ;;  %v3012_v8 = vmax.f32 %v3003_v9, 0.0  ;;  %v3258_v37 = vrot.slane %v3213_v46, %v4277_v5  ;;  %v3262_v58 = vrot.slane %v3217_v48, %v4277_v5 }
 0xa56   :  { %v3011_v63 = vmax.f32 %v3002_v56, 0.0  ;;  %v3013_v0 = vmax.f32 %v3004_v26, 0.0  ;;  %v3266_v11 = vrot.slane %v3221_v29, %v4277_v5  ;;  %v3270_v19 = vrot.slane %v3225_v3, %v4277_v5 }
 0xa57   :  { %v3019_v27 = vadd.f32 1e-05, %v3010_v23  ;;  %v3021_v28 = vadd.f32 1e-05, %v3012_v8  ;;  %v3093_v41 = vsub.f32 %v4526_v54, %v4550_v10  ;;  %v3095_v1 = vsub.f32 %v4528_v55, %v4552_v32 }
 0xa58   :  { %v3020_v30 = vadd.f32 1e-05, %v3011_v63  ;;  %v3022_v31 = vadd.f32 1e-05, %v3013_v0  ;;  %v3094_v57 = vsub.f32 %v4536_v12, %v4554_v22  ;;  %v3096_v60 = vsub.f32 %v4538_v13, %v4556_v35 }
 0xa59   :  { %3647 = vrsqrt.f32 %v3019_v27 }
 0xa5a   :  { %3649 = vrsqrt.f32 %v3021_v28 }
 0xa5b   :  { %3651 = vrsqrt.f32 %v3020_v30 }
 0xa5c   :  { %3653 = vrsqrt.f32 %v3022_v31 }
 0xa62   :  { %v3468_v14 = vpop.f32.mrb[24].mxu1 }
 0xa63   :  { %v3648_v18 = vpop.eup %3647  ;;  %v3469_v33 = vpop.f32.mrb[25].mxu1 }
 0xa64   :  { %v3650_v61 = vpop.eup %3649  ;;  %v4566_v16 = vadd.f32 %v3469_v33, %v3468_v14  ;;  %v3471_v20 = vpop.f32.mrb[26].mxu1 }
 0xa65   :  { %v3652_v21 = vpop.eup %3651  ;;  %v3472_v47 = vpop.f32.mrb[27].mxu1 }
 0xa66   :  { %v3654_v4 = vpop.eup %3653  ;;  %v3059_v38 = vcombine.low %v3648_v18, %v3652_v21 }
 0xa67   :  { %v3060_v6 = vcombine.low %v3650_v61, %v3654_v4 }
 0xa68   :  { %v3067_v42 = vrot.slane %v3059_v38, %v4275_v36 }
 0xa69   :  { %v3074_v44 = vrot.slane %v3060_v6, %v4275_v36 }
 0xa6b   :  { %v3075_v49 = vcombine.low %v3067_v42, %v3074_v44 }
 0xa6d   :  { %v3087_v50 = vmul.f32 %v3075_v49, %v2851_v43 }
 0xa6f   :  { %v3120_v62 = vrot.slane %v3087_v50, %v4287_v45  ;;  %v3124_v2 = vrot.slane %v3087_v50, %v4293_v51  ;;  %v3128_v39 = vrot.slane %v3087_v50, %v4295_v52  ;;  %v3132_v40 = vrot.slane %v3087_v50, %v4297_v53 }
 0xa71   :  { %v3165_v24 = vrot.slane %v3120_v62, %v4287_v45  ;;  %v3169_v51 = vrot.slane %v3124_v2, %v4287_v45  ;;  %v3173_v52 = vrot.slane %v3128_v39, %v4287_v45  ;;  %v3177_v53 = vrot.slane %v3132_v40, %v4287_v45  ;;  %v2852_v39 = vld [vmem:[#allocation21 + $0x10] sm:$0x3] }
 0xa73   :  { %v3186_v17 = vmul.f32 %v3165_v24, %v3093_v41  ;;  %v3187_v59 = vmul.f32 %v3169_v51, %v3094_v57  ;;  %v3188_v54 = vmul.f32 %v3173_v52, %v3095_v1  ;;  %v3189_v10 = vmul.f32 %v3177_v53, %v3096_v60 }
 0xa74   :  { %v3229_v1 = vrot.slane %v2852_v39, %v4277_v5 }
 0xa75   :  { %v3279_v25 = vadd.f32 %v3258_v37, %v3186_v17  ;;  %v3280_v55 = vadd.f32 %v3262_v58, %v3187_v59  ;;  %v3281_v32 = vadd.f32 %v3266_v11, %v3188_v54  ;;  %v3282_v15 = vadd.f32 %v3270_v19, %v3189_v10 }
 0xa76   :  { %v3274_v51 = vrot.slane %v3229_v1, %v4277_v5 }
 0xa77   :  { %v3298_v12 = vmin.f32 %v3279_v25, 0.0  ;;  %v3299_v22 = vmin.f32 %v3280_v55, 0.0  ;;  %v3300_v34 = vmin.f32 %v3281_v32, 0.0  ;;  %v3301_v13 = vmin.f32 %v3282_v15, 0.0 }
 0xa78   :  { %v3289_v35 = vmax.f32 %v3279_v25, 0.0  ;;  %v3290_v9 = vmax.f32 %v3280_v55, 0.0  ;;  %v3291_v56 = vmax.f32 %v3281_v32, 0.0  ;;  %v3292_v23 = vmax.f32 %v3282_v15, 0.0 }
 0xa79   :  { %v3308_v26 = vmul.f32 %v4508_v7, %v3298_v12  ;;  %v3309_v8 = vmul.f32 %v4508_v7, %v3299_v22  ;;  %v3310_v63 = vmul.f32 %v4508_v7, %v3300_v34  ;;  %v3311_v27 = vmul.f32 %v4508_v7, %v3301_v13 }
 0xa7b   :  { %v3317_v0 = vadd.f32 %v3308_v26, %v3289_v35  ;;  %v3318_v28 = vadd.f32 %v3309_v8, %v3290_v9  ;;  %v3319_v30 = vadd.f32 %v3310_v63, %v3291_v56  ;;  %v3320_v31 = vadd.f32 %v3311_v27, %v3292_v23 }
 0xa7d   :  { %3329 = vst [vmem:[#allocation24 + $0x38] sm:$0xff] %v3320_v31  ;;  %3326 = vst [vmem:[#allocation24 + $0x20] sm:$0xff] %v3317_v0 }
 0xa7e   :  { %3327 = vst [vmem:[#allocation24 + $0x28] sm:$0xff] %v3318_v28  ;;  %3328 = vst [vmem:[#allocation24 + $0x30] sm:$0xff] %v3319_v30 }
 0xa82   :  { %v3490_v14 = vpop.f32.mrb[28].mxu1 }
 0xa83   :  { %v3491_v18 = vpop.f32.mrb[29].mxu1 }
 0xa84   :  { %v3492_v33 = vadd.f32 %v3491_v18, %v3490_v14  ;;  %v3493_v61 = vpop.f32.mrb[30].mxu1 }
 0xa85   :  { %v3494_v20 = vpop.f32.mrb[31].mxu1 }
 0xa86   :  { %v2845_v21 = vadd.f32 %v3492_v33, %v4566_v16 }
 0xa88   :  { %v2901_v47 = vrot.slane %v2845_v21, 4  ;;  %v2924_v4 = vmul.f32 %v2845_v21, %v2845_v21 }
 0xa8a   :  { %v2902_v38 = vadd.f32 %v2901_v47, %v2845_v21  ;;  %v2973_v6 = vrot.slane %v2924_v4, 4 }
 0xa8c   :  { %v2903_v42 = vrot.slane %v2902_v38, 2  ;;  %v2974_v43 = vadd.f32 %v2973_v6, %v2924_v4 }
 0xa8e   :  { %v2904_v44 = vadd.f32 %v2903_v42, %v2902_v38  ;;  %v2975_v46 = vrot.slane %v2974_v43, 2 }
 0xa90   :  { %v2905_v48 = vrot.slane %v2904_v44, 1  ;;  %v2976_v29 = vadd.f32 %v2975_v46, %v2974_v43 }
 0xa92   :  { %v2906_v3 = vadd.f32 %v2905_v48, %v2904_v44  ;;  %v2977_v49 = vrot.slane %v2976_v29, 1 }
 0xa94   :  { %v2915_v50 = vmul.f32 0.125, %v2906_v3  ;;  %v2978_v37 = vadd.f32 %v2977_v49, %v2976_v29 }
 0xa96   :  { %v2987_v58 = vmul.f32 0.125, %v2978_v37  ;;  %v2996_v11 = vmul.f32 %v2915_v50, %v2915_v50  ;;  %v3097_v60 = vsub.f32 %v2845_v21, %v2915_v50 }
 0xa98   :  { %v3005_v19 = vsub.f32 %v2987_v58, %v2996_v11 }
 0xa9a   :  { %v3014_v62 = vmax.f32 %v3005_v19, 0.0 }
 0xa9c   :  { %v3023_v2 = vadd.f32 1e-05, %v3014_v62 }
 0xa9e   :  { %3655 = vrsqrt.f32 %v3023_v2 }
 0xaa8   :  { %v3656_v16 = vpop.eup %3655 }
 0xaa9   :  { %v3082_v40 = vrot.slane %v3656_v16, %v4275_v36 }
 0xaab   :  { %v3088_v41 = vmul.f32 %v3082_v40, %v2852_v39 }
 0xaad   :  { %v3136_v57 = vrot.slane %v3088_v41, %v4287_v45 }
 0xaaf   :  { %v3181_v24 = vrot.slane %v3136_v57, %v4287_v45 }
 0xab1   :  { %v3190_v52 = vmul.f32 %v3181_v24, %v3097_v60 }
 0xab3   :  { %v3283_v53 = vadd.f32 %v3274_v51, %v3190_v52 }
 0xab5   :  { %v3302_v17 = vmin.f32 %v3283_v53, 0.0  ;;  %v3293_v59 = vmax.f32 %v3283_v53, 0.0 }
 0xab7   :  { %v3312_v54 = vmul.f32 %v4508_v7, %v3302_v17 }
 0xab9   :  { %v3321_v10 = vadd.f32 %v3312_v54, %v3293_v59 }
 0xabb   :  { %3330 = vst [vmem:[#allocation24 + $0x40] sm:$0xff] %v3321_v10 }
 0xabc   :  { %3876 = shalt.err (!%p3873_p9)
}
 0xabd   :  { %s3877_s6 = scalar_lea.hbm %s4632_s15, 1152 }
 0xabe   :  { %p3878_p10 = scmp.ne.s32.totalorder %s4632_s15, %s3877_s6  ;;  %p3881_p11 = scmp.lt.u32.totalorder %s3877_s6, %s4632_s15 }
 0xac0   :  { %p3883_p12 = pnand %p3881_p11, %p3878_p10 }
 0xac2   :  { %3886 = shalt.err (!%p3883_p12)
}
 0xac3   :  { %3350 = dma.vmem_to_hbm [thread:$0]  %s3348_s21, 1152, %s4632_s15, [#allocation25]  }
 0xac4   :  { %3909 = dma.done.wait [#allocation11], 128  }
 0xac5   :  { %3910 = vsyncadd [#allocation11], 4294967168 }
 0xac6   :  { %3911 = dma.done.wait [#allocation25], 1152  }
 0xac7   :  { %3912 = vsyncadd [#allocation25], 4294966144 }
 0xac8   :  { %3357 = vsyncpa [#allocation10], 1 }
 0xac9   :  { %3358 = vsyncpa [#allocation14], 1 }
 0xaca   :  { %3359 = vsyncpa [#allocation17], 1 }
 0xacb   :  { %3360 = vsyncpa [#allocation20], 1 }
 0xacc   :  { %3361 = vsyncpa [#allocation11], 1 }
 0xacd   :  { %3362 = vsyncpa [#allocation25], 1 }
 0xace   :  { %3363 = vsyncpa [#allocation12], 1 }
 0xacf   :  { %3364 = vsyncmov [#allocation8] }
 0xad2   :  { %s3365_s27 = vpop.sfrf %3364 }
 0xad3   :  { %p3424_p13 = scmp.ne.s32.totalorder %s3365_s27, 0 }
 0xad5   :  { %3369 = shalt.err (%p3424_p13)  }
 0xad6   :  { %3371 = vsyncmov [#allocation8 + $0x1] }
 0xad9   :  { %s3372_s4 = vpop.sfrf %3371 }
 0xada   :  { %p3425_p0 = scmp.ne.s32.totalorder %s3372_s4, 0 }
 0xadc   :  { %3376 = shalt.err (%p3425_p0)  }
 0xadd   :  { %3378 = vsyncmov [#allocation8 + $0x2] }
 0xae0   :  { %s3379_s15 = vpop.sfrf %3378 }
 0xae1   :  { %p3426_p1 = scmp.ne.s32.totalorder %s3379_s15, 0 }
 0xae3   :  { %3383 = shalt.err (%p3426_p1)  }
 0xae4   :  { %3385 = vsyncmov [#allocation8 + $0x3] }
 0xae7   :  { %s3386_s24 = vpop.sfrf %3385 }
 0xae8   :  { %p3427_p2 = scmp.ne.s32.totalorder %s3386_s24, 0 }
 0xaea   :  { %3390 = shalt.err (%p3427_p2)  }
 0xaeb   :  { %3392 = vsyncmov [#allocation8 + $0x4] }
 0xaee   :  { %s3393_s13 = vpop.sfrf %3392 }
 0xaef   :  { %p3428_p3 = scmp.ne.s32.totalorder %s3393_s13, 0 }
 0xaf1   :  { %3397 = shalt.err (%p3428_p3)  }
 0xaf2   :  { %3399 = vsyncmov [#allocation8 + $0x5] }
 0xaf5   :  { %s3400_s7 = vpop.sfrf %3399 }
 0xaf6   :  { %p3429_p4 = scmp.ne.s32.totalorder %s3400_s7, 0 }
 0xaf8   :  { %3404 = shalt.err (%p3429_p4)  }

</bundles_post_ra>
